<compile_context>
chip_gen: v6e
topology: v6e:2x2x1
jax: 0.10.0
libtpu: 0.0.40
codegen_flags: <defaults>
</compile_context>

<pallas_src>
import functools

import numpy as np
import jax
import jax.numpy as jnp
from jax.experimental import pallas as pl
from jax.experimental.pallas import tpu as pltpu

D_IN = 768   # nn.Linear(768, 512)
D_HID = 512


def _posterior_rank_kernel(sn_ref,        # SMEM (B,) int32     (scalar prefetch)
                           sent_ref,      # VMEM (B*S, 768) f32
                           resp_t_ref,    # VMEM (768, B*T) f32 (pre-transposed)
                           wk_ref,        # VMEM (768, 512) bf16 (Wk^T)
                           bk_ref,        # VMEM (1, 512)   f32
                           wq_ref,        # VMEM (512, 768) bf16 (Wq, native layout)
                           bq_ref,        # VMEM (512, 1)   f32
                           out_ref,       # VMEM (B, S, TPAD) f32
                           *, B, S, T, TPAD):
    f32 = jnp.float32

    # In-kernel bf16 casts (VPU, rides spare slots; avoids standalone cast HLOs).
    sent_bf = sent_ref[...].astype(jnp.bfloat16)        # (B*S, 768)
    resp_t_bf = resp_t_ref[...].astype(jnp.bfloat16)    # (768, B*T)

    # Fused projections: batch folded into the matmul M/N dims, bf16 MXU operands
    # with f32 accumulation; bias adds stay f32 on the VPU.
    k2 = jnp.dot(sent_bf, wk_ref[...],
                 preferred_element_type=f32) + bk_ref[...]          # (B*S, 512) f32
    # Query produced already transposed: q2^T = Wq @ resp^T + bq, so the score dot
    # below is a plain (M,K)@(K,N) with no transposes (no XLU work, no VMEM copies).
    q2t = jnp.dot(wq_ref[...], resp_t_bf,
                  preferred_element_type=f32) + bq_ref[...]         # (512, B*T) f32

    # One score matmul covering all batches; only the B diagonal (S,T) blocks are
    # used downstream (the extra FLOPs are negligible at this size).
    scores_all = jnp.dot(k2, q2t, preferred_element_type=f32)       # (B*S, B*T) f32

    # Block-diagonal 0/1 selection matrix built on-chip (iota + cmp, no division):
    # one matmul moves every per-batch (S,T) block into a lane-dense (S,TPAD) slab
    # so every output store is an unmasked full-width vst.
    pr = jax.lax.broadcasted_iota(jnp.int32, (B * T, 1), 0)         # row id b*T + t
    tgt_col = jnp.zeros((B * T, 1), jnp.int32)
    for b in range(B):                                              # B tiny & static
        in_b = (pr >= b * T) & (pr < (b + 1) * T)
        tgt_col = jnp.where(in_b, pr + b * (TPAD - T), tgt_col)     # -> b*TPAD + t
    pc = jax.lax.broadcasted_iota(jnp.int32, (B * T, B * TPAD), 1)
    psel = (pc == tgt_col).astype(f32)                              # (B*T, B*TPAD)
    widened = jnp.dot(scores_all, psel,
                      preferred_element_type=f32)                   # (B*S, B*TPAD)

    # Mask built in-kernel from prefetched sentence_num scalars (SMEM), mirroring
    # torch's right-aligned broadcast: same (S,T) mask, indexed by sentence axis s,
    # added to every batch.  Columns >= T are sliced away by the wrapper.
    row = jax.lax.broadcasted_iota(jnp.int32, (S, 1), 0)
    thresh = jnp.zeros((S, 1), jnp.int32)
    for s in range(S):                                              # S tiny & static
        thresh = jnp.where(row == s, sn_ref[s], thresh)
    col = jax.lax.broadcasted_iota(jnp.int32, (S, TPAD), 1)
    mask = jnp.where(thresh > col, f32(0.0), f32(-2000.0))          # (S, TPAD)

    # Per-batch lane-dense stores; the slices land exactly on (8,128) vreg tiles.
    for b in range(B):
        blk = widened[b * S:(b + 1) * S, b * TPAD:(b + 1) * TPAD]   # (S, TPAD)
        out_ref[b] = blk + mask


def prepare_params(wq, bq, wk, bk):
    """One-time parameter prep (outside the hot path).

    Wk is pre-transposed to (768, 512) so the key projection is a plain dot; Wq is
    kept in its native nn.Linear (512, 768) layout because the kernel computes the
    query already transposed (Wq @ resp^T).  MXU operands are cast to bf16 once;
    biases stay f32.
    """
    wk_t = jnp.asarray(wk, jnp.float32).T.astype(jnp.bfloat16)       # (768, 512)
    bk_row = jnp.asarray(bk, jnp.float32).reshape(1, D_HID)          # (1, 512)
    wq_bf = jnp.asarray(wq, jnp.float32).astype(jnp.bfloat16)        # (512, 768)
    bq_col = jnp.asarray(bq, jnp.float32).reshape(D_HID, 1)          # (512, 1)
    return wk_t, bk_row, wq_bf, bq_col


@jax.jit
def _masked_scores(all_sentence_hidden, target_response_hidden, sentence_num,
                   prepared):
    """Pallas hot path: both projections + bmm + mask add -> (B, S, T) scores."""
    wk_t, bk_row, wq_bf, bq_col = prepared
    B, S, d_in = all_sentence_hidden.shape
    _, T, _ = target_response_hidden.shape
    assert d_in == D_IN
    # torch's in-place `scores += mask_num` only type-checks when B == S and
    # max(sentence_num) == T, so T is used as the statically-known mask width
    # (no host sync on sentence_num values).
    assert B == S, "torch broadcast requires B == S (and max(sentence_num) == T)"

    TPAD = ((T + 127) // 128) * 128

    sent2 = all_sentence_hidden.reshape(B * S, D_IN)                 # (B*S, 768) f32
    resp2t = target_response_hidden.reshape(B * T, D_IN).T           # (768, B*T) f32
    sn = sentence_num.astype(jnp.int32)

    kernel = functools.partial(_posterior_rank_kernel, B=B, S=S, T=T, TPAD=TPAD)

    out_pad = pl.pallas_call(
        kernel,
        out_shape=jax.ShapeDtypeStruct((B, S, TPAD), jnp.float32),
        grid_spec=pltpu.PrefetchScalarGridSpec(
            num_scalar_prefetch=1,                                   # sentence_num -> SMEM
            grid=(1,),
            in_specs=[
                pl.BlockSpec((B * S, D_IN), lambda i, _: (0, 0)),    # sentences (f32)
                pl.BlockSpec((D_IN, B * T), lambda i, _: (0, 0)),    # responses^T (f32)
                pl.BlockSpec((D_IN, D_HID), lambda i, _: (0, 0)),    # Wk^T (bf16)
                pl.BlockSpec((1, D_HID), lambda i, _: (0, 0)),       # bk (f32)
                pl.BlockSpec((D_HID, D_IN), lambda i, _: (0, 0)),    # Wq (bf16)
                pl.BlockSpec((D_HID, 1), lambda i, _: (0, 0)),       # bq (f32)
            ],
            out_specs=pl.BlockSpec((B, S, TPAD), lambda i, _: (0, 0, 0)),
        ),
        compiler_params=pltpu.CompilerParams(
            dimension_semantics=("arbitrary",),
            vmem_limit_bytes=32 * 1024 * 1024),
    )(sn, sent2, resp2t, wk_t, bk_row, wq_bf, bq_col)

    return out_pad[:, :, :T]      # lane-dense slab -> (B, S, T); fused under jit


def posterior_rank_net_forward(all_sentence_hidden, target_response_hidden,
                               sentence_num, prepared):
    """Full module forward (returns what the PyTorch module returns).

    torch.softmax(scores.unsqueeze(-1), dim=-1) is a softmax over a size-1 axis,
    i.e. identically 1.0, so it is emitted directly (mathematically identical,
    per perf review) after the kernel computes the masked scores.
    """
    scores = _masked_scores(all_sentence_hidden, target_response_hidden,
                            sentence_num, prepared)
    return jnp.ones(scores.shape + (1,), scores.dtype)


def _reference_scores(sent, resp, sentence_num, params_f32):
    """Pure-JAX f32 reference of the pre-softmax scores (validation only)."""
    wq, bq, wk, bk = params_f32
    q = resp @ wq.T + bq                                             # (B, T, 512)
    k = sent @ wk.T + bk                                             # (B, S, 512)
    scores = jnp.einsum("bsh,bth->bst", k, q)                        # (B, S, T)
    B = sent.shape[0]
    smax = int(np.max(np.asarray(sentence_num)))                     # reference only
    compare = jnp.arange(smax, dtype=sentence_num.dtype)[None, :]
    mask = (sentence_num[:, None] > jnp.broadcast_to(compare, (B, smax))).astype(jnp.int32)
    mask_num = (1 - mask).astype(jnp.float32) * -2000.0
    return scores + mask_num                                         # same broadcast as torch


if __name__ == "__main__":
    # B == S == T == max(sentence_num) (required by the module's in-place broadcast).
    B = S = T = 8
    key = jax.random.PRNGKey(0)
    k1, k2, k3, k4, k5, k6 = jax.random.split(key, 6)

    all_sentence_hidden = jax.random.normal(k1, (B, S, D_IN), dtype=jnp.float32)
    target_response_hidden = jax.random.normal(k2, (B, T, D_IN), dtype=jnp.float32)
    sentence_num = jnp.array([8, 5, 8, 3, 8, 6, 7, 2], dtype=jnp.int32)  # max == 8 == T

    # deterministic parameter init (shapes from nn.Linear(768, 512))
    bound = 1.0 / np.sqrt(D_IN)
    wq = jax.random.uniform(k3, (D_HID, D_IN), jnp.float32, -bound, bound)
    bq = jax.random.uniform(k4, (D_HID,), jnp.float32, -bound, bound)
    wk = jax.random.uniform(k5, (D_HID, D_IN), jnp.float32, -bound, bound)
    bk = jax.random.uniform(k6, (D_HID,), jnp.float32, -bound, bound)
    params_f32 = (wq, bq, wk, bk)

    # one-time weight prep (pre-transpose + bf16 cast), outside the hot path
    prepared = prepare_params(wq, bq, wk, bk)
    prepared = jax.block_until_ready(prepared)

    # run jitted kernel (hot path) and full forward
    scores = _masked_scores(all_sentence_hidden, target_response_hidden,
                            sentence_num, prepared)
    out = posterior_rank_net_forward(all_sentence_hidden, target_response_hidden,
                                     sentence_num, prepared)
    jax.block_until_ready(scores)
    jax.block_until_ready(out)

    # validate against pure-JAX f32 reference (tolerance loosened for bf16 MXU operands)
    ref_scores = _reference_scores(all_sentence_hidden, target_response_hidden,
                                   sentence_num, params_f32)
    np.testing.assert_allclose(np.asarray(scores), np.asarray(ref_scores),
                               rtol=2e-2, atol=0.5)
    assert out.shape == (B, S, T, 1)
    np.testing.assert_allclose(np.asarray(out), np.ones((B, S, T, 1), np.float32),
                               rtol=0, atol=1e-6)

    print("KERNEL_OK")
</pallas_src>

<mosaic_0001>
module attributes {stable_mosaic.version = 11 : i64} {
  func.func @_posterior_rank_kernel(%arg0: i32, %arg1: memref<8xi32, #tpu.memory_space<smem>>, %arg2: memref<64x768xf32, #tpu.memory_space<vmem>>, %arg3: memref<768x64xf32, #tpu.memory_space<vmem>>, %arg4: memref<768x512xbf16, #tpu.memory_space<vmem>>, %arg5: memref<1x512xf32, #tpu.memory_space<vmem>>, %arg6: memref<512x768xbf16, #tpu.memory_space<vmem>>, %arg7: memref<512x1xf32, #tpu.memory_space<vmem>>, %arg8: memref<8x8x128xf32, #tpu.memory_space<vmem>>) attributes {dimension_semantics = [#tpu.dimension_semantics<arbitrary>], iteration_bounds = array<i64: 1>, scalar_prefetch = 1 : i64, scratch_operands = 0 : i64, tpu.core_type = #tpu.core_type<tc>, window_params = [{pipeline_mode = #tpu.pipeline_mode<synchronous>, transform_indices = @transform_0, window_bounds = array<i64: 64, 768>}, {pipeline_mode = #tpu.pipeline_mode<synchronous>, transform_indices = @transform_1, window_bounds = array<i64: 768, 64>}, {pipeline_mode = #tpu.pipeline_mode<synchronous>, transform_indices = @transform_2, window_bounds = array<i64: 768, 512>}, {pipeline_mode = #tpu.pipeline_mode<synchronous>, transform_indices = @transform_3, window_bounds = array<i64: 1, 512>}, {pipeline_mode = #tpu.pipeline_mode<synchronous>, transform_indices = @transform_4, window_bounds = array<i64: 512, 768>}, {pipeline_mode = #tpu.pipeline_mode<synchronous>, transform_indices = @transform_5, window_bounds = array<i64: 512, 1>}, {pipeline_mode = #tpu.pipeline_mode<synchronous>, transform_indices = @transform_6, window_bounds = array<i64: 8, 8, 128>}]} {
    %c0 = arith.constant 0 : index
    %c0_0 = arith.constant 0 : index
    %0 = vector.load %arg2[%c0, %c0_0] : memref<64x768xf32, #tpu.memory_space<vmem>>, vector<64x768xf32>
    %1 = arith.truncf %0 : vector<64x768xf32> to vector<64x768xbf16>
    %c0_1 = arith.constant 0 : index
    %c0_2 = arith.constant 0 : index
    %2 = vector.load %arg3[%c0_1, %c0_2] : memref<768x64xf32, #tpu.memory_space<vmem>>, vector<768x64xf32>
    %3 = arith.truncf %2 : vector<768x64xf32> to vector<768x64xbf16>
    %c0_3 = arith.constant 0 : index
    %c0_4 = arith.constant 0 : index
    %4 = vector.load %arg4[%c0_3, %c0_4] : memref<768x512xbf16, #tpu.memory_space<vmem>>, vector<768x512xbf16>
    %cst = arith.constant dense<0.000000e+00> : vector<64x512xf32>
    %5 = tpu.matmul %1, %4, %cst {dimension_numbers = #tpu.dot_dimension_numbers<[1], [0], [0], [1], [0, 0, 1, 1], [], []>} : vector<64x768xbf16>, vector<768x512xbf16>, vector<64x512xf32> -> vector<64x512xf32>
    %c0_5 = arith.constant 0 : index
    %c0_6 = arith.constant 0 : index
    %6 = vector.load %arg5[%c0_5, %c0_6] : memref<1x512xf32, #tpu.memory_space<vmem>>, vector<1x512xf32>
    %7 = vector.broadcast %6 : vector<1x512xf32> to vector<64x512xf32>
    %8 = arith.addf %5, %7 : vector<64x512xf32>
    %c0_7 = arith.constant 0 : index
    %c0_8 = arith.constant 0 : index
    %9 = vector.load %arg6[%c0_7, %c0_8] : memref<512x768xbf16, #tpu.memory_space<vmem>>, vector<512x768xbf16>
    %cst_9 = arith.constant dense<0.000000e+00> : vector<512x64xf32>
    %10 = tpu.matmul %9, %3, %cst_9 {dimension_numbers = #tpu.dot_dimension_numbers<[1], [0], [0], [1], [0, 0, 1, 1], [], []>} : vector<512x768xbf16>, vector<768x64xbf16>, vector<512x64xf32> -> vector<512x64xf32>
    %c0_10 = arith.constant 0 : index
    %c0_11 = arith.constant 0 : index
    %11 = vector.load %arg7[%c0_10, %c0_11] : memref<512x1xf32, #tpu.memory_space<vmem>>, vector<512x1xf32>
    %12 = vector.broadcast %11 : vector<512x1xf32> to vector<512x64xf32>
    %13 = arith.addf %10, %12 : vector<512x64xf32>
    %cst_12 = arith.constant dense<0.000000e+00> : vector<64x64xf32>
    %14 = tpu.matmul %8, %13, %cst_12 {dimension_numbers = #tpu.dot_dimension_numbers<[1], [0], [0], [1], [0, 0, 1, 1], [], []>} : vector<64x512xf32>, vector<512x64xf32>, vector<64x64xf32> -> vector<64x64xf32>
    %15 = tpu.iota {dimensions = array<i32: 0>} : vector<64x1xi32>
    %c0_i32 = arith.constant 0 : i32
    %16 = vector.broadcast %c0_i32 : i32 to vector<64x1xi32>
    %c0_i32_13 = arith.constant 0 : i32
    %17 = vector.broadcast %c0_i32_13 : i32 to vector<64x1xi32>
    %18 = arith.cmpi sge, %15, %17 : vector<64x1xi32>
    %c8_i32 = arith.constant 8 : i32
    %19 = vector.broadcast %c8_i32 : i32 to vector<64x1xi32>
    %20 = arith.cmpi slt, %15, %19 : vector<64x1xi32>
    %21 = arith.andi %18, %20 : vector<64x1xi1>
    %c0_i32_14 = arith.constant 0 : i32
    %22 = vector.broadcast %c0_i32_14 : i32 to vector<64x1xi32>
    %23 = arith.addi %15, %22 : vector<64x1xi32>
    %24 = arith.select %21, %23, %16 : vector<64x1xi1>, vector<64x1xi32>
    %c8_i32_15 = arith.constant 8 : i32
    %25 = vector.broadcast %c8_i32_15 : i32 to vector<64x1xi32>
    %26 = arith.cmpi sge, %15, %25 : vector<64x1xi32>
    %c16_i32 = arith.constant 16 : i32
    %27 = vector.broadcast %c16_i32 : i32 to vector<64x1xi32>
    %28 = arith.cmpi slt, %15, %27 : vector<64x1xi32>
    %29 = arith.andi %26, %28 : vector<64x1xi1>
    %c120_i32 = arith.constant 120 : i32
    %30 = vector.broadcast %c120_i32 : i32 to vector<64x1xi32>
    %31 = arith.addi %15, %30 : vector<64x1xi32>
    %32 = arith.select %29, %31, %24 : vector<64x1xi1>, vector<64x1xi32>
    %c16_i32_16 = arith.constant 16 : i32
    %33 = vector.broadcast %c16_i32_16 : i32 to vector<64x1xi32>
    %34 = arith.cmpi sge, %15, %33 : vector<64x1xi32>
    %c24_i32 = arith.constant 24 : i32
    %35 = vector.broadcast %c24_i32 : i32 to vector<64x1xi32>
    %36 = arith.cmpi slt, %15, %35 : vector<64x1xi32>
    %37 = arith.andi %34, %36 : vector<64x1xi1>
    %c240_i32 = arith.constant 240 : i32
    %38 = vector.broadcast %c240_i32 : i32 to vector<64x1xi32>
    %39 = arith.addi %15, %38 : vector<64x1xi32>
    %40 = arith.select %37, %39, %32 : vector<64x1xi1>, vector<64x1xi32>
    %c24_i32_17 = arith.constant 24 : i32
    %41 = vector.broadcast %c24_i32_17 : i32 to vector<64x1xi32>
    %42 = arith.cmpi sge, %15, %41 : vector<64x1xi32>
    %c32_i32 = arith.constant 32 : i32
    %43 = vector.broadcast %c32_i32 : i32 to vector<64x1xi32>
    %44 = arith.cmpi slt, %15, %43 : vector<64x1xi32>
    %45 = arith.andi %42, %44 : vector<64x1xi1>
    %c360_i32 = arith.constant 360 : i32
    %46 = vector.broadcast %c360_i32 : i32 to vector<64x1xi32>
    %47 = arith.addi %15, %46 : vector<64x1xi32>
    %48 = arith.select %45, %47, %40 : vector<64x1xi1>, vector<64x1xi32>
    %c32_i32_18 = arith.constant 32 : i32
    %49 = vector.broadcast %c32_i32_18 : i32 to vector<64x1xi32>
    %50 = arith.cmpi sge, %15, %49 : vector<64x1xi32>
    %c40_i32 = arith.constant 40 : i32
    %51 = vector.broadcast %c40_i32 : i32 to vector<64x1xi32>
    %52 = arith.cmpi slt, %15, %51 : vector<64x1xi32>
    %53 = arith.andi %50, %52 : vector<64x1xi1>
    %c480_i32 = arith.constant 480 : i32
    %54 = vector.broadcast %c480_i32 : i32 to vector<64x1xi32>
    %55 = arith.addi %15, %54 : vector<64x1xi32>
    %56 = arith.select %53, %55, %48 : vector<64x1xi1>, vector<64x1xi32>
    %c40_i32_19 = arith.constant 40 : i32
    %57 = vector.broadcast %c40_i32_19 : i32 to vector<64x1xi32>
    %58 = arith.cmpi sge, %15, %57 : vector<64x1xi32>
    %c48_i32 = arith.constant 48 : i32
    %59 = vector.broadcast %c48_i32 : i32 to vector<64x1xi32>
    %60 = arith.cmpi slt, %15, %59 : vector<64x1xi32>
    %61 = arith.andi %58, %60 : vector<64x1xi1>
    %c600_i32 = arith.constant 600 : i32
    %62 = vector.broadcast %c600_i32 : i32 to vector<64x1xi32>
    %63 = arith.addi %15, %62 : vector<64x1xi32>
    %64 = arith.select %61, %63, %56 : vector<64x1xi1>, vector<64x1xi32>
    %c48_i32_20 = arith.constant 48 : i32
    %65 = vector.broadcast %c48_i32_20 : i32 to vector<64x1xi32>
    %66 = arith.cmpi sge, %15, %65 : vector<64x1xi32>
    %c56_i32 = arith.constant 56 : i32
    %67 = vector.broadcast %c56_i32 : i32 to vector<64x1xi32>
    %68 = arith.cmpi slt, %15, %67 : vector<64x1xi32>
    %69 = arith.andi %66, %68 : vector<64x1xi1>
    %c720_i32 = arith.constant 720 : i32
    %70 = vector.broadcast %c720_i32 : i32 to vector<64x1xi32>
    %71 = arith.addi %15, %70 : vector<64x1xi32>
    %72 = arith.select %69, %71, %64 : vector<64x1xi1>, vector<64x1xi32>
    %c56_i32_21 = arith.constant 56 : i32
    %73 = vector.broadcast %c56_i32_21 : i32 to vector<64x1xi32>
    %74 = arith.cmpi sge, %15, %73 : vector<64x1xi32>
    %c64_i32 = arith.constant 64 : i32
    %75 = vector.broadcast %c64_i32 : i32 to vector<64x1xi32>
    %76 = arith.cmpi slt, %15, %75 : vector<64x1xi32>
    %77 = arith.andi %74, %76 : vector<64x1xi1>
    %c840_i32 = arith.constant 840 : i32
    %78 = vector.broadcast %c840_i32 : i32 to vector<64x1xi32>
    %79 = arith.addi %15, %78 : vector<64x1xi32>
    %80 = arith.select %77, %79, %72 : vector<64x1xi1>, vector<64x1xi32>
    %81 = tpu.iota {dimensions = array<i32: 1>} : vector<64x1024xi32>
    %82 = vector.broadcast %80 : vector<64x1xi32> to vector<64x1024xi32>
    %83 = arith.cmpi eq, %81, %82 : vector<64x1024xi32>
    %84 = arith.extui %83 : vector<64x1024xi1> to vector<64x1024xi32>
    %85 = arith.sitofp %84 : vector<64x1024xi32> to vector<64x1024xf32>
    %cst_22 = arith.constant dense<0.000000e+00> : vector<64x1024xf32>
    %86 = tpu.matmul %14, %85, %cst_22 {dimension_numbers = #tpu.dot_dimension_numbers<[1], [0], [0], [1], [0, 0, 1, 1], [], []>} : vector<64x64xf32>, vector<64x1024xf32>, vector<64x1024xf32> -> vector<64x1024xf32>
    %87 = tpu.iota {dimensions = array<i32: 0>} : vector<8x1xi32>
    %c0_i32_23 = arith.constant 0 : i32
    %88 = vector.broadcast %c0_i32_23 : i32 to vector<8x1xi32>
    %c0_i32_24 = arith.constant 0 : i32
    %89 = vector.broadcast %c0_i32_24 : i32 to vector<8x1xi32>
    %90 = arith.cmpi eq, %87, %89 : vector<8x1xi32>
    %c0_25 = arith.constant 0 : index
    %91 = memref.load %arg1[%c0_25] : memref<8xi32, #tpu.memory_space<smem>>
    %92 = vector.broadcast %91 : i32 to vector<8x1xi32>
    %93 = arith.select %90, %92, %88 : vector<8x1xi1>, vector<8x1xi32>
    %c1_i32 = arith.constant 1 : i32
    %94 = vector.broadcast %c1_i32 : i32 to vector<8x1xi32>
    %95 = arith.cmpi eq, %87, %94 : vector<8x1xi32>
    %c1 = arith.constant 1 : index
    %96 = memref.load %arg1[%c1] : memref<8xi32, #tpu.memory_space<smem>>
    %97 = vector.broadcast %96 : i32 to vector<8x1xi32>
    %98 = arith.select %95, %97, %93 : vector<8x1xi1>, vector<8x1xi32>
    %c2_i32 = arith.constant 2 : i32
    %99 = vector.broadcast %c2_i32 : i32 to vector<8x1xi32>
    %100 = arith.cmpi eq, %87, %99 : vector<8x1xi32>
    %c2 = arith.constant 2 : index
    %101 = memref.load %arg1[%c2] : memref<8xi32, #tpu.memory_space<smem>>
    %102 = vector.broadcast %101 : i32 to vector<8x1xi32>
    %103 = arith.select %100, %102, %98 : vector<8x1xi1>, vector<8x1xi32>
    %c3_i32 = arith.constant 3 : i32
    %104 = vector.broadcast %c3_i32 : i32 to vector<8x1xi32>
    %105 = arith.cmpi eq, %87, %104 : vector<8x1xi32>
    %c3 = arith.constant 3 : index
    %106 = memref.load %arg1[%c3] : memref<8xi32, #tpu.memory_space<smem>>
    %107 = vector.broadcast %106 : i32 to vector<8x1xi32>
    %108 = arith.select %105, %107, %103 : vector<8x1xi1>, vector<8x1xi32>
    %c4_i32 = arith.constant 4 : i32
    %109 = vector.broadcast %c4_i32 : i32 to vector<8x1xi32>
    %110 = arith.cmpi eq, %87, %109 : vector<8x1xi32>
    %c4 = arith.constant 4 : index
    %111 = memref.load %arg1[%c4] : memref<8xi32, #tpu.memory_space<smem>>
    %112 = vector.broadcast %111 : i32 to vector<8x1xi32>
    %113 = arith.select %110, %112, %108 : vector<8x1xi1>, vector<8x1xi32>
    %c5_i32 = arith.constant 5 : i32
    %114 = vector.broadcast %c5_i32 : i32 to vector<8x1xi32>
    %115 = arith.cmpi eq, %87, %114 : vector<8x1xi32>
    %c5 = arith.constant 5 : index
    %116 = memref.load %arg1[%c5] : memref<8xi32, #tpu.memory_space<smem>>
    %117 = vector.broadcast %116 : i32 to vector<8x1xi32>
    %118 = arith.select %115, %117, %113 : vector<8x1xi1>, vector<8x1xi32>
    %c6_i32 = arith.constant 6 : i32
    %119 = vector.broadcast %c6_i32 : i32 to vector<8x1xi32>
    %120 = arith.cmpi eq, %87, %119 : vector<8x1xi32>
    %c6 = arith.constant 6 : index
    %121 = memref.load %arg1[%c6] : memref<8xi32, #tpu.memory_space<smem>>
    %122 = vector.broadcast %121 : i32 to vector<8x1xi32>
    %123 = arith.select %120, %122, %118 : vector<8x1xi1>, vector<8x1xi32>
    %c7_i32 = arith.constant 7 : i32
    %124 = vector.broadcast %c7_i32 : i32 to vector<8x1xi32>
    %125 = arith.cmpi eq, %87, %124 : vector<8x1xi32>
    %c7 = arith.constant 7 : index
    %126 = memref.load %arg1[%c7] : memref<8xi32, #tpu.memory_space<smem>>
    %127 = vector.broadcast %126 : i32 to vector<8x1xi32>
    %128 = arith.select %125, %127, %123 : vector<8x1xi1>, vector<8x1xi32>
    %129 = tpu.iota {dimensions = array<i32: 1>} : vector<8x128xi32>
    %130 = vector.broadcast %128 : vector<8x1xi32> to vector<8x128xi32>
    %131 = arith.cmpi sgt, %130, %129 : vector<8x128xi32>
    %cst_26 = arith.constant 0.000000e+00 : f32
    %cst_27 = arith.constant -2.000000e+03 : f32
    %132 = vector.broadcast %cst_26 : f32 to vector<8x128xf32>
    %133 = vector.broadcast %cst_27 : f32 to vector<8x128xf32>
    %134 = arith.select %131, %132, %133 : vector<8x128xi1>, vector<8x128xf32>
    %135 = vector.extract_strided_slice %86 {offsets = [0, 0], sizes = [8, 128], strides = [1, 1]} : vector<64x1024xf32> to vector<8x128xf32>
    %136 = arith.addf %135, %134 : vector<8x128xf32>
    %c0_28 = arith.constant 0 : index
    %c0_29 = arith.constant 0 : index
    %c0_30 = arith.constant 0 : index
    %137 = vector.load %arg8[%c0_28, %c0_29, %c0_30] : memref<8x8x128xf32, #tpu.memory_space<vmem>>, vector<1x8x128xf32>
    %138 = vector.shape_cast %137 : vector<1x8x128xf32> to vector<8x128xf32>
    %139 = vector.shape_cast %136 : vector<8x128xf32> to vector<1x8x128xf32>
    tpu.vector_store %arg8[%c0_28, %c0_29, %c0_30], %139 {strides = array<i32>} : memref<8x8x128xf32, #tpu.memory_space<vmem>>, vector<1x8x128xf32>,
    %140 = vector.extract_strided_slice %86 {offsets = [8, 128], sizes = [8, 128], strides = [1, 1]} : vector<64x1024xf32> to vector<8x128xf32>
    %141 = arith.addf %140, %134 : vector<8x128xf32>
    %c1_31 = arith.constant 1 : index
    %c0_32 = arith.constant 0 : index
    %c0_33 = arith.constant 0 : index
    %142 = vector.load %arg8[%c1_31, %c0_32, %c0_33] : memref<8x8x128xf32, #tpu.memory_space<vmem>>, vector<1x8x128xf32>
    %143 = vector.shape_cast %142 : vector<1x8x128xf32> to vector<8x128xf32>
    %144 = vector.shape_cast %141 : vector<8x128xf32> to vector<1x8x128xf32>
    tpu.vector_store %arg8[%c1_31, %c0_32, %c0_33], %144 {strides = array<i32>} : memref<8x8x128xf32, #tpu.memory_space<vmem>>, vector<1x8x128xf32>,
    %145 = vector.extract_strided_slice %86 {offsets = [16, 256], sizes = [8, 128], strides = [1, 1]} : vector<64x1024xf32> to vector<8x128xf32>
    %146 = arith.addf %145, %134 : vector<8x128xf32>
    %c2_34 = arith.constant 2 : index
    %c0_35 = arith.constant 0 : index
    %c0_36 = arith.constant 0 : index
    %147 = vector.load %arg8[%c2_34, %c0_35, %c0_36] : memref<8x8x128xf32, #tpu.memory_space<vmem>>, vector<1x8x128xf32>
    %148 = vector.shape_cast %147 : vector<1x8x128xf32> to vector<8x128xf32>
    %149 = vector.shape_cast %146 : vector<8x128xf32> to vector<1x8x128xf32>
    tpu.vector_store %arg8[%c2_34, %c0_35, %c0_36], %149 {strides = array<i32>} : memref<8x8x128xf32, #tpu.memory_space<vmem>>, vector<1x8x128xf32>,
    %150 = vector.extract_strided_slice %86 {offsets = [24, 384], sizes = [8, 128], strides = [1, 1]} : vector<64x1024xf32> to vector<8x128xf32>
    %151 = arith.addf %150, %134 : vector<8x128xf32>
    %c3_37 = arith.constant 3 : index
    %c0_38 = arith.constant 0 : index
    %c0_39 = arith.constant 0 : index
    %152 = vector.load %arg8[%c3_37, %c0_38, %c0_39] : memref<8x8x128xf32, #tpu.memory_space<vmem>>, vector<1x8x128xf32>
    %153 = vector.shape_cast %152 : vector<1x8x128xf32> to vector<8x128xf32>
    %154 = vector.shape_cast %151 : vector<8x128xf32> to vector<1x8x128xf32>
    tpu.vector_store %arg8[%c3_37, %c0_38, %c0_39], %154 {strides = array<i32>} : memref<8x8x128xf32, #tpu.memory_space<vmem>>, vector<1x8x128xf32>,
    %155 = vector.extract_strided_slice %86 {offsets = [32, 512], sizes = [8, 128], strides = [1, 1]} : vector<64x1024xf32> to vector<8x128xf32>
    %156 = arith.addf %155, %134 : vector<8x128xf32>
    %c4_40 = arith.constant 4 : index
    %c0_41 = arith.constant 0 : index
    %c0_42 = arith.constant 0 : index
    %157 = vector.load %arg8[%c4_40, %c0_41, %c0_42] : memref<8x8x128xf32, #tpu.memory_space<vmem>>, vector<1x8x128xf32>
    %158 = vector.shape_cast %157 : vector<1x8x128xf32> to vector<8x128xf32>
    %159 = vector.shape_cast %156 : vector<8x128xf32> to vector<1x8x128xf32>
    tpu.vector_store %arg8[%c4_40, %c0_41, %c0_42], %159 {strides = array<i32>} : memref<8x8x128xf32, #tpu.memory_space<vmem>>, vector<1x8x128xf32>,
    %160 = vector.extract_strided_slice %86 {offsets = [40, 640], sizes = [8, 128], strides = [1, 1]} : vector<64x1024xf32> to vector<8x128xf32>
    %161 = arith.addf %160, %134 : vector<8x128xf32>
    %c5_43 = arith.constant 5 : index
    %c0_44 = arith.constant 0 : index
    %c0_45 = arith.constant 0 : index
    %162 = vector.load %arg8[%c5_43, %c0_44, %c0_45] : memref<8x8x128xf32, #tpu.memory_space<vmem>>, vector<1x8x128xf32>
    %163 = vector.shape_cast %162 : vector<1x8x128xf32> to vector<8x128xf32>
    %164 = vector.shape_cast %161 : vector<8x128xf32> to vector<1x8x128xf32>
    tpu.vector_store %arg8[%c5_43, %c0_44, %c0_45], %164 {strides = array<i32>} : memref<8x8x128xf32, #tpu.memory_space<vmem>>, vector<1x8x128xf32>,
    %165 = vector.extract_strided_slice %86 {offsets = [48, 768], sizes = [8, 128], strides = [1, 1]} : vector<64x1024xf32> to vector<8x128xf32>
    %166 = arith.addf %165, %134 : vector<8x128xf32>
    %c6_46 = arith.constant 6 : index
    %c0_47 = arith.constant 0 : index
    %c0_48 = arith.constant 0 : index
    %167 = vector.load %arg8[%c6_46, %c0_47, %c0_48] : memref<8x8x128xf32, #tpu.memory_space<vmem>>, vector<1x8x128xf32>
    %168 = vector.shape_cast %167 : vector<1x8x128xf32> to vector<8x128xf32>
    %169 = vector.shape_cast %166 : vector<8x128xf32> to vector<1x8x128xf32>
    tpu.vector_store %arg8[%c6_46, %c0_47, %c0_48], %169 {strides = array<i32>} : memref<8x8x128xf32, #tpu.memory_space<vmem>>, vector<1x8x128xf32>,
    %170 = vector.extract_strided_slice %86 {offsets = [56, 896], sizes = [8, 128], strides = [1, 1]} : vector<64x1024xf32> to vector<8x128xf32>
    %171 = arith.addf %170, %134 : vector<8x128xf32>
    %c7_49 = arith.constant 7 : index
    %c0_50 = arith.constant 0 : index
    %c0_51 = arith.constant 0 : index
    %172 = vector.load %arg8[%c7_49, %c0_50, %c0_51] : memref<8x8x128xf32, #tpu.memory_space<vmem>>, vector<1x8x128xf32>
    %173 = vector.shape_cast %172 : vector<1x8x128xf32> to vector<8x128xf32>
    %174 = vector.shape_cast %171 : vector<8x128xf32> to vector<1x8x128xf32>
    tpu.vector_store %arg8[%c7_49, %c0_50, %c0_51], %174 {strides = array<i32>} : memref<8x8x128xf32, #tpu.memory_space<vmem>>, vector<1x8x128xf32>,
    return
  }
  func.func @transform_0(%arg0: i32, %arg1: memref<8xi32, #tpu.memory_space<smem>>) -> (i32, i32) {
    %c0_i32 = arith.constant 0 : i32
    %c0_i32_0 = arith.constant 0 : i32
    %c0_i32_1 = arith.constant 0 : i32
    return %c0_i32, %c0_i32_0 : i32, i32
  }
  func.func @transform_1(%arg0: i32, %arg1: memref<8xi32, #tpu.memory_space<smem>>) -> (i32, i32) {
    %c0_i32 = arith.constant 0 : i32
    %c0_i32_0 = arith.constant 0 : i32
    %c0_i32_1 = arith.constant 0 : i32
    return %c0_i32, %c0_i32_0 : i32, i32
  }
  func.func @transform_2(%arg0: i32, %arg1: memref<8xi32, #tpu.memory_space<smem>>) -> (i32, i32) {
    %c0_i32 = arith.constant 0 : i32
    %c0_i32_0 = arith.constant 0 : i32
    %c0_i32_1 = arith.constant 0 : i32
    return %c0_i32, %c0_i32_0 : i32, i32
  }
  func.func @transform_3(%arg0: i32, %arg1: memref<8xi32, #tpu.memory_space<smem>>) -> (i32, i32) {
    %c0_i32 = arith.constant 0 : i32
    %c0_i32_0 = arith.constant 0 : i32
    %c0_i32_1 = arith.constant 0 : i32
    return %c0_i32, %c0_i32_0 : i32, i32
  }
  func.func @transform_4(%arg0: i32, %arg1: memref<8xi32, #tpu.memory_space<smem>>) -> (i32, i32) {
    %c0_i32 = arith.constant 0 : i32
    %c0_i32_0 = arith.constant 0 : i32
    %c0_i32_1 = arith.constant 0 : i32
    return %c0_i32, %c0_i32_0 : i32, i32
  }
  func.func @transform_5(%arg0: i32, %arg1: memref<8xi32, #tpu.memory_space<smem>>) -> (i32, i32) {
    %c0_i32 = arith.constant 0 : i32
    %c0_i32_0 = arith.constant 0 : i32
    %c0_i32_1 = arith.constant 0 : i32
    return %c0_i32, %c0_i32_0 : i32, i32
  }
  func.func @transform_6(%arg0: i32, %arg1: memref<8xi32, #tpu.memory_space<smem>>) -> (i32, i32, i32) {
    %c0_i32 = arith.constant 0 : i32
    %c0_i32_0 = arith.constant 0 : i32
    %c0_i32_1 = arith.constant 0 : i32
    %c0_i32_2 = arith.constant 0 : i32
    return %c0_i32, %c0_i32_0, %c0_i32_1 : i32, i32, i32
  }
}

</mosaic_0001>

<bundles_post_ra>
// kernel: _masked_scores.1
= control target key start
LH: loop header
LB: loop body
LE: loop exit
PB: predicated region body
PF: predicated region fallthrough
CT: control target
= control target key end

     0   :  { %s8957_s0 = inlined_call_operand.vmem [shape: s32[8], index: 0, kind: input, shape index: {}]   ;;  %s8958_s1 = inlined_call_operand.hbm [shape: f32[64,768], index: 1, kind: input, shape index: {}]   ;;  %s8959_s2 = inlined_call_operand.vmem [shape: f32[768,64], index: 2, kind: input, shape index: {}]   ;;  %s8960_s3 = inlined_call_operand.vmem [shape: bf16[768,512], index: 3, kind: input, shape index: {}]   ;;  %s8961_s4 = inlined_call_operand.vmem [shape: f32[1,512], index: 4, kind: input, shape index: {}]   ;;  %s8962_s5 = inlined_call_operand.hbm [shape: bf16[512,768], index: 5, kind: input, shape index: {}]   ;;  %s8963_s6 = inlined_call_operand.vmem [shape: f32[512,1], index: 6, kind: input, shape index: {}]   ;;  %s8964_s7 = inlined_call_operand.hbm [shape: f32[8,8,128], index: 7, kind: output, shape index: {}]  }
   0x1   :  { %s12_s26 = sshll.u32 %s8957_s0, 4  ;;  %s13_s26 = int_to_ptr.vmem [resolvable:$true] %s12_s26 }
   0x2   :  { %s6694_s27 = scalar_lea.vmem %s13_s26, 16  ;;  %p6699_p1 = scmp.lt.s32.totalorder %s13_s26, %s13_s26 }
   0x3   :  { %p6695_p0 = scmp.ne.s32.totalorder %s13_s26, %s6694_s27  ;;  %p6700_p2 = scmp.lt.s32.totalorder %s6694_s27, %s6694_s27 }
   0x5   :  { %p6701_p3 = por %p6700_p2, %p6699_p1 }
   0x7   :  { %p6702_p4 = pnand %p6701_p3, %p6695_p0 }
   0x9   :  { %6705 = shalt.err (!%p6702_p4)  }
   0xa   :  { %s6774_s28 = smov [#allocation3]  }
   0xb   :  { %15 = dma.vmem_to_smem %s13_s26, 16, %s6774_s28, [#allocation2] }
   0xc   :  { %6766 = dma.done.wait [#allocation2], 16 }
   0xd   :  { %6767 = vsyncadd [#allocation2], 4294967280 }
   0xe   :  { %17 = sfence }
   0xf   :  { %18 = vsyncpa [#allocation5], 0 }
  0x10   :  { %19 = vsyncpa [#allocation8], 0 }
  0x11   :  { %20 = vsyncpa [#allocation6], 0  ;;  %s6775_s29 = smov [#allocation4]  }
  0x12   :  { %s26_s30 = sshll.u32 %s6775_s29, 4  ;;  %s27_s30 = int_to_ptr.vmem [resolvable:$true] %s26_s30 }
  0x13   :  { %s6714_s0 = scalar_lea.vmem %s27_s30, 6144  ;;  %p6719_p6 = scmp.lt.s32.totalorder %s27_s30, %s27_s30 }
  0x14   :  { %p6715_p5 = scmp.ne.s32.totalorder %s27_s30, %s6714_s0  ;;  %p6720_p7 = scmp.lt.s32.totalorder %s6714_s0, %s6714_s0 }
  0x16   :  { %p6721_p8 = por %p6720_p7, %p6719_p6 }
  0x18   :  { %p6722_p9 = pnand %p6721_p8, %p6715_p5 }
  0x1a   :  { %6725 = shalt.err (!%p6722_p9)
}
  0x1b   :  { %s6776_s8 = smov 768   ;;  %s6777_s9 = smov 48  }
  0x1c   :  { %32 = dma.hbm_to_vmem [thread:$0]  %s8958_s1, 6144, %s27_s30, [#allocation5], %s6776_s8, %s6776_s8, %s6777_s9  }
  0x1d   :  { %s6778_s12 = smov [#allocation7]  }
  0x1e   :  { %s44_s13 = sshll.u32 %s6778_s12, 4  ;;  %s45_s13 = int_to_ptr.vmem [resolvable:$true] %s44_s13 }
  0x1f   :  { %s6734_s14 = scalar_lea.vmem %s45_s13, 24576  ;;  %p6739_p11 = scmp.lt.s32.totalorder %s45_s13, %s45_s13 }
  0x20   :  { %p6735_p10 = scmp.ne.s32.totalorder %s45_s13, %s6734_s14  ;;  %p6740_p12 = scmp.lt.s32.totalorder %s6734_s14, %s6734_s14 }
  0x22   :  { %p6741_p13 = por %p6740_p12, %p6739_p11 }
  0x24   :  { %p6742_p0 = pnand %p6741_p13, %p6735_p10 }
  0x26   :  { %6745 = shalt.err (!%p6742_p0)
}
  0x27   :  { %s6779_s15 = smov 384   ;;  %s6780_s16 = smov 24  }
  0x28   :  { %50 = dma.hbm_to_vmem [thread:$0]  %s8962_s5, 24576, %s45_s13, [#allocation8], %s6779_s15, %s6779_s15, %s6780_s16  }
  0x29   :  { %6768 = dma.done.wait [#allocation5], 6144  }
  0x2a   :  { %6769 = vsyncadd [#allocation5], 4294961152 }
  0x2b   :  { %6770 = dma.done.wait [#allocation8], 24576  }
  0x2c   :  { %6771 = vsyncadd [#allocation8], 4294942720  ;;  %v6118_v0 = vld [vmem:[%s8960_s3 + $0xe4] ss:$16 sps:$4 sm:$0xff]   ;;  %v6122_v2 = vld [vmem:[%s8960_s3 + $0xe0] ss:$16 sps:$4 sm:$0xff]  }
  0x2d   :  { %v6120_v1 = vld [vmem:[%s8960_s3 + $0x2e4] ss:$16 sps:$4 sm:$0xff]   ;;  %1450 = vmatprep.subr.bf16.mxu0 %v6118_v0  ;;  %v6123_v3 = vld [vmem:[%s8960_s3 + $0x2e0] ss:$16 sps:$4 sm:$0xff]   ;;  %v61_v46 = vld [vmem:[#allocation4 + $0x8] sm:$0xff]  ;;  %vm5023_vm3 = vcmask 523264  }
  0x2e   :  { %1523 = vmatprep.subr.bf16.mxu1 %v6120_v1  ;;  %v6124_v4 = vld [vmem:[%s8960_s3 + $0xc4] ss:$16 sps:$4 sm:$0xff]   ;;  %1451 = vmatpush1.bf16.msra.mxu0 %v6122_v2  ;;  %v6128_v6 = vld [vmem:[%s8960_s3 + $0xc0] ss:$16 sps:$4 sm:$0xff]   ;;  %v67_v49 = vld [vmem:[#allocation4 + $0x38] sm:$0xff]  ;;  %s5951_s29 = sld [smem:[#allocation3 + $0x1]] }
  0x2f   :  { %1524 = vmatpush1.bf16.msra.mxu1 %v6123_v3  ;;  %v6126_v5 = vld [vmem:[%s8960_s3 + $0x2c4] ss:$16 sps:$4 sm:$0xff]   ;;  %1452 = vmatprep.subr.bf16.mxu0 %v6124_v4  ;;  %v6129_v7 = vld [vmem:[%s8960_s3 + $0x2c0] ss:$16 sps:$4 sm:$0xff]   ;;  %v6981_v50 = vpack.c.bf16 %v67_v49, %v61_v46  ;;  %v63_v51 = vld [vmem:[#allocation4 + $0x18] sm:$0xff]  ;;  %s5952_s30 = sld [smem:[#allocation3 + $0x2]] }
  0x30   :  { %1525 = vmatprep.subr.bf16.mxu1 %v6126_v5  ;;  %v6130_v8 = vld [vmem:[%s8960_s3 + $0xa4] ss:$16 sps:$4 sm:$0xff]   ;;  %v6134_v10 = vld [vmem:[%s8960_s3 + $0xa0] ss:$16 sps:$4 sm:$0xff]   ;;  %v69_v52 = vld [vmem:[#allocation4 + $0x48] sm:$0xff]  ;;  %s5953_s0 = sld [smem:[#allocation3 + $0x3]] }
  0x31   :  { %v6132_v9 = vld [vmem:[%s8960_s3 + $0x2a4] ss:$16 sps:$4 sm:$0xff]   ;;  %v6135_v11 = vld [vmem:[%s8960_s3 + $0x2a0] ss:$16 sps:$4 sm:$0xff]   ;;  %v6989_v55 = vpack.c.bf16 %v69_v52, %v63_v51  ;;  %1482 = vmatprep.mubr.bf16.mxu0 %v6981_v50  ;;  %v93_v51 = vld [vmem:[#allocation4 + $0x108] sm:$0xff]  ;;  %s5954_s8 = sld [smem:[#allocation3 + $0x4]] }
  0x32   :  { %1453 = vmatpush1.bf16.msra.mxu0 %v6128_v6  ;;  %v6136_v12 = vld [vmem:[%s8960_s3 + $0x84] ss:$16 sps:$4 sm:$0xff]   ;;  %v6140_v14 = vld [vmem:[%s8960_s3 + $0x80] ss:$16 sps:$4 sm:$0xff]   ;;  %s5955_s9 = sld [smem:[#allocation3 + $0x5]] }
  0x33   :  { %1526 = vmatpush1.bf16.msra.mxu1 %v6129_v7  ;;  %1454 = vmatprep.subr.bf16.mxu0 %v6130_v8  ;;  %v6138_v13 = vld [vmem:[%s8960_s3 + $0x284] ss:$16 sps:$4 sm:$0xff]   ;;  %v6141_v15 = vld [vmem:[%s8960_s3 + $0x280] ss:$16 sps:$4 sm:$0xff]   ;;  %s5956_s10 = sld [smem:[#allocation3 + $0x6]] }
  0x34   :  { %1527 = vmatprep.subr.bf16.mxu1 %v6132_v9  ;;  %v6142_v16 = vld [vmem:[%s8960_s3 + $0x64] ss:$16 sps:$4 sm:$0xff]   ;;  %v6146_v18 = vld [vmem:[%s8960_s3 + $0x60] ss:$16 sps:$4 sm:$0xff]   ;;  %1555 = vmatprep.mubr.bf16.mxu1 %v6989_v55  ;;  %s5957_s11 = sld [smem:[#allocation3 + $0x7]] }
  0x35   :  { %v6144_v17 = vld [vmem:[%s8960_s3 + $0x264] ss:$16 sps:$4 sm:$0xff]   ;;  %v6147_v19 = vld [vmem:[%s8960_s3 + $0x260] ss:$16 sps:$4 sm:$0xff]  }
  0x36   :  { %1455 = vmatpush1.bf16.msra.mxu0 %v6134_v10  ;;  %v6148_v20 = vld [vmem:[%s8960_s3 + $0x44] ss:$16 sps:$4 sm:$0xff]   ;;  %v6152_v22 = vld [vmem:[%s8960_s3 + $0x40] ss:$16 sps:$4 sm:$0xff]  }
  0x37   :  { %1528 = vmatpush1.bf16.msra.mxu1 %v6135_v11  ;;  %1456 = vmatprep.subr.bf16.mxu0 %v6136_v12  ;;  %v6150_v21 = vld [vmem:[%s8960_s3 + $0x244] ss:$16 sps:$4 sm:$0xff]   ;;  %v6153_v23 = vld [vmem:[%s8960_s3 + $0x240] ss:$16 sps:$4 sm:$0xff]   ;;  %v6219_v11 = vld [vmem:[%s8960_s3 + $0xec] ss:$16 sps:$4 sm:$0xff]  }
  0x38   :  { %1529 = vmatprep.subr.bf16.mxu1 %v6138_v13  ;;  %v6154_v24 = vld [vmem:[%s8960_s3 + $0x24] ss:$16 sps:$4 sm:$0xff]   ;;  %v6158_v26 = vld [vmem:[%s8960_s3 + $0x20] ss:$16 sps:$4 sm:$0xff]  }
  0x39   :  { %v6156_v25 = vld [vmem:[%s8960_s3 + $0x224] ss:$16 sps:$4 sm:$0xff]   ;;  %v6159_v27 = vld [vmem:[%s8960_s3 + $0x220] ss:$16 sps:$4 sm:$0xff]  }
  0x3a   :  { %1457 = vmatpush1.bf16.msra.mxu0 %v6140_v14  ;;  %v6160_v28 = vld [vmem:[%s8960_s3 + $0x4] ss:$16 sps:$4 sm:$0xff]   ;;  %v6164_v30 = vld [vmem:[%s8960_s3] ss:$16 sps:$4 sm:$0xff]   ;;  %v6217_v14 = vld [vmem:[%s8960_s3 + $0xe8] ss:$16 sps:$4 sm:$0xff]  }
  0x3b   :  { %1530 = vmatpush1.bf16.msra.mxu1 %v6141_v15  ;;  %1458 = vmatprep.subr.bf16.mxu0 %v6142_v16  ;;  %v6162_v29 = vld [vmem:[%s8960_s3 + $0x204] ss:$16 sps:$4 sm:$0xff]   ;;  %v6165_v31 = vld [vmem:[%s8960_s3 + $0x200] ss:$16 sps:$4 sm:$0xff]  }
  0x3c   :  { %1531 = vmatprep.subr.bf16.mxu1 %v6144_v17  ;;  %v6166_v32 = vld [vmem:[%s8960_s3 + $0x1e4] ss:$16 sps:$4 sm:$0xff]   ;;  %v6170_v34 = vld [vmem:[%s8960_s3 + $0x1e0] ss:$16 sps:$4 sm:$0xff]   ;;  %v6225_v17 = vld [vmem:[%s8960_s3 + $0xcc] ss:$16 sps:$4 sm:$0xff]  }
  0x3d   :  { %v6168_v33 = vld [vmem:[%s8960_s3 + $0x3e4] ss:$16 sps:$4 sm:$0xff]   ;;  %v6171_v35 = vld [vmem:[%s8960_s3 + $0x3e0] ss:$16 sps:$4 sm:$0xff]  }
  0x3e   :  { %1459 = vmatpush1.bf16.msra.mxu0 %v6146_v18  ;;  %v6172_v36 = vld [vmem:[%s8960_s3 + $0x1c4] ss:$16 sps:$4 sm:$0xff]   ;;  %v6176_v38 = vld [vmem:[%s8960_s3 + $0x1c0] ss:$16 sps:$4 sm:$0xff]  }
  0x3f   :  { %1532 = vmatpush1.bf16.msra.mxu1 %v6147_v19  ;;  %1460 = vmatprep.subr.bf16.mxu0 %v6148_v20  ;;  %v6174_v37 = vld [vmem:[%s8960_s3 + $0x3c4] ss:$16 sps:$4 sm:$0xff]   ;;  %v6177_v39 = vld [vmem:[%s8960_s3 + $0x3c0] ss:$16 sps:$4 sm:$0xff]   ;;  %v6223_v19 = vld [vmem:[%s8960_s3 + $0xc8] ss:$16 sps:$4 sm:$0xff]  }
  0x40   :  { %1533 = vmatprep.subr.bf16.mxu1 %v6150_v21  ;;  %v6178_v40 = vld [vmem:[%s8960_s3 + $0x1a4] ss:$16 sps:$4 sm:$0xff]   ;;  %v6182_v42 = vld [vmem:[%s8960_s3 + $0x1a0] ss:$16 sps:$4 sm:$0xff]   ;;  %v6231_v21 = vld [vmem:[%s8960_s3 + $0xac] ss:$16 sps:$4 sm:$0xff]  }
  0x41   :  { %v6180_v41 = vld [vmem:[%s8960_s3 + $0x3a4] ss:$16 sps:$4 sm:$0xff]   ;;  %v6183_v43 = vld [vmem:[%s8960_s3 + $0x3a0] ss:$16 sps:$4 sm:$0xff]  }
  0x42   :  { %1461 = vmatpush1.bf16.msra.mxu0 %v6152_v22  ;;  %v6184_v44 = vld [vmem:[%s8960_s3 + $0x184] ss:$16 sps:$4 sm:$0xff]   ;;  %v6188_v47 = vld [vmem:[%s8960_s3 + $0x180] ss:$16 sps:$4 sm:$0xff]   ;;  %v73_v22 = vld [vmem:[#allocation4 + $0x68] sm:$0xff] }
  0x43   :  { %1534 = vmatpush1.bf16.msra.mxu1 %v6153_v23  ;;  %1462 = vmatprep.subr.bf16.mxu0 %v6154_v24  ;;  %v6186_v45 = vld [vmem:[%s8960_s3 + $0x384] ss:$16 sps:$4 sm:$0xff]   ;;  %v6189_v48 = vld [vmem:[%s8960_s3 + $0x380] ss:$16 sps:$4 sm:$0xff]   ;;  %v79_v23 = vld [vmem:[#allocation4 + $0x98] sm:$0xff] }
  0x44   :  { %1535 = vmatprep.subr.bf16.mxu1 %v6156_v25  ;;  %v6190_v53 = vld [vmem:[%s8960_s3 + $0x164] ss:$16 sps:$4 sm:$0xff]   ;;  %v6194_v56 = vld [vmem:[%s8960_s3 + $0x160] ss:$16 sps:$4 sm:$0xff]   ;;  %v7071_v24 = vpack.c.bf16 %v79_v23, %v73_v22  ;;  %v6267_v22 = vld [vmem:[%s8960_s3 + $0x1ec] ss:$16 sps:$4 sm:$0xff]  }
  0x45   :  { %v6192_v54 = vld [vmem:[%s8960_s3 + $0x364] ss:$16 sps:$4 sm:$0xff]   ;;  %v6195_v57 = vld [vmem:[%s8960_s3 + $0x360] ss:$16 sps:$4 sm:$0xff]  }
  0x46   :  { %1463 = vmatpush1.bf16.msra.mxu0 %v6158_v26  ;;  %v6196_v58 = vld [vmem:[%s8960_s3 + $0x144] ss:$16 sps:$4 sm:$0xff]   ;;  %v6200_v60 = vld [vmem:[%s8960_s3 + $0x140] ss:$16 sps:$4 sm:$0xff]  }
  0x47   :  { %1536 = vmatpush1.bf16.msra.mxu1 %v6159_v27  ;;  %1464 = vmatprep.subr.bf16.mxu0 %v6160_v28  ;;  %v6198_v59 = vld [vmem:[%s8960_s3 + $0x344] ss:$16 sps:$4 sm:$0xff]   ;;  %v6201_v61 = vld [vmem:[%s8960_s3 + $0x340] ss:$16 sps:$4 sm:$0xff]   ;;  %v75_v27 = vld [vmem:[#allocation4 + $0x78] sm:$0xff]  ;;  %v6781_v28 = vmov 0  }
  0x48   :  { %1537 = vmatprep.subr.bf16.mxu1 %v6162_v29  ;;  %v6202_v62 = vld [vmem:[%s8960_s3 + $0x124] ss:$16 sps:$4 sm:$0xff]   ;;  %v6206_v0 = vld [vmem:[%s8960_s3 + $0x120] ss:$16 sps:$4 sm:$0xff]   ;;  %6117 = vset.pattern.permute.xlu1 %v6781_v28 }
  0x49   :  { %v6204_v63 = vld [vmem:[%s8960_s3 + $0x324] ss:$16 sps:$4 sm:$0xff]   ;;  %v6207_v1 = vld [vmem:[%s8960_s3 + $0x320] ss:$16 sps:$4 sm:$0xff]   ;;  %6116 = vset.pattern.permute.xlu0 %v6781_v28 }
  0x4a   :  { %1465 = vmatpush1.bf16.msra.mxu0 %v6164_v30  ;;  %v6208_v2 = vld [vmem:[%s8960_s3 + $0x104] ss:$16 sps:$4 sm:$0xff]   ;;  %v6212_v4 = vld [vmem:[%s8960_s3 + $0x100] ss:$16 sps:$4 sm:$0xff]   ;;  %v81_v30 = vld [vmem:[#allocation4 + $0xa8] sm:$0xff] }
  0x4b   :  { %1538 = vmatpush1.bf16.msra.mxu1 %v6165_v31  ;;  %1466 = vmatprep.subr.bf16.mxu0 %v6166_v32  ;;  %v6210_v3 = vld [vmem:[%s8960_s3 + $0x304] ss:$16 sps:$4 sm:$0xff]   ;;  %v6213_v5 = vld [vmem:[%s8960_s3 + $0x300] ss:$16 sps:$4 sm:$0xff]   ;;  %v6229_v32 = vld [vmem:[%s8960_s3 + $0xa8] ss:$16 sps:$4 sm:$0xff]  }
  0x4c   :  { %1539 = vmatprep.subr.bf16.mxu1 %v6168_v33  ;;  %v60_v6 = vld [vmem:[#allocation4] sm:$0xff]  ;;  %v66_v7 = vld [vmem:[#allocation4 + $0x30] sm:$0xff]  ;;  %v7083_v33 = vpack.c.bf16 %v81_v30, %v75_v27  ;;  %v65_v27 = vld [vmem:[#allocation4 + $0x28] sm:$0xff] }
  0x4d   :  { %v6216_v8 = vld [vmem:[%s8960_s3 + $0x4e4] ss:$16 sps:$4 sm:$0xff]   ;;  %v7041_v12 = vpack.c.bf16 %v66_v7, %v60_v6  ;;  %v6214_v13 = vld [vmem:[%s8960_s3 + $0x4e0] ss:$16 sps:$4 sm:$0xff]   ;;  %v99_v6 = vld [vmem:[#allocation4 + $0x138] sm:$0xff] }
  0x4e   :  { %1467 = vmatpush2.bf16.msra.mxu0 %v6170_v34  ;;  %v62_v9 = vld [vmem:[#allocation4 + $0x10] sm:$0xff]  ;;  %v68_v10 = vld [vmem:[#allocation4 + $0x40] sm:$0xff]  ;;  %v71_v30 = vld [vmem:[#allocation4 + $0x58] sm:$0xff] }
  0x4f   :  { %1540 = vmatpush2.bf16.msra.mxu1 %v6171_v35  ;;  %1468 = vmatprep.subr.bf16.mxu0 %v6172_v36  ;;  %v7049_v15 = vpack.c.bf16 %v68_v10, %v62_v9  ;;  %v6222_v16 = vld [vmem:[%s8960_s3 + $0x4c4] ss:$16 sps:$4 sm:$0xff]   ;;  %v6220_v18 = vld [vmem:[%s8960_s3 + $0x4c0] ss:$16 sps:$4 sm:$0xff]   ;;  %v6237_v35 = vld [vmem:[%s8960_s3 + $0x8c] ss:$16 sps:$4 sm:$0xff]  }
  0x50   :  { %1541 = vmatprep.subr.bf16.mxu1 %v6174_v37  ;;  %v6228_v20 = vld [vmem:[%s8960_s3 + $0x4a4] ss:$16 sps:$4 sm:$0xff]   ;;  %v6226_v31 = vld [vmem:[%s8960_s3 + $0x4a0] ss:$16 sps:$4 sm:$0xff]   ;;  %v6253_v10 = vld [vmem:[%s8960_s3 + $0x28] ss:$16 sps:$4 sm:$0xff]  }
  0x51   :  { %v72_v25 = vld [vmem:[#allocation4 + $0x60] sm:$0xff]  ;;  %v78_v26 = vld [vmem:[#allocation4 + $0x90] sm:$0xff] }
  0x52   :  { %1469 = vmatpush2.bf16.msra.mxu0 %v6176_v38  ;;  %v7075_v29 = vpack.c.bf16 %v78_v26, %v72_v25  ;;  %v6234_v34 = vld [vmem:[%s8960_s3 + $0x484] ss:$16 sps:$4 sm:$0xff]   ;;  %v6232_v38 = vld [vmem:[%s8960_s3 + $0x480] ss:$16 sps:$4 sm:$0xff]   ;;  %v6265_v25 = vld [vmem:[%s8960_s3 + $0x1e8] ss:$16 sps:$4 sm:$0xff]  }
  0x53   :  { %1542 = vmatpush2.bf16.msra.mxu1 %v6177_v39  ;;  %1470 = vmatprep.subr.bf16.mxu0 %v6178_v40  ;;  %v74_v36 = vld [vmem:[#allocation4 + $0x70] sm:$0xff]  ;;  %v80_v37 = vld [vmem:[#allocation4 + $0xa0] sm:$0xff]  ;;  %v6235_v39 = vld [vmem:[%s8960_s3 + $0x88] ss:$16 sps:$4 sm:$0xff]  }
  0x54   :  { %1543 = vmatprep.subr.bf16.mxu1 %v6180_v41  ;;  %v7100_v40 = vpack.c.bf16 %v80_v37, %v74_v36  ;;  %v6240_v41 = vld [vmem:[%s8960_s3 + $0x464] ss:$16 sps:$4 sm:$0xff]   ;;  %v6238_v52 = vld [vmem:[%s8960_s3 + $0x460] ss:$16 sps:$4 sm:$0xff]   ;;  %v6279_v36 = vld [vmem:[%s8960_s3 + $0x1ac] ss:$16 sps:$4 sm:$0xff]  }
  0x55   :  { %v84_v46 = vld [vmem:[#allocation4 + $0xc0] sm:$0xff] }
  0x56   :  { %1471 = vmatpush2.bf16.msra.mxu0 %v6182_v42  ;;  %v6243_v42 = vld [vmem:[%s8960_s3 + $0x6c] ss:$16 sps:$4 sm:$0xff]   ;;  %v6250_v9 = vld [vmem:[%s8960_s3 + $0x420] ss:$16 sps:$4 sm:$0xff]   ;;  %v6270_v26 = vld [vmem:[%s8960_s3 + $0x5c4] ss:$16 sps:$4 sm:$0xff]  }
  0x57   :  { %1544 = vmatpush2.bf16.msra.mxu1 %v6183_v43  ;;  %1472 = vmatprep.subr.bf16.mxu0 %v6184_v44  ;;  %v85_v43 = vld [vmem:[#allocation4 + $0xc8] sm:$0xff]  ;;  %v91_v44 = vld [vmem:[#allocation4 + $0xf8] sm:$0xff]  ;;  %v6262_v23 = vld [vmem:[%s8960_s3 + $0x5e0] ss:$16 sps:$4 sm:$0xff]  }
  0x58   :  { %1545 = vmatprep.subr.bf16.mxu1 %v6186_v45  ;;  %v7109_v45 = vpack.c.bf16 %v91_v44, %v85_v43  ;;  %v6274_v37 = vld [vmem:[%s8960_s3 + $0x5a0] ss:$16 sps:$4 sm:$0xff]   ;;  %v6283_v43 = vld [vmem:[%s8960_s3 + $0x188] ss:$16 sps:$4 sm:$0xff]   ;;  %v6288_v44 = vld [vmem:[%s8960_s3 + $0x564] ss:$16 sps:$4 sm:$0xff]  }
  0x5a   :  { %1473 = vmatpush2.bf16.msra.mxu0 %v6188_v47  ;;  %v90_v47 = vld [vmem:[#allocation4 + $0xf0] sm:$0xff] }
  0x5b   :  { %1546 = vmatpush2.bf16.msra.mxu1 %v6189_v48  ;;  %1474 = vmatprep.subr.bf16.mxu0 %v6190_v53  ;;  %v87_v48 = vld [vmem:[#allocation4 + $0xd8] sm:$0xff]  ;;  %v7111_v49 = vpack.c.bf16 %v90_v47, %v84_v46  ;;  %v6286_v47 = vld [vmem:[%s8960_s3 + $0x560] ss:$16 sps:$4 sm:$0xff]  }
  0x5c   :  { %1547 = vmatprep.subr.bf16.mxu1 %v6192_v54  ;;  %v6241_v53 = vld [vmem:[%s8960_s3 + $0x68] ss:$16 sps:$4 sm:$0xff]   ;;  %v7119_v54 = vpack.c.bf16 %v93_v51, %v87_v48  ;;  %v6291_v46 = vld [vmem:[%s8960_s3 + $0x16c] ss:$16 sps:$4 sm:$0xff]   ;;  %v6294_v51 = vld [vmem:[%s8960_s3 + $0x544] ss:$16 sps:$4 sm:$0xff]  }
  0x5d   :  { %v6289_v48 = vld [vmem:[%s8960_s3 + $0x168] ss:$16 sps:$4 sm:$0xff]  }
  0x5e   :  { %1475 = vmatpush2.bf16.msra.mxu0 %v6194_v56  ;;  %v6246_v56 = vld [vmem:[%s8960_s3 + $0x444] ss:$16 sps:$4 sm:$0xff]  }
  0x5f   :  { %1548 = vmatpush2.bf16.msra.mxu1 %v6195_v57  ;;  %1476 = vmatprep.subr.bf16.mxu0 %v6196_v58  ;;  %v6249_v57 = vld [vmem:[%s8960_s3 + $0x4c] ss:$16 sps:$4 sm:$0xff]   ;;  %v86_v58 = vld [vmem:[#allocation4 + $0xd0] sm:$0xff] }
  0x60   :  { %1549 = vmatprep.subr.bf16.mxu1 %v6198_v59  ;;  %v92_v59 = vld [vmem:[#allocation4 + $0x100] sm:$0xff] }
  0x62   :  { %1477 = vmatpush2.bf16.msra.mxu0 %v6200_v60  ;;  %v6244_v60 = vld [vmem:[%s8960_s3 + $0x440] ss:$16 sps:$4 sm:$0xff]  }
  0x63   :  { %1550 = vmatpush2.bf16.msra.mxu1 %v6201_v61  ;;  %1478 = vmatprep.subr.bf16.mxu0 %v6202_v62  ;;  %v6247_v61 = vld [vmem:[%s8960_s3 + $0x48] ss:$16 sps:$4 sm:$0xff]   ;;  %v7136_v62 = vpack.c.bf16 %v92_v59, %v86_v58  ;;  %v6303_v58 = vld [vmem:[%s8960_s3 + $0x12c] ss:$16 sps:$4 sm:$0xff]   ;;  %v6298_v59 = vld [vmem:[%s8960_s3 + $0x520] ss:$16 sps:$4 sm:$0xff]  }
  0x64   :  { %1551 = vmatprep.subr.bf16.mxu1 %v6204_v63  ;;  %v6252_v63 = vld [vmem:[%s8960_s3 + $0x424] ss:$16 sps:$4 sm:$0xff]  }
  0x66   :  { %1479 = vmatpush2.bf16.msra.mxu0 %v6206_v0  ;;  %v6255_v0 = vld [vmem:[%s8960_s3 + $0x2c] ss:$16 sps:$4 sm:$0xff]  }
  0x67   :  { %1552 = vmatpush2.bf16.msra.mxu1 %v6207_v1  ;;  %1480 = vmatprep.subr.bf16.mxu0 %v6208_v2  ;;  %v97_v1 = vld [vmem:[#allocation4 + $0x128] sm:$0xff]  ;;  %v103_v2 = vld [vmem:[#allocation4 + $0x158] sm:$0xff] }
  0x68   :  { %1553 = vmatprep.subr.bf16.mxu1 %v6210_v3  ;;  %v7145_v3 = vpack.c.bf16 %v103_v2, %v97_v1  ;;  %v6307_v1 = vld [vmem:[%s8960_s3 + $0x108] ss:$16 sps:$4 sm:$0xff]   ;;  %v64_v2 = vld [vmem:[#allocation4 + $0x20] sm:$0xff] }
  0x6a   :  { %1481 = vmatpush2.bf16.msra.mxu0 %v6212_v4  ;;  %v96_v4 = vld [vmem:[#allocation4 + $0x120] sm:$0xff] }
  0x6b   :  { %1554 = vmatpush2.bf16.msra.mxu1 %v6213_v5  ;;  %1596 = vmatprep.subr.bf16.mxu0 %v6216_v8  ;;  %v102_v5 = vld [vmem:[#allocation4 + $0x150] sm:$0xff]  ;;  %v105_v8 = vld [vmem:[#allocation4 + $0x168] sm:$0xff] }
  0x6c   :  { %1669 = vmatprep.subr.bf16.mxu1 %v6219_v11  ;;  %v7147_v7 = vpack.c.bf16 %v102_v5, %v96_v4  ;;  %v7155_v11 = vpack.c.bf16 %v105_v8, %v99_v6  ;;  %v70_v4 = vld [vmem:[#allocation4 + $0x50] sm:$0xff]  ;;  %v6312_v5 = vld [vmem:[%s8960_s3 + $0x2ec] ss:$16 sps:$4 sm:$0xff]   ;;  %v6310_v8 = vld [vmem:[%s8960_s3 + $0x2e8] ss:$16 sps:$4 sm:$0xff]  }
  0x6d   :  { %1483 = vmatmul.mubr.bf16.vlgmr.msra.gmra.mxu0 %v7041_v12  ;;  %v6315_v6 = vld [vmem:[%s8960_s3 + $0x4ec] ss:$16 sps:$4 sm:$0xff]  }
  0x6e   :  { %1556 = vmatmul.mubr.bf16.vlgmr.msra.gmra.mxu1 %v7049_v15  ;;  %1597 = vmatpush1.bf16.msra.mxu0 %v6214_v13  ;;  %v6258_v13 = vld [vmem:[%s8960_s3 + $0x404] ss:$16 sps:$4 sm:$0xff]  }
  0x6f   :  { %1670 = vmatpush1.bf16.msra.mxu1 %v6217_v14  ;;  %1598 = vmatprep.subr.bf16.mxu0 %v6222_v16  ;;  %v6261_v14 = vld [vmem:[%s8960_s3 + $0xc] ss:$16 sps:$4 sm:$0xff]   ;;  %v98_v16 = vld [vmem:[#allocation4 + $0x130] sm:$0xff] }
  0x70   :  { %1671 = vmatprep.subr.bf16.mxu1 %v6225_v17  ;;  %1492 = vmatprep.mubr.bf16.mxu0 %v7071_v24  ;;  %v104_v17 = vld [vmem:[#allocation4 + $0x160] sm:$0xff] }
  0x71   :  { %1565 = vmatprep.mubr.bf16.mxu1 %v7083_v33 }
  0x72   :  { %1599 = vmatpush1.bf16.msra.mxu0 %v6220_v18  ;;  %v6256_v18 = vld [vmem:[%s8960_s3 + $0x400] ss:$16 sps:$4 sm:$0xff]  }
  0x73   :  { %1672 = vmatpush1.bf16.msra.mxu1 %v6223_v19  ;;  %1600 = vmatprep.subr.bf16.mxu0 %v6228_v20  ;;  %v6259_v19 = vld [vmem:[%s8960_s3 + $0x8] ss:$16 sps:$4 sm:$0xff]   ;;  %v7172_v20 = vpack.c.bf16 %v104_v17, %v98_v16  ;;  %v6318_v16 = vld [vmem:[%s8960_s3 + $0x2cc] ss:$16 sps:$4 sm:$0xff]  }
  0x74   :  { %1673 = vmatprep.subr.bf16.mxu1 %v6231_v21  ;;  %v6264_v21 = vld [vmem:[%s8960_s3 + $0x5e4] ss:$16 sps:$4 sm:$0xff]   ;;  %v6321_v17 = vld [vmem:[%s8960_s3 + $0x4cc] ss:$16 sps:$4 sm:$0xff]  }
  0x75   :  { %1493 = vmatmul.mubr.bf16.gmra.mxu0 %v7075_v29 }
  0x76   :  { %1601 = vmatpush1.bf16.msra.mxu0 %v6226_v31  ;;  %1566 = vmatmul.mubr.bf16.gmra.mxu1 %v7100_v40  ;;  %v6273_v31 = vld [vmem:[%s8960_s3 + $0x1cc] ss:$16 sps:$4 sm:$0xff]  }
  0x77   :  { %1674 = vmatpush1.bf16.msra.mxu1 %v6229_v32  ;;  %1602 = vmatprep.subr.bf16.mxu0 %v6234_v34  ;;  %v7194_v32 = vpack.c.bf16 %v71_v30, %v65_v27  ;;  %v6271_v34 = vld [vmem:[%s8960_s3 + $0x1c8] ss:$16 sps:$4 sm:$0xff]  }
  0x78   :  { %1675 = vmatprep.subr.bf16.mxu1 %v6237_v35  ;;  %1502 = vmatprep.mubr.bf16.mxu0 %v7109_v45  ;;  %v6276_v35 = vld [vmem:[%s8960_s3 + $0x5a4] ss:$16 sps:$4 sm:$0xff]   ;;  %v6325_v27 = vld [vmem:[%s8960_s3 + $0x4a8] ss:$16 sps:$4 sm:$0xff]  }
  0x79   :  { %1575 = vmatprep.mubr.bf16.mxu1 %v7119_v54 }
  0x7a   :  { %1603 = vmatpush1.bf16.msra.mxu0 %v6232_v38  ;;  %v6277_v38 = vld [vmem:[%s8960_s3 + $0x1a8] ss:$16 sps:$4 sm:$0xff]  }
  0x7b   :  { %1676 = vmatpush1.bf16.msra.mxu1 %v6235_v39  ;;  %1604 = vmatprep.subr.bf16.mxu0 %v6240_v41  ;;  %v6282_v39 = vld [vmem:[%s8960_s3 + $0x584] ss:$16 sps:$4 sm:$0xff]   ;;  %v6285_v41 = vld [vmem:[%s8960_s3 + $0x18c] ss:$16 sps:$4 sm:$0xff]  }
  0x7c   :  { %1677 = vmatprep.subr.bf16.mxu1 %v6243_v42  ;;  %v6280_v42 = vld [vmem:[%s8960_s3 + $0x580] ss:$16 sps:$4 sm:$0xff]  }
  0x7d   :  { %1503 = vmatmul.mubr.bf16.gmra.mxu0 %v7111_v49 }
  0x7e   :  { %1605 = vmatpush1.bf16.msra.mxu0 %v6238_v52  ;;  %1576 = vmatmul.mubr.bf16.gmra.mxu1 %v7136_v62  ;;  %v6297_v52 = vld [vmem:[%s8960_s3 + $0x14c] ss:$16 sps:$4 sm:$0xff]  }
  0x7f   :  { %1678 = vmatpush1.bf16.msra.mxu1 %v6241_v53  ;;  %1606 = vmatprep.subr.bf16.mxu0 %v6246_v56  ;;  %v6292_v53 = vld [vmem:[%s8960_s3 + $0x540] ss:$16 sps:$4 sm:$0xff]   ;;  %v6295_v56 = vld [vmem:[%s8960_s3 + $0x148] ss:$16 sps:$4 sm:$0xff]  }
  0x80   :  { %1679 = vmatprep.subr.bf16.mxu1 %v6249_v57  ;;  %1512 = vmatprep.mubr.bf16.mxu0 %v7145_v3  ;;  %v6300_v57 = vld [vmem:[%s8960_s3 + $0x524] ss:$16 sps:$4 sm:$0xff]  }
  0x81   :  { %1585 = vmatprep.mubr.bf16.mxu1 %v7155_v11 }
  0x82   :  { %1607 = vmatpush1.bf16.msra.mxu0 %v6244_v60  ;;  %v6301_v60 = vld [vmem:[%s8960_s3 + $0x128] ss:$16 sps:$4 sm:$0xff]  }
  0x83   :  { %1680 = vmatpush1.bf16.msra.mxu1 %v6247_v61  ;;  %1608 = vmatprep.subr.bf16.mxu0 %v6252_v63  ;;  %v6306_v61 = vld [vmem:[%s8960_s3 + $0x504] ss:$16 sps:$4 sm:$0xff]   ;;  %v6309_v63 = vld [vmem:[%s8960_s3 + $0x10c] ss:$16 sps:$4 sm:$0xff]  }
  0x84   :  { %1681 = vmatprep.subr.bf16.mxu1 %v6255_v0  ;;  %v6304_v0 = vld [vmem:[%s8960_s3 + $0x500] ss:$16 sps:$4 sm:$0xff]  }
  0x85   :  { %1513 = vmatmul.mubr.bf16.gmra.mxu0 %v7147_v7 }
  0x86   :  { %1609 = vmatpush1.bf16.msra.mxu0 %v6250_v9  ;;  %1586 = vmatmul.mubr.bf16.gmra.mxu1 %v7172_v20  ;;  %v6313_v9 = vld [vmem:[%s8960_s3 + $0x4e8] ss:$16 sps:$4 sm:$0xff]  }
  0x87   :  { %1682 = vmatpush1.bf16.msra.mxu1 %v6253_v10  ;;  %1610 = vmatprep.subr.bf16.mxu0 %v6258_v13  ;;  %v7287_v10 = vpack.c.bf16 %v70_v4, %v64_v2  ;;  %v77_v13 = vld [vmem:[#allocation4 + $0x88] sm:$0xff] }
  0x88   :  { %1683 = vmatprep.subr.bf16.mxu1 %v6261_v14  ;;  %1701 = vmatprep.mubr.bf16.mxu1 %v6981_v50  ;;  %v6268_v50 = vld [vmem:[%s8960_s3 + $0x5c0] ss:$16 sps:$4 sm:$0xff]   ;;  %v83_v14 = vld [vmem:[#allocation4 + $0xb8] sm:$0xff] }
  0x89   :  { %1628 = vmatprep.mubr.bf16.mxu0 %v7194_v32  ;;  %v6360_v2 = vld [vmem:[%s8960_s3 + $0x3ec] ss:$16 sps:$4 sm:$0xff]   ;;  %v6358_v4 = vld [vmem:[%s8960_s3 + $0x3e8] ss:$16 sps:$4 sm:$0xff]  }
  0x8a   :  { %1611 = vmatpush1.bf16.msra.mxu0 %v6256_v18  ;;  %v6316_v18 = vld [vmem:[%s8960_s3 + $0x2c8] ss:$16 sps:$4 sm:$0xff]  }
  0x8b   :  { %1684 = vmatpush1.bf16.msra.mxu1 %v6259_v19  ;;  %1612 = vmatprep.subr.bf16.mxu0 %v6264_v21  ;;  %v6319_v19 = vld [vmem:[%s8960_s3 + $0x4c8] ss:$16 sps:$4 sm:$0xff]   ;;  %v7301_v21 = vpack.c.bf16 %v83_v14, %v77_v13  ;;  %v6375_v13 = vld [vmem:[%s8960_s3 + $0x5ac] ss:$16 sps:$4 sm:$0xff]  }
  0x8c   :  { %1685 = vmatprep.subr.bf16.mxu1 %v6267_v22  ;;  %v76_v22 = vld [vmem:[#allocation4 + $0x80] sm:$0xff]  ;;  %v6370_v14 = vld [vmem:[%s8960_s3 + $0x3a8] ss:$16 sps:$4 sm:$0xff]  }
  0x8e   :  { %1613 = vmatpush2.bf16.msra.mxu0 %v6262_v23  ;;  %v82_v23 = vld [vmem:[#allocation4 + $0xb0] sm:$0xff] }
  0x8f   :  { %1686 = vmatpush2.bf16.msra.mxu1 %v6265_v25  ;;  %1614 = vmatprep.subr.bf16.mxu0 %v6270_v26  ;;  %v6324_v25 = vld [vmem:[%s8960_s3 + $0x2ac] ss:$16 sps:$4 sm:$0xff]   ;;  %v7319_v30 = vpack.c.bf16 %v82_v23, %v76_v22  ;;  %v6379_v22 = vld [vmem:[%s8960_s3 + $0x588] ss:$16 sps:$4 sm:$0xff]   ;;  %v2110_v23 = vld [vmem:[%s8963_s6 + $0xf0] sm:$0xff] }
  0x90   :  { %1687 = vmatprep.subr.bf16.mxu1 %v6273_v31  ;;  %v6327_v26 = vld [vmem:[%s8960_s3 + $0x4ac] ss:$16 sps:$4 sm:$0xff]   ;;  %2296 = vperm.xlu1 %6117, %v2110_v23   ;;  %v136_v23 = vld [vmem:[%s8959_s2 + $0x20] sm:$0xff] }
  0x91   :  { %v89_v31 = vld [vmem:[#allocation4 + $0xe8] sm:$0xff] }
  0x92   :  { %1615 = vmatpush2.bf16.msra.mxu0 %v6268_v50  ;;  %v95_v50 = vld [vmem:[#allocation4 + $0x118] sm:$0xff] }
  0x93   :  { %1688 = vmatpush2.bf16.msra.mxu1 %v6271_v34  ;;  %1616 = vmatprep.subr.bf16.mxu0 %v6276_v35  ;;  %v6330_v34 = vld [vmem:[%s8960_s3 + $0x28c] ss:$16 sps:$4 sm:$0xff]  }
  0x94   :  { %1689 = vmatprep.subr.bf16.mxu1 %v6279_v36  ;;  %v6333_v35 = vld [vmem:[%s8960_s3 + $0x48c] ss:$16 sps:$4 sm:$0xff]   ;;  %v6331_v36 = vld [vmem:[%s8960_s3 + $0x488] ss:$16 sps:$4 sm:$0xff]  }
  0x96   :  { %1617 = vmatpush2.bf16.msra.mxu0 %v6274_v37  ;;  %v7333_v37 = vpack.c.bf16 %v95_v50, %v89_v31  ;;  %v2094_v31 = vld [vmem:[%s8963_s6 + $0x70] sm:$0xff]  ;;  %v6390_v50 = vld [vmem:[%s8960_s3 + $0x34c] ss:$16 sps:$4 sm:$0xff]  }
  0x97   :  { %1690 = vmatpush2.bf16.msra.mxu1 %v6277_v38  ;;  %1618 = vmatprep.subr.bf16.mxu0 %v6282_v39  ;;  %v88_v38 = vld [vmem:[#allocation4 + $0xe0] sm:$0xff]  ;;  %v94_v39 = vld [vmem:[#allocation4 + $0x110] sm:$0xff] }
  0x98   :  { %1691 = vmatprep.subr.bf16.mxu1 %v6285_v41  ;;  %v6336_v41 = vld [vmem:[%s8960_s3 + $0x26c] ss:$16 sps:$4 sm:$0xff]   ;;  %2216 = vperm.xlu1 %6117, %v2094_v31  }
  0x99   :  { %v167_v31 = vld [vmem:[%s8959_s2 + $0x118] sm:$0xff] }
  0x9a   :  { %1619 = vmatpush2.bf16.msra.mxu0 %v6280_v42  ;;  %v6339_v42 = vld [vmem:[%s8960_s3 + $0x46c] ss:$16 sps:$4 sm:$0xff]  }
  0x9b   :  { %1692 = vmatpush2.bf16.msra.mxu1 %v6283_v43  ;;  %1620 = vmatprep.subr.bf16.mxu0 %v6288_v44  ;;  %v7345_v43 = vpack.c.bf16 %v94_v39, %v88_v38  ;;  %v101_v44 = vld [vmem:[#allocation4 + $0x148] sm:$0xff] }
  0x9c   :  { %1693 = vmatprep.subr.bf16.mxu1 %v6291_v46  ;;  %v6334_v46 = vld [vmem:[%s8960_s3 + $0x268] ss:$16 sps:$4 sm:$0xff]   ;;  %v6396_v38 = vld [vmem:[%s8960_s3 + $0x32c] ss:$16 sps:$4 sm:$0xff]  }
  0x9d   :  { %v6399_v39 = vld [vmem:[%s8960_s3 + $0x52c] ss:$16 sps:$4 sm:$0xff]  }
  0x9e   :  { %1621 = vmatpush2.bf16.msra.mxu0 %v6286_v47  ;;  %v6337_v47 = vld [vmem:[%s8960_s3 + $0x468] ss:$16 sps:$4 sm:$0xff]  }
  0x9f   :  { %1694 = vmatpush2.bf16.msra.mxu1 %v6289_v48  ;;  %1622 = vmatprep.subr.bf16.mxu0 %v6294_v51  ;;  %v6345_v48 = vld [vmem:[%s8960_s3 + $0x44c] ss:$16 sps:$4 sm:$0xff]  }
  0xa0   :  { %1695 = vmatprep.subr.bf16.mxu1 %v6297_v52  ;;  %v6340_v52 = vld [vmem:[%s8960_s3 + $0x248] ss:$16 sps:$4 sm:$0xff]  }
  0xa2   :  { %1623 = vmatpush2.bf16.msra.mxu0 %v6292_v53  ;;  %v6343_v53 = vld [vmem:[%s8960_s3 + $0x448] ss:$16 sps:$4 sm:$0xff]  }
  0xa3   :  { %1696 = vmatpush2.bf16.msra.mxu1 %v6295_v56  ;;  %1624 = vmatprep.subr.bf16.mxu0 %v6300_v57  ;;  %v100_v56 = vld [vmem:[#allocation4 + $0x140] sm:$0xff]  ;;  %v106_v57 = vld [vmem:[#allocation4 + $0x170] sm:$0xff] }
  0xa4   :  { %1697 = vmatprep.subr.bf16.mxu1 %v6303_v58  ;;  %v6348_v58 = vld [vmem:[%s8960_s3 + $0x22c] ss:$16 sps:$4 sm:$0xff]  }
  0xa6   :  { %1625 = vmatpush2.bf16.msra.mxu0 %v6298_v59  ;;  %v6351_v59 = vld [vmem:[%s8960_s3 + $0x42c] ss:$16 sps:$4 sm:$0xff]  }
  0xa7   :  { %1698 = vmatpush2.bf16.msra.mxu1 %v6301_v60  ;;  %1626 = vmatprep.subr.bf16.mxu0 %v6306_v61  ;;  %v6346_v60 = vld [vmem:[%s8960_s3 + $0x228] ss:$16 sps:$4 sm:$0xff]  }
  0xa8   :  { %1699 = vmatprep.subr.bf16.mxu1 %v6309_v63  ;;  %v6349_v61 = vld [vmem:[%s8960_s3 + $0x428] ss:$16 sps:$4 sm:$0xff]   ;;  %v6354_v63 = vld [vmem:[%s8960_s3 + $0x20c] ss:$16 sps:$4 sm:$0xff]  }
  0xaa   :  { %1627 = vmatpush2.bf16.msra.mxu0 %v6304_v0  ;;  %v6352_v0 = vld [vmem:[%s8960_s3 + $0x208] ss:$16 sps:$4 sm:$0xff]  }
  0xab   :  { %1700 = vmatpush2.bf16.msra.mxu1 %v6307_v1  ;;  %1742 = vmatprep.subr.bf16.mxu0 %v6312_v5  ;;  %v6355_v1 = vld [vmem:[%s8960_s3 + $0x408] ss:$16 sps:$4 sm:$0xff]  }
  0xac   :  { %1815 = vmatprep.subr.bf16.mxu1 %v6315_v6  ;;  %v6361_v5 = vld [vmem:[%s8960_s3 + $0x5e8] ss:$16 sps:$4 sm:$0xff]   ;;  %v6366_v6 = vld [vmem:[%s8960_s3 + $0x3cc] ss:$16 sps:$4 sm:$0xff]  }
  0xad   :  { %1629 = vmatmul.mubr.bf16.vlgmr.msra.gmra.mxu0 %v7287_v10 }
  0xae   :  { %1702 = vmatmul.mubr.bf16.vlgmr.msra.gmra.mxu1 %v7041_v12  ;;  %1743 = vmatpush1.bf16.msra.mxu0 %v6310_v8  ;;  %v6322_v12 = vld [vmem:[%s8960_s3 + $0x2a8] ss:$16 sps:$4 sm:$0xff]  }
  0xaf   :  { %1816 = vmatpush1.bf16.msra.mxu1 %v6313_v9  ;;  %1744 = vmatprep.subr.bf16.mxu0 %v6318_v16  ;;  %v6367_v8 = vld [vmem:[%s8960_s3 + $0x5c8] ss:$16 sps:$4 sm:$0xff]   ;;  %v6372_v9 = vld [vmem:[%s8960_s3 + $0x3ac] ss:$16 sps:$4 sm:$0xff]  }
  0xb0   :  { %1817 = vmatprep.subr.bf16.mxu1 %v6321_v17  ;;  %1638 = vmatprep.mubr.bf16.mxu0 %v7301_v21  ;;  %v6373_v16 = vld [vmem:[%s8960_s3 + $0x5a8] ss:$16 sps:$4 sm:$0xff]   ;;  %v6378_v17 = vld [vmem:[%s8960_s3 + $0x38c] ss:$16 sps:$4 sm:$0xff]  }
  0xb1   :  { %1711 = vmatprep.mubr.bf16.mxu1 %v7071_v24  ;;  %v6328_v24 = vld [vmem:[%s8960_s3 + $0x288] ss:$16 sps:$4 sm:$0xff]  }
  0xb2   :  { %1745 = vmatpush1.bf16.msra.mxu0 %v6316_v18  ;;  %v6381_v18 = vld [vmem:[%s8960_s3 + $0x58c] ss:$16 sps:$4 sm:$0xff]  }
  0xb3   :  { %1818 = vmatpush1.bf16.msra.mxu1 %v6319_v19  ;;  %1746 = vmatprep.subr.bf16.mxu0 %v6324_v25  ;;  %v6376_v19 = vld [vmem:[%s8960_s3 + $0x388] ss:$16 sps:$4 sm:$0xff]   ;;  %v6384_v25 = vld [vmem:[%s8960_s3 + $0x36c] ss:$16 sps:$4 sm:$0xff]  }
  0xb4   :  { %1819 = vmatprep.subr.bf16.mxu1 %v6327_v26  ;;  %v6387_v26 = vld [vmem:[%s8960_s3 + $0x56c] ss:$16 sps:$4 sm:$0xff]  }
  0xb5   :  { %1639 = vmatmul.mubr.bf16.gmra.mxu0 %v7319_v30 }
  0xb6   :  { %1712 = vmatmul.mubr.bf16.gmra.mxu1 %v7075_v29  ;;  %1747 = vmatpush1.bf16.msra.mxu0 %v6322_v12  ;;  %v107_v29 = vld [vmem:[#allocation4 + $0x178] sm:$0xff] }
  0xb7   :  { %1820 = vmatpush1.bf16.msra.mxu1 %v6325_v27  ;;  %1748 = vmatprep.subr.bf16.mxu0 %v6330_v34  ;;  %v7359_v51 = vpack.c.bf16 %v107_v29, %v101_v44  ;;  %v6382_v12 = vld [vmem:[%s8960_s3 + $0x368] ss:$16 sps:$4 sm:$0xff]   ;;  %v6393_v34 = vld [vmem:[%s8960_s3 + $0x54c] ss:$16 sps:$4 sm:$0xff]  }
  0xb8   :  { %1821 = vmatprep.subr.bf16.mxu1 %v6333_v35  ;;  %1648 = vmatprep.mubr.bf16.mxu0 %v7333_v37  ;;  %v6385_v27 = vld [vmem:[%s8960_s3 + $0x568] ss:$16 sps:$4 sm:$0xff]   ;;  %v6402_v29 = vld [vmem:[%s8960_s3 + $0x30c] ss:$16 sps:$4 sm:$0xff]  }
  0xb9   :  { %1721 = vmatprep.mubr.bf16.mxu1 %v7109_v45  ;;  %v6342_v45 = vld [vmem:[%s8960_s3 + $0x24c] ss:$16 sps:$4 sm:$0xff]   ;;  %v6388_v35 = vld [vmem:[%s8960_s3 + $0x348] ss:$16 sps:$4 sm:$0xff]  }
  0xba   :  { %1749 = vmatpush1.bf16.msra.mxu0 %v6328_v24  ;;  %v2093_v24 = vld [vmem:[%s8963_s6 + $0x68] sm:$0xff] }
  0xbb   :  { %1822 = vmatpush1.bf16.msra.mxu1 %v6331_v36  ;;  %1750 = vmatprep.subr.bf16.mxu0 %v6336_v41  ;;  %v6391_v36 = vld [vmem:[%s8960_s3 + $0x548] ss:$16 sps:$4 sm:$0xff]  }
  0xbc   :  { %1823 = vmatprep.subr.bf16.mxu1 %v6339_v42  ;;  %2211 = vperm.xlu1 %6117, %v2093_v24   ;;  %v6394_v41 = vld [vmem:[%s8960_s3 + $0x328] ss:$16 sps:$4 sm:$0xff]   ;;  %v2092_v42 = vld [vmem:[%s8963_s6 + $0x60] sm:$0xff] }
  0xbd   :  { %1649 = vmatmul.mubr.bf16.gmra.mxu0 %v7345_v43  ;;  %v6397_v44 = vld [vmem:[%s8960_s3 + $0x528] ss:$16 sps:$4 sm:$0xff]  }
  0xbe   :  { %1722 = vmatmul.mubr.bf16.gmra.mxu1 %v7111_v49  ;;  %1751 = vmatpush1.bf16.msra.mxu0 %v6334_v46  ;;  %v7377_v49 = vpack.c.bf16 %v106_v57, %v100_v56  ;;  %v6405_v46 = vld [vmem:[%s8960_s3 + $0x50c] ss:$16 sps:$4 sm:$0xff]   ;;  %v178_v56 = vld [vmem:[%s8959_s2 + $0x170] sm:$0xff] }
  0xbf   :  { %1824 = vmatpush1.bf16.msra.mxu1 %v6337_v47  ;;  %1752 = vmatprep.subr.bf16.mxu0 %v6342_v45  ;;  %v6400_v47 = vld [vmem:[%s8960_s3 + $0x308] ss:$16 sps:$4 sm:$0xff]  }
  0xc0   :  { %1825 = vmatprep.subr.bf16.mxu1 %v6345_v48  ;;  %1658 = vmatprep.mubr.bf16.mxu0 %v7359_v51  ;;  %v6403_v45 = vld [vmem:[%s8960_s3 + $0x508] ss:$16 sps:$4 sm:$0xff]  }
  0xc1   :  { %1731 = vmatprep.mubr.bf16.mxu1 %v7145_v3  ;;  %v6357_v3 = vld [vmem:[%s8960_s3 + $0x40c] ss:$16 sps:$4 sm:$0xff]   ;;  %2206 = vperm.xlu1 %6117, %v2092_v42   ;;  %v2086_v42 = vld [vmem:[%s8963_s6 + $0x30] sm:$0xff] }
  0xc2   :  { %1753 = vmatpush1.bf16.msra.mxu0 %v6340_v52  ;;  %v2091_v48 = vld [vmem:[%s8963_s6 + $0x58] sm:$0xff]  ;;  %v146_v52 = vld [vmem:[%s8959_s2 + $0x70] sm:$0xff] }
  0xc3   :  { %1826 = vmatpush1.bf16.msra.mxu1 %v6343_v53  ;;  %1754 = vmatprep.subr.bf16.mxu0 %v6348_v58  ;;  %v147_v53 = vld [vmem:[%s8959_s2 + $0x78] sm:$0xff]  ;;  %v2090_v58 = vld [vmem:[%s8963_s6 + $0x50] sm:$0xff] }
  0xc4   :  { %1827 = vmatprep.subr.bf16.mxu1 %v6351_v59  ;;  %v179_v57 = vld [vmem:[%s8959_s2 + $0x178] sm:$0xff]  ;;  %v235_v59 = vpack.c.bf16 %v147_v53, %v146_v52 }
  0xc5   :  { %1659 = vmatmul.mubr.bf16.gmra.mxu0 %v7377_v49  ;;  %2201 = vperm.xlu1 %6117, %v2091_v48   ;;  %v2095_v24 = vld [vmem:[%s8963_s6 + $0x78] sm:$0xff] }
  0xc6   :  { %1732 = vmatmul.mubr.bf16.gmra.mxu1 %v7147_v7  ;;  %1755 = vmatpush1.bf16.msra.mxu0 %v6346_v60  ;;  %v6363_v7 = vld [vmem:[%s8960_s3 + $0x5ec] ss:$16 sps:$4 sm:$0xff]   ;;  %v251_v60 = vpack.c.bf16 %v179_v57, %v178_v56 }
  0xc7   :  { %1828 = vmatpush1.bf16.msra.mxu1 %v6349_v61  ;;  %1756 = vmatprep.subr.bf16.mxu0 %v6354_v63  ;;  %v144_v61 = vld [vmem:[%s8959_s2 + $0x60] sm:$0xff]  ;;  %v145_v63 = vld [vmem:[%s8959_s2 + $0x68] sm:$0xff] }
  0xc8   :  { %1829 = vmatprep.subr.bf16.mxu1 %v6357_v3  ;;  %1774 = vmatprep.mubr.bf16.mxu0 %v6989_v55  ;;  %v6369_v55 = vld [vmem:[%s8960_s3 + $0x5cc] ss:$16 sps:$4 sm:$0xff]   ;;  %v176_v3 = vld [vmem:[%s8959_s2 + $0x160] sm:$0xff] }
  0xc9   :  { %1847 = vmatprep.mubr.bf16.mxu1 %v7194_v32  ;;  %v6364_v32 = vld [vmem:[%s8960_s3 + $0x3c8] ss:$16 sps:$4 sm:$0xff]   ;;  %2196 = vperm.xlu1 %6117, %v2090_v58   ;;  %v2108_v58 = vld [vmem:[%s8963_s6 + $0xe0] sm:$0xff] }
  0xca   :  { %1757 = vmatpush1.bf16.msra.mxu0 %v6352_v0  ;;  %v177_v0 = vld [vmem:[%s8959_s2 + $0x168] sm:$0xff] }
  0xcb   :  { %1830 = vmatpush1.bf16.msra.mxu1 %v6355_v1  ;;  %1758 = vmatprep.subr.bf16.mxu0 %v6360_v2  ;;  %v234_v1 = vpack.c.bf16 %v145_v63, %v144_v61  ;;  %v250_v2 = vpack.c.bf16 %v177_v0, %v176_v3  ;;  %v2085_v57 = vld [vmem:[%s8963_s6 + $0x28] sm:$0xff]  ;;  %v158_v61 = vld [vmem:[%s8959_s2 + $0xd0] sm:$0xff]  ;;  %v159_v63 = vld [vmem:[%s8959_s2 + $0xd8] sm:$0xff] }
  0xcc   :  { %1831 = vmatprep.subr.bf16.mxu1 %v6363_v7  ;;  %v142_v7 = vld [vmem:[%s8959_s2 + $0x50] sm:$0xff] }
  0xce   :  { %1759 = vmatpush2.bf16.msra.mxu0 %v6358_v4  ;;  %v2089_v4 = vld [vmem:[%s8963_s6 + $0x48] sm:$0xff] }
  0xcf   :  { %1832 = vmatpush2.bf16.msra.mxu1 %v6361_v5  ;;  %1760 = vmatprep.subr.bf16.mxu0 %v6366_v6  ;;  %v175_v5 = vld [vmem:[%s8959_s2 + $0x158] sm:$0xff] }
  0xd0   :  { %1833 = vmatprep.subr.bf16.mxu1 %v6369_v55  ;;  %2191 = vperm.xlu1 %6117, %v2089_v4   ;;  %v191_v4 = vld [vmem:[%s8959_s2 + $0x1d8] sm:$0xff] }
  0xd2   :  { %1761 = vmatpush2.bf16.msra.mxu0 %v6364_v32  ;;  %v140_v32 = vld [vmem:[%s8959_s2 + $0x40] sm:$0xff] }
  0xd3   :  { %1834 = vmatpush2.bf16.msra.mxu1 %v6367_v8  ;;  %1762 = vmatprep.subr.bf16.mxu0 %v6372_v9  ;;  %v141_v8 = vld [vmem:[%s8959_s2 + $0x48] sm:$0xff]  ;;  %v2088_v9 = vld [vmem:[%s8963_s6 + $0x40] sm:$0xff] }
  0xd4   :  { %1835 = vmatprep.subr.bf16.mxu1 %v6375_v13  ;;  %v138_v13 = vld [vmem:[%s8959_s2 + $0x30] sm:$0xff]  ;;  %2186 = vperm.xlu1 %6117, %v2088_v9   ;;  %v155_v9 = vld [vmem:[%s8959_s2 + $0xb8] sm:$0xff] }
  0xd6   :  { %1763 = vmatpush2.bf16.msra.mxu0 %v6370_v14  ;;  %v139_v14 = vld [vmem:[%s8959_s2 + $0x38] sm:$0xff] }
  0xd7   :  { %1836 = vmatpush2.bf16.msra.mxu1 %v6373_v16  ;;  %1764 = vmatprep.subr.bf16.mxu0 %v6378_v17  ;;  %v170_v16 = vld [vmem:[%s8959_s2 + $0x130] sm:$0xff]  ;;  %v171_v17 = vld [vmem:[%s8959_s2 + $0x138] sm:$0xff] }
  0xd8   :  { %1837 = vmatprep.subr.bf16.mxu1 %v6381_v18  ;;  %v2111_v18 = vld [vmem:[%s8963_s6 + $0xf8] sm:$0xff] }
  0xd9   :  { %2301 = vperm.xlu0 %6116, %v2111_v18   ;;  %v2082_v18 = vld [vmem:[%s8963_s6 + $0x10] sm:$0xff] }
  0xda   :  { %1765 = vmatpush2.bf16.msra.mxu0 %v6376_v19  ;;  %v232_v19 = vpack.c.bf16 %v141_v8, %v140_v32  ;;  %v241_v32 = vpack.c.bf16 %v159_v63, %v158_v61 }
  0xdb   :  { %1838 = vmatpush2.bf16.msra.mxu1 %v6379_v22  ;;  %1766 = vmatprep.subr.bf16.mxu0 %v6384_v25  ;;  %v137_v25 = vld [vmem:[%s8959_s2 + $0x28] sm:$0xff] }
  0xdc   :  { %1839 = vmatprep.subr.bf16.mxu1 %v6387_v26  ;;  %v134_v26 = vld [vmem:[%s8959_s2 + $0x10] sm:$0xff] }
  0xdd   :  { %2221 = vperm.xlu0 %6116, %v2095_v24   ;;  %v2080_v24 = vld [vmem:[%s8963_s6] sm:$0xff] }
  0xde   :  { %1767 = vmatpush2.bf16.msra.mxu0 %v6382_v12  ;;  %v135_v12 = vld [vmem:[%s8959_s2 + $0x18] sm:$0xff] }
  0xdf   :  { %1840 = vmatpush2.bf16.msra.mxu1 %v6385_v27  ;;  %1768 = vmatprep.subr.bf16.mxu0 %v6390_v50  ;;  %v166_v27 = vld [vmem:[%s8959_s2 + $0x110] sm:$0xff]  ;;  %v230_v50 = vpack.c.bf16 %v137_v25, %v136_v23  ;;  %v153_v23 = vld [vmem:[%s8959_s2 + $0xa8] sm:$0xff]  ;;  %v184_v25 = vld [vmem:[%s8959_s2 + $0x1a0] sm:$0xff] }
  0xe0   :  { %1841 = vmatprep.subr.bf16.mxu1 %v6393_v34 }
  0xe2   :  { %1769 = vmatpush2.bf16.msra.mxu0 %v6388_v35  ;;  %v2087_v35 = vld [vmem:[%s8963_s6 + $0x38] sm:$0xff] }
  0xe3   :  { %1842 = vmatpush2.bf16.msra.mxu1 %v6391_v36  ;;  %1770 = vmatprep.subr.bf16.mxu0 %v6396_v38  ;;  %v229_v36 = vpack.c.bf16 %v135_v12, %v134_v26  ;;  %v245_v38 = vpack.c.bf16 %v167_v31, %v166_v27  ;;  %v185_v26 = vld [vmem:[%s8959_s2 + $0x1a8] sm:$0xff]  ;;  %v150_v12 = vld [vmem:[%s8959_s2 + $0x90] sm:$0xff]  ;;  %v151_v27 = vld [vmem:[%s8959_s2 + $0x98] sm:$0xff] }
  0xe4   :  { %1843 = vmatprep.subr.bf16.mxu1 %v6399_v39  ;;  %2181 = vperm.xlu1 %6117, %v2087_v35   ;;  %v6408_v39 = vld [vmem:[#allocation7 + $0x4] ss:$24 sps:$4 sm:$0xff]   ;;  %v8965_v35 = vlaneseq }
  0xe6   :  { %1771 = vmatpush2.bf16.msra.mxu0 %v6394_v41  ;;  %v6411_v41 = vld [vmem:[#allocation7 + $0xc] ss:$24 sps:$4 sm:$0xff]  }
  0xe7   :  { %1844 = vmatpush2.bf16.msra.mxu1 %v6397_v44  ;;  %1772 = vmatprep.subr.bf16.mxu0 %v6402_v29  ;;  %v162_v44 = vld [vmem:[%s8959_s2 + $0xf0] sm:$0xff]  ;;  %v163_v29 = vld [vmem:[%s8959_s2 + $0xf8] sm:$0xff] }
  0xe8   :  { %1845 = vmatprep.subr.bf16.mxu1 %v6405_v46  ;;  %v194_v46 = vld [vmem:[%s8959_s2 + $0x1f0] sm:$0xff]  ;;  %2176 = vperm.xlu1 %6117, %v2086_v42   ;;  %v243_v53 = vpack.c.bf16 %v163_v29, %v162_v44  ;;  %v7807_v42 = vshrl.u32 %v8965_v35, 7  ;;  %v181_v44 = vld [vmem:[%s8959_s2 + $0x188] sm:$0xff]  ;;  %v7817_v29 = vld [vmem:[%s8961_s4] sm:$0xf]  ;;  %s6785_s4 = smov [#allocation9]  }
  0xe9   :  { %v6511_v35 = vld [vmem:[#allocation7 + $0x338] ss:$24 sps:$4 sm:$0xff]   ;;  %s5506_s12 = sshll.u32 %s6785_s4, 4  ;;  %s5507_s12 = int_to_ptr.vmem [resolvable:$true] %s5506_s12 }
  0xea   :  { %1773 = vmatpush2.bf16.msra.mxu0 %v6400_v47  ;;  %v195_v47 = vld [vmem:[%s8959_s2 + $0x1f8] sm:$0xff]  ;;  %8970 = vst [vmem:[#allocation14_spill] sm:$0xff] %v7807_v42  ;;  %s6746_s13 = scalar_lea.vmem %s5507_s12, 1024  ;;  %p6751_p2 = scmp.lt.s32.totalorder %s5507_s12, %s5507_s12 }
  0xeb   :  { %1846 = vmatpush2.bf16.msra.mxu1 %v6403_v45  ;;  %3424 = vmatprep.subr.bf16.mxu0 %v6781_v28  ;;  %v2109_v45 = vld [vmem:[%s8963_s6 + $0xe8] sm:$0xff]  ;;  %v259_v56 = vpack.c.bf16 %v195_v47, %v194_v46  ;;  %p6747_p1 = scmp.ne.s32.totalorder %s5507_s12, %s6746_s13  ;;  %p6752_p3 = scmp.lt.s32.totalorder %s6746_s13, %s6746_s13 }
  0xec   :  { %3713 = vmatprep.subr.bf16.mxu1 %v6781_v28  ;;  %2291 = vperm.xlu0 %6116, %v2109_v45   ;;  %v472_v45 = vsub.s32 0, %v7807_v42 }
  0xed   :  { %1775 = vmatmul.mubr.bf16.vlgmr.msra.gmra.mxu0 %v7049_v15  ;;  %v143_v15 = vld [vmem:[%s8959_s2 + $0x58] sm:$0xff]  ;;  %2171 = vperm.xlu1 %6117, %v2085_v57   ;;  %v6412_v57 = vld [vmem:[#allocation7 + $0x34] ss:$24 sps:$4 sm:$0xff]   ;;  %p6753_p4 = por %p6752_p3, %p6751_p2 }
  0xee   :  { %1848 = vmatmul.mubr.bf16.vlgmr.msra.gmra.mxu1 %v7287_v10  ;;  %3425 = vmatpush1.bf16.msra.mxu0 %v235_v59  ;;  %v174_v10 = vld [vmem:[%s8959_s2 + $0x150] sm:$0xff]  ;;  %v233_v6 = vpack.c.bf16 %v143_v15, %v142_v7  ;;  %v192_v59 = vld [vmem:[%s8959_s2 + $0x1e0] sm:$0xff]  ;;  %v2107_v7 = vld [vmem:[%s8963_s6 + $0xd8] sm:$0xff]  ;;  %v7839_v61 = vrot.slane %v7817_v29, %v472_v45 }
  0xef   :  { %3714 = vmatpush1.bf16.msra.mxu1 %v251_v60  ;;  %3426 = vmatprep.subr.bf16.mxu0 %v6781_v28  ;;  %v249_v55 = vpack.c.bf16 %v175_v5, %v174_v10  ;;  %v193_v60 = vld [vmem:[%s8959_s2 + $0x1e8] sm:$0xff]  ;;  %v2083_v15 = vld [vmem:[%s8963_s6 + $0x18] sm:$0xff]  ;;  %v2106_v10 = vld [vmem:[%s8963_s6 + $0xd0] sm:$0xff]  ;;  %p6754_p5 = pnand %p6753_p4, %p6747_p1 }
  0xf0   :  { %3715 = vmatprep.subr.bf16.mxu1 %v6781_v28  ;;  %1784 = vmatprep.mubr.bf16.mxu0 %v7083_v33  ;;  %v172_v33 = vld [vmem:[%s8959_s2 + $0x140] sm:$0xff]  ;;  %v258_v0 = vpack.c.bf16 %v193_v60, %v192_v59  ;;  %v209_v60 = vld [vmem:[%s8959_s2 + $0x268] sm:$0xff] }
  0xf1   :  { %1857 = vmatprep.mubr.bf16.mxu1 %v7301_v21  ;;  %v173_v21 = vld [vmem:[%s8959_s2 + $0x148] sm:$0xff]  ;;  %2286 = vperm.xlu0 %6116, %v2108_v58   ;;  %v156_v5 = vld [vmem:[%s8959_s2 + $0xc0] sm:$0xff]  ;;  %v6414_v58 = vld [vmem:[#allocation7 + $0x3c] ss:$24 sps:$4 sm:$0xff]  }
  0xf2   :  { %3427 = vmatpush1.bf16.msra.mxu0 %v234_v1  ;;  %v248_v22 = vpack.c.bf16 %v173_v21, %v172_v33  ;;  %v190_v1 = vld [vmem:[%s8959_s2 + $0x1d0] sm:$0xff]  ;;  %v189_v33 = vld [vmem:[%s8959_s2 + $0x1c8] sm:$0xff]  ;;  %v208_v59 = vld [vmem:[%s8959_s2 + $0x260] sm:$0xff] }
  0xf3   :  { %3716 = vmatpush1.bf16.msra.mxu1 %v250_v2  ;;  %3428 = vmatprep.subr.bf16.mxu0 %v6781_v28  ;;  %v2084_v2 = vld [vmem:[%s8963_s6 + $0x20] sm:$0xff]  ;;  %v257_v8 = vpack.c.bf16 %v191_v4, %v190_v1  ;;  %v154_v21 = vld [vmem:[%s8959_s2 + $0xb0] sm:$0xff]  ;;  %v266_v4 = vpack.c.bf16 %v209_v60, %v208_v59  ;;  %v2125_v59 = vld [vmem:[%s8963_s6 + $0x168] sm:$0xff] }
  0xf4   :  { %3717 = vmatprep.subr.bf16.mxu1 %v6781_v28  ;;  %2166 = vperm.xlu1 %6117, %v2084_v2   ;;  %v2100_v2 = vld [vmem:[%s8963_s6 + $0xa0] sm:$0xff] }
  0xf5   :  { %1785 = vmatmul.mubr.bf16.gmra.mxu0 %v7100_v40  ;;  %v231_v40 = vpack.c.bf16 %v139_v14, %v138_v13  ;;  %2281 = vperm.xlu0 %6116, %v2107_v7   ;;  %v186_v13 = vld [vmem:[%s8959_s2 + $0x1b0] sm:$0xff]  ;;  %v187_v14 = vld [vmem:[%s8959_s2 + $0x1b8] sm:$0xff] }
  0xf6   :  { %1858 = vmatmul.mubr.bf16.gmra.mxu1 %v7319_v30  ;;  %3429 = vmatpush1.bf16.msra.mxu0 %v233_v6  ;;  %v247_v30 = vpack.c.bf16 %v171_v17, %v170_v16  ;;  %v157_v6 = vld [vmem:[%s8959_s2 + $0xc8] sm:$0xff] }
  0xf7   :  { %3718 = vmatpush1.bf16.msra.mxu1 %v249_v55  ;;  %3430 = vmatprep.subr.bf16.mxu0 %v6781_v28  ;;  %v188_v55 = vld [vmem:[%s8959_s2 + $0x1c0] sm:$0xff]  ;;  %v240_v16 = vpack.c.bf16 %v157_v6, %v156_v5 }
  0xf8   :  { %3719 = vmatprep.subr.bf16.mxu1 %v6781_v28  ;;  %1794 = vmatprep.mubr.bf16.mxu0 %v7119_v54  ;;  %v168_v54 = vld [vmem:[%s8959_s2 + $0x120] sm:$0xff]  ;;  %v256_v17 = vpack.c.bf16 %v189_v33, %v188_v55  ;;  %v6416_v55 = vld [vmem:[#allocation7 + $0x30] ss:$24 sps:$4 sm:$0xff]  }
  0xf9   :  { %1867 = vmatprep.mubr.bf16.mxu1 %v7333_v37  ;;  %v169_v37 = vld [vmem:[%s8959_s2 + $0x128] sm:$0xff]  ;;  %2161 = vperm.xlu1 %6117, %v2083_v15   ;;  %v206_v15 = vld [vmem:[%s8959_s2 + $0x250] sm:$0xff] }
  0xfa   :  { %3431 = vmatpush1.bf16.msra.mxu0 %v232_v19  ;;  %v246_v34 = vpack.c.bf16 %v169_v37, %v168_v54  ;;  %2276 = vperm.xlu0 %6116, %v2106_v10   ;;  %v2105_v19 = vld [vmem:[%s8963_s6 + $0xc8] sm:$0xff]  ;;  %v239_v54 = vpack.c.bf16 %v155_v9, %v154_v21  ;;  %v255_v37 = vpack.c.bf16 %v187_v14, %v186_v13  ;;  %v207_v10 = vld [vmem:[%s8959_s2 + $0x258] sm:$0xff] }
  0xfb   :  { %3720 = vmatpush1.bf16.msra.mxu1 %v248_v22  ;;  %3432 = vmatprep.subr.bf16.mxu0 %v6781_v28  ;;  %v2081_v22 = vld [vmem:[%s8963_s6 + $0x8] sm:$0xff]  ;;  %v6418_v21 = vld [vmem:[#allocation7 + $0x64] ss:$24 sps:$4 sm:$0xff]  }
  0xfc   :  { %3721 = vmatprep.subr.bf16.mxu1 %v6781_v28  ;;  %v2099_v14 = vld [vmem:[%s8963_s6 + $0x98] sm:$0xff] }
  0xfd   :  { %1795 = vmatmul.mubr.bf16.gmra.mxu0 %v7136_v62  ;;  %v132_v62 = vld [vmem:[%s8959_s2] sm:$0xff]  ;;  %2156 = vperm.xlu1 %6117, %v2082_v18  }
  0xfe   :  { %1868 = vmatmul.mubr.bf16.gmra.mxu1 %v7345_v43  ;;  %3433 = vmatpush1.bf16.msra.mxu0 %v231_v40  ;;  %v133_v43 = vld [vmem:[%s8959_s2 + $0x8] sm:$0xff]  ;;  %v2104_v40 = vld [vmem:[%s8963_s6 + $0xc0] sm:$0xff] }
  0xff   :  { %3722 = vmatpush1.bf16.msra.mxu1 %v247_v30  ;;  %3434 = vmatprep.subr.bf16.mxu0 %v6781_v28  ;;  %v228_v48 = vpack.c.bf16 %v133_v43, %v132_v62  ;;  %v152_v30 = vld [vmem:[%s8959_s2 + $0xa0] sm:$0xff]  ;;  %v2103_v62 = vld [vmem:[%s8963_s6 + $0xb8] sm:$0xff] }
 0x100   :  { %3723 = vmatprep.subr.bf16.mxu1 %v6781_v28  ;;  %1804 = vmatprep.mubr.bf16.mxu0 %v7155_v11  ;;  %v164_v11 = vld [vmem:[%s8959_s2 + $0x100] sm:$0xff]  ;;  %v238_v31 = vpack.c.bf16 %v153_v23, %v152_v30  ;;  %v183_v43 = vld [vmem:[%s8959_s2 + $0x198] sm:$0xff]  ;;  %v205_v30 = vld [vmem:[%s8959_s2 + $0x248] sm:$0xff] }
 0x101   :  { %1877 = vmatprep.mubr.bf16.mxu1 %v7359_v51  ;;  %v165_v51 = vld [vmem:[%s8959_s2 + $0x108] sm:$0xff]  ;;  %2271 = vperm.xlu0 %6116, %v2105_v19   ;;  %v204_v19 = vld [vmem:[%s8959_s2 + $0x240] sm:$0xff]  ;;  %v2098_v23 = vld [vmem:[%s8963_s6 + $0x90] sm:$0xff] }
 0x102   :  { %3435 = vmatpush1.bf16.msra.mxu0 %v230_v50  ;;  %v244_v52 = vpack.c.bf16 %v165_v51, %v164_v11  ;;  %2151 = vperm.xlu1 %6117, %v2081_v22   ;;  %v254_v50 = vpack.c.bf16 %v185_v26, %v184_v25  ;;  %v149_v11 = vld [vmem:[%s8959_s2 + $0x88] sm:$0xff]  ;;  %v180_v51 = vld [vmem:[%s8959_s2 + $0x180] sm:$0xff] }
 0x103   :  { %3724 = vmatpush1.bf16.msra.mxu1 %v246_v34  ;;  %3436 = vmatprep.subr.bf16.mxu0 %v6781_v28  ;;  %v182_v34 = vld [vmem:[%s8959_s2 + $0x190] sm:$0xff]  ;;  %v252_v47 = vpack.c.bf16 %v181_v44, %v180_v51  ;;  %v6420_v18 = vld [vmem:[#allocation7 + $0x6c] ss:$24 sps:$4 sm:$0xff]  }
 0x104   :  { %3725 = vmatprep.subr.bf16.mxu1 %v6781_v28  ;;  %v6426_v44 = vld [vmem:[#allocation7 + $0x9c] ss:$24 sps:$4 sm:$0xff]  }
 0x105   :  { %1805 = vmatmul.mubr.bf16.gmra.mxu0 %v7172_v20  ;;  %v160_v20 = vld [vmem:[%s8959_s2 + $0xe0] sm:$0xff]  ;;  %2266 = vperm.xlu0 %6116, %v2104_v40   ;;  %v265_v40 = vpack.c.bf16 %v207_v10, %v206_v15  ;;  %v199_v15 = vld [vmem:[%s8959_s2 + $0x218] sm:$0xff] }
 0x106   :  { %1878 = vmatmul.mubr.bf16.gmra.mxu1 %v7377_v49  ;;  %3437 = vmatpush1.bf16.msra.mxu0 %v229_v36  ;;  %v161_v49 = vld [vmem:[%s8959_s2 + $0xe8] sm:$0xff]  ;;  %v2102_v36 = vld [vmem:[%s8963_s6 + $0xb0] sm:$0xff]  ;;  %v2124_v10 = vld [vmem:[%s8963_s6 + $0x160] sm:$0xff] }
 0x107   :  { %3726 = vmatpush1.bf16.msra.mxu1 %v245_v38  ;;  %3438 = vmatprep.subr.bf16.mxu0 %v6781_v28  ;;  %v242_v3 = vpack.c.bf16 %v161_v49, %v160_v20  ;;  %v148_v38 = vld [vmem:[%s8959_s2 + $0x80] sm:$0xff]  ;;  %v2101_v20 = vld [vmem:[%s8963_s6 + $0xa8] sm:$0xff] }
 0x108   :  { %3727 = vmatprep.subr.bf16.mxu1 %v6781_v28  ;;  %3456 = vmatprep.mubr.bf16.mxu0 %v6408_v39  ;;  %v237_v39 = vpack.c.bf16 %v151_v27, %v150_v12  ;;  %v236_v46 = vpack.c.bf16 %v149_v11, %v148_v38  ;;  %v6406_v49 = vld [vmem:[#allocation7] ss:$24 sps:$4 sm:$0xff]   ;;  %v202_v27 = vld [vmem:[%s8959_s2 + $0x230] sm:$0xff] }
 0x109   :  { %3745 = vmatprep.mubr.bf16.mxu1 %v6411_v41  ;;  %2146 = vperm.xlu1 %6117, %v2080_v24   ;;  %v253_v41 = vpack.c.bf16 %v183_v43, %v182_v34  ;;  %v6423_v34 = vld [vmem:[#allocation7 + $0x68] ss:$24 sps:$4 sm:$0xff]  }
 0x10a   :  { %3439 = vmatpush1.bf16.msra.mxu0 %v228_v48  ;;  %2261 = vperm.xlu0 %6116, %v2103_v62   ;;  %v210_v48 = vld [vmem:[%s8959_s2 + $0x270] sm:$0xff]  ;;  %v264_v62 = vpack.c.bf16 %v205_v30, %v204_v19  ;;  %v2097_v43 = vld [vmem:[%s8963_s6 + $0x88] sm:$0xff] }
 0x10b   :  { %3728 = vmatpush1.bf16.msra.mxu1 %v244_v52  ;;  %3440 = vmatprep.subr.bf16.mxu0 %v6781_v28  ;;  %v211_v52 = vld [vmem:[%s8959_s2 + $0x278] sm:$0xff]  ;;  %v197_v30 = vld [vmem:[%s8959_s2 + $0x208] sm:$0xff] }
 0x10c   :  { %3729 = vmatprep.subr.bf16.mxu1 %v6781_v28  ;;  %v267_v63 = vpack.c.bf16 %v211_v52, %v210_v48 }
 0x10e   :  { %3441 = vmatpush2.bf16.msra.mxu0 %v243_v53  ;;  %2256 = vperm.xlu0 %6116, %v2102_v36   ;;  %v6409_v53 = vld [vmem:[#allocation7 + $0x8] ss:$24 sps:$4 sm:$0xff]   ;;  %v2126_v36 = vld [vmem:[%s8963_s6 + $0x170] sm:$0xff] }
 0x10f   :  { %3730 = vmatpush2.bf16.msra.mxu1 %v259_v56  ;;  %3442 = vmatprep.subr.bf16.mxu0 %v6781_v28  ;;  %v476_v56 = vsub.s32 1, %v7807_v42 }
 0x110   :  { %3731 = vmatprep.subr.bf16.mxu1 %v6781_v28 }
 0x112   :  { %3443 = vmatpush2.bf16.msra.mxu0 %v242_v3  ;;  %2251 = vperm.xlu0 %6116, %v2101_v20   ;;  %v7844_v3 = vrot.slane %v7817_v29, %v476_v56 }
 0x113   :  { %3732 = vmatpush2.bf16.msra.mxu1 %v258_v0  ;;  %3444 = vmatprep.subr.bf16.mxu0 %v6781_v28 }
 0x114   :  { %3733 = vmatprep.subr.bf16.mxu1 %v6781_v28  ;;  %8971 = vst [vmem:[#allocation15_spill] sm:$0xff] %v7844_v3 }
 0x116   :  { %3445 = vmatpush2.bf16.msra.mxu0 %v241_v32  ;;  %v6417_v32 = vld [vmem:[#allocation7 + $0x38] ss:$24 sps:$4 sm:$0xff]   ;;  %2246 = vperm.xlu0 %6116, %v2100_v2  }
 0x117   :  { %3734 = vmatpush2.bf16.msra.mxu1 %v257_v8  ;;  %3446 = vmatprep.subr.bf16.mxu0 %v6781_v28 }
 0x118   :  { %3735 = vmatprep.subr.bf16.mxu1 %v6781_v28 }
 0x11a   :  { %3447 = vmatpush2.bf16.msra.mxu0 %v240_v16  ;;  %2241 = vperm.xlu0 %6116, %v2099_v14  }
 0x11b   :  { %3736 = vmatpush2.bf16.msra.mxu1 %v256_v17  ;;  %3448 = vmatprep.subr.bf16.mxu0 %v6781_v28 }
 0x11c   :  { %3737 = vmatprep.subr.bf16.mxu1 %v6781_v28 }
 0x11e   :  { %3449 = vmatpush2.bf16.msra.mxu0 %v239_v54  ;;  %2236 = vperm.xlu0 %6116, %v2098_v23  }
 0x11f   :  { %3738 = vmatpush2.bf16.msra.mxu1 %v255_v37  ;;  %3450 = vmatprep.subr.bf16.mxu0 %v6781_v28  ;;  %v2127_v37 = vld [vmem:[%s8963_s6 + $0x178] sm:$0xff] }
 0x120   :  { %3739 = vmatprep.subr.bf16.mxu1 %v6781_v28  ;;  %2381 = vperm.xlu1 %6117, %v2127_v37   ;;  %v2123_v37 = vld [vmem:[%s8963_s6 + $0x158] sm:$0xff] }
 0x122   :  { %3451 = vmatpush2.bf16.msra.mxu0 %v238_v31  ;;  %v203_v31 = vld [vmem:[%s8959_s2 + $0x238] sm:$0xff]  ;;  %2231 = vperm.xlu0 %6116, %v2097_v43  }
 0x123   :  { %3740 = vmatpush2.bf16.msra.mxu1 %v254_v50  ;;  %3452 = vmatprep.subr.bf16.mxu0 %v6781_v28  ;;  %v6422_v50 = vld [vmem:[#allocation7 + $0x60] ss:$24 sps:$4 sm:$0xff]   ;;  %v7909_v52 = vpack.c.bf16 %v203_v31, %v202_v27 }
 0x124   :  { %3741 = vmatprep.subr.bf16.mxu1 %v6781_v28  ;;  %2376 = vperm.xlu1 %6117, %v2126_v36   ;;  %v227_v43 = vld [vmem:[%s8959_s2 + $0x2f8] sm:$0xff]  ;;  %v2122_v36 = vld [vmem:[%s8963_s6 + $0x150] sm:$0xff] }
 0x126   :  { %3453 = vmatpush2.bf16.msra.mxu0 %v237_v39 }
 0x127   :  { %3742 = vmatpush2.bf16.msra.mxu1 %v253_v41  ;;  %3454 = vmatprep.subr.bf16.mxu0 %v6781_v28  ;;  %v6424_v41 = vld [vmem:[#allocation7 + $0x94] ss:$24 sps:$4 sm:$0xff]  }
 0x128   :  { %3743 = vmatprep.subr.bf16.mxu1 %v6781_v28  ;;  %2371 = vperm.xlu1 %6117, %v2125_v59   ;;  %v2121_v59 = vld [vmem:[%s8963_s6 + $0x148] sm:$0xff] }
 0x12a   :  { %3455 = vmatpush2.bf16.msra.mxu0 %v236_v46 }
 0x12b   :  { %3744 = vmatpush2.bf16.msra.mxu1 %v252_v47  ;;  %4002 = vmatprep.subr.bf16.mxu0 %v6781_v28 }
 0x12c   :  { %6070 = vmatprep.subr.bf16.mxu1 %v6781_v28  ;;  %2366 = vperm.xlu1 %6117, %v2124_v10   ;;  %v6444_v10 = vld [vmem:[#allocation7 + $0x12c] ss:$24 sps:$4 sm:$0xff]  }
 0x12d   :  { %v1484_v0 = vpop.f32.mrf.mxu0  ;;  %3457 = vmatmul.mubr.bf16.vlgmr.msra.gmra.mxu0 %v6406_v49  ;;  %v200_v49 = vld [vmem:[%s8959_s2 + $0x220] sm:$0xff] }
 0x12e   :  { %3746 = vmatmul.mubr.bf16.vlgmr.msra.gmra.mxu1 %v6409_v53  ;;  %v1557_v1 = vpop.f32.mrf.mxu1  ;;  %v1485_v7 = vadd.f32 %v1484_v0, %v7839_v61  ;;  %4003 = vmatpush1.bf16.msra.mxu0 %v267_v63  ;;  %v201_v53 = vld [vmem:[%s8959_s2 + $0x228] sm:$0xff] }
 0x12f   :  { %3464 = vmatprep.mubr.bf16.mxu0 %v6412_v57  ;;  %v1486_v5 = vpop.f32.mrf.mxu0  ;;  %3753 = vmatprep.mubr.bf16.mxu1 %v6414_v58  ;;  %v2096_v58 = vld [vmem:[%s8963_s6 + $0x80] sm:$0xff] }
 0x130   :  { %v1559_v6 = vpop.f32.mrf.mxu1  ;;  %4004 = vmatprep.subr.bf16.mxu0 %v6781_v28  ;;  %v1487_v8 = vadd.f32 %v1486_v5, %v7844_v3  ;;  %v7858_v33 = vadd.f32 %v1557_v1, %v1485_v7  ;;  %6086 = vmatpush1.bf16.msra.mxu1 %v267_v63  ;;  %v7930_v1 = vpack.c.bf16 %v201_v53, %v200_v49  ;;  %v6428_v5 = vld [vmem:[#allocation7 + $0x90] ss:$24 sps:$4 sm:$0xff]  }
 0x131   :  { %v1488_v9 = vpop.f32.mrf.mxu0  ;;  %6071 = vmatprep.subr.bf16.mxu1 %v6781_v28  ;;  %2226 = vperm.xlu0 %6116, %v2096_v58   ;;  %v225_v58 = vld [vmem:[%s8959_s2 + $0x2e8] sm:$0xff] }
 0x132   :  { %v1561_v13 = vpop.f32.mrf.mxu1  ;;  %v1489_v16 = vadd.f32 %v1488_v9, %v7839_v61  ;;  %v7865_v17 = vadd.f32 %v1559_v6, %v1487_v8  ;;  %4005 = vmatpush1.bf16.msra.mxu0 %v266_v4  ;;  %v6429_v6 = vld [vmem:[#allocation7 + $0x98] ss:$24 sps:$4 sm:$0xff]   ;;  %v6430_v8 = vld [vmem:[#allocation7 + $0xc4] ss:$24 sps:$4 sm:$0xff]   ;;  %2361 = vperm.xlu1 %6117, %v2123_v37  }
 0x133   :  { %v7870_v22 = vpop.f32.mrf.mxu0  ;;  %4006 = vmatprep.subr.bf16.mxu0 %v6781_v28  ;;  %v6452_v37 = vld [vmem:[#allocation7 + $0x150] ss:$24 sps:$4 sm:$0xff]  }
 0x134   :  { %8972 = vst [vmem:[#allocation16_spill] sm:$0xff] %v7870_v22  ;;  %v7879_v25 = vadd.f32 %v1561_v13, %v1489_v16  ;;  %6087 = vmatpush1.bf16.msra.mxu1 %v266_v4  ;;  %v7884_v26 = vpop.f32.mrf.mxu1  ;;  %v198_v4 = vld [vmem:[%s8959_s2 + $0x210] sm:$0xff] }
 0x135   :  { %3465 = vmatmul.mubr.bf16.gmra.mxu0 %v6416_v55  ;;  %v1494_v54 = vpop.f32.mrf.mxu0  ;;  %8973 = vst [vmem:[#allocation17_spill] sm:$0xff] %v7884_v26  ;;  %6072 = vmatprep.subr.bf16.mxu1 %v6781_v28 }
 0x136   :  { %3754 = vmatmul.mubr.bf16.gmra.mxu1 %v6417_v32  ;;  %3472 = vmatprep.mubr.bf16.mxu0 %v6418_v21  ;;  %v1495_v12 = vadd.f32 %v1494_v54, %v7839_v61  ;;  %v1567_v11 = vpop.f32.mrf.mxu1  ;;  %v6432_v21 = vld [vmem:[#allocation7 + $0xcc] ss:$24 sps:$4 sm:$0xff]  }
 0x137   :  { %3761 = vmatprep.mubr.bf16.mxu1 %v6420_v18  ;;  %4007 = vmatpush1.bf16.msra.mxu0 %v265_v40  ;;  %v1496_v24 = vpop.f32.mrf.mxu0  ;;  %v261_v18 = vpack.c.bf16 %v199_v15, %v198_v4  ;;  %v6441_v4 = vld [vmem:[#allocation7 + $0xf8] ss:$24 sps:$4 sm:$0xff]   ;;  %v6442_v15 = vld [vmem:[#allocation7 + $0x124] ss:$24 sps:$4 sm:$0xff]  }
 0x138   :  { %v1497_v38 = vadd.f32 %v1496_v24, %v7844_v3  ;;  %4008 = vmatprep.subr.bf16.mxu0 %v6781_v28  ;;  %v7901_v51 = vadd.f32 %v1567_v11, %v1495_v12  ;;  %v1569_v47 = vpop.f32.mrf.mxu1  ;;  %6088 = vmatpush1.bf16.msra.mxu1 %v265_v40  ;;  %v196_v40 = vld [vmem:[%s8959_s2 + $0x200] sm:$0xff] }
 0x139   :  { %v1498_v39 = vpop.f32.mrf.mxu0  ;;  %6073 = vmatprep.subr.bf16.mxu1 %v6781_v28  ;;  %v6435_v11 = vld [vmem:[#allocation7 + $0xc8] ss:$24 sps:$4 sm:$0xff]   ;;  %2356 = vperm.xlu1 %6117, %v2122_v36  }
 0x13a   :  { %v1499_v46 = vadd.f32 %v1498_v39, %v7839_v61  ;;  %v7905_v45 = vadd.f32 %v1569_v47, %v1497_v38  ;;  %v1571_v20 = vpop.f32.mrf.mxu1  ;;  %v6434_v38 = vld [vmem:[#allocation7 + $0xc0] ss:$24 sps:$4 sm:$0xff]  }
 0x13b   :  { %v7907_v48 = vpop.f32.mrf.mxu0  ;;  %4009 = vmatpush1.bf16.msra.mxu0 %v264_v62  ;;  %v6458_v36 = vld [vmem:[#allocation7 + $0x180] ss:$24 sps:$4 sm:$0xff]  }
 0x13c   :  { %8974 = vst [vmem:[#allocation18_spill] sm:$0xff] %v7907_v48  ;;  %4010 = vmatprep.subr.bf16.mxu0 %v6781_v28  ;;  %v7918_v56 = vadd.f32 %v1571_v20, %v1499_v46  ;;  %v7927_v63 = vpop.f32.mrf.mxu1  ;;  %6089 = vmatpush1.bf16.msra.mxu1 %v264_v62  ;;  %v226_v62 = vld [vmem:[%s8959_s2 + $0x2f0] sm:$0xff] }
 0x13d   :  { %3473 = vmatmul.mubr.bf16.gmra.mxu0 %v6422_v50  ;;  %v1504_v57 = vpop.f32.mrf.mxu0  ;;  %8975 = vst [vmem:[#allocation19_spill] sm:$0xff] %v7927_v63  ;;  %6074 = vmatprep.subr.bf16.mxu1 %v6781_v28  ;;  %v260_v50 = vpack.c.bf16 %v197_v30, %v196_v40  ;;  %v6438_v46 = vld [vmem:[#allocation7 + $0xfc] ss:$24 sps:$4 sm:$0xff]   ;;  %v275_v53 = vpack.c.bf16 %v227_v43, %v226_v62  ;;  %v221_v40 = vld [vmem:[%s8959_s2 + $0x2c8] sm:$0xff]  ;;  %v484_v62 = vsub.s32 3, %v7807_v42 }
 0x13e   :  { %3762 = vmatmul.mubr.bf16.gmra.mxu1 %v6423_v34  ;;  %3480 = vmatprep.mubr.bf16.mxu0 %v6424_v41  ;;  %v1505_v60 = vadd.f32 %v1504_v57, %v7839_v61  ;;  %v1577_v7 = vpop.f32.mrf.mxu1  ;;  %v2114_v43 = vld [vmem:[%s8963_s6 + $0x110] sm:$0xff] }
 0x13f   :  { %3769 = vmatprep.mubr.bf16.mxu1 %v6426_v44  ;;  %v1506_v0 = vpop.f32.mrf.mxu0  ;;  %4011 = vmatpush1.bf16.msra.mxu0 %v7909_v52  ;;  %v6436_v44 = vld [vmem:[#allocation7 + $0xf4] ss:$24 sps:$4 sm:$0xff]  }
 0x140   :  { %v1507_v2 = vadd.f32 %v1506_v0, %v7844_v3  ;;  %4012 = vmatprep.subr.bf16.mxu0 %v6781_v28  ;;  %v7943_v55 = vadd.f32 %v1577_v7, %v1505_v60  ;;  %v1579_v13 = vpop.f32.mrf.mxu1  ;;  %6090 = vmatpush1.bf16.msra.mxu1 %v7909_v52  ;;  %v224_v52 = vld [vmem:[%s8959_s2 + $0x2e0] sm:$0xff]  ;;  %v222_v0 = vld [vmem:[%s8959_s2 + $0x2d0] sm:$0xff] }
 0x141   :  { %v1508_v32 = vpop.f32.mrf.mxu0  ;;  %6075 = vmatprep.subr.bf16.mxu1 %v6781_v28  ;;  %v274_v60 = vpack.c.bf16 %v225_v58, %v224_v52  ;;  %2351 = vperm.xlu1 %6117, %v2121_v59   ;;  %v6440_v7 = vld [vmem:[#allocation7 + $0xf0] ss:$24 sps:$4 sm:$0xff]  }
 0x142   :  { %v1509_v9 = vadd.f32 %v1508_v32, %v7839_v61  ;;  %v7947_v14 = vadd.f32 %v1579_v13, %v1507_v2  ;;  %v1581_v19 = vpop.f32.mrf.mxu1  ;;  %v2120_v2 = vld [vmem:[%s8963_s6 + $0x140] sm:$0xff]  ;;  %v2118_v32 = vld [vmem:[%s8963_s6 + $0x130] sm:$0xff]  ;;  %v2113_v52 = vld [vmem:[%s8963_s6 + $0x108] sm:$0xff] }
 0x143   :  { %v7949_v16 = vpop.f32.mrf.mxu0  ;;  %4013 = vmatpush1.bf16.msra.mxu0 %v7930_v1  ;;  %v6450_v13 = vld [vmem:[#allocation7 + $0x15c] ss:$24 sps:$4 sm:$0xff]  }
 0x144   :  { %8976 = vst [vmem:[#allocation20_spill] sm:$0xff] %v7949_v16  ;;  %4014 = vmatprep.subr.bf16.mxu0 %v6781_v28  ;;  %v7960_v23 = vadd.f32 %v1581_v19, %v1509_v9  ;;  %v7966_v27 = vpop.f32.mrf.mxu1  ;;  %6091 = vmatpush1.bf16.msra.mxu1 %v7930_v1  ;;  %v223_v1 = vld [vmem:[%s8959_s2 + $0x2d8] sm:$0xff]  ;;  %v6448_v9 = vld [vmem:[#allocation7 + $0x154] ss:$24 sps:$4 sm:$0xff]   ;;  %v220_v19 = vld [vmem:[%s8959_s2 + $0x2c0] sm:$0xff] }
 0x145   :  { %3481 = vmatmul.mubr.bf16.gmra.mxu0 %v6428_v5  ;;  %v1514_v54 = vpop.f32.mrf.mxu0  ;;  %8977 = vst [vmem:[#allocation21_spill] sm:$0xff] %v7966_v27  ;;  %6076 = vmatprep.subr.bf16.mxu1 %v6781_v28  ;;  %v273_v5 = vpack.c.bf16 %v223_v1, %v222_v0  ;;  %v272_v30 = vpack.c.bf16 %v221_v40, %v220_v19 }
 0x146   :  { %3770 = vmatmul.mubr.bf16.gmra.mxu1 %v6429_v6  ;;  %3488 = vmatprep.mubr.bf16.mxu0 %v6430_v8  ;;  %v1515_v12 = vadd.f32 %v1514_v54, %v7839_v61  ;;  %v1587_v24 = vpop.f32.mrf.mxu1  ;;  %v2119_v6 = vld [vmem:[%s8963_s6 + $0x138] sm:$0xff]  ;;  %v2116_v54 = vld [vmem:[%s8963_s6 + $0x120] sm:$0xff] }
 0x147   :  { %3777 = vmatprep.mubr.bf16.mxu1 %v6432_v21  ;;  %v1516_v31 = vpop.f32.mrf.mxu0  ;;  %4015 = vmatpush1.bf16.msra.mxu0 %v261_v18  ;;  %v6446_v8 = vld [vmem:[#allocation7 + $0x120] ss:$24 sps:$4 sm:$0xff]  }
 0x148   :  { %v1517_v34 = vadd.f32 %v1516_v31, %v7844_v3  ;;  %4016 = vmatprep.subr.bf16.mxu0 %v6781_v28  ;;  %v7980_v39 = vadd.f32 %v1587_v24, %v1515_v12  ;;  %v1589_v20 = vpop.f32.mrf.mxu1  ;;  %6092 = vmatpush1.bf16.msra.mxu1 %v261_v18  ;;  %v6447_v21 = vld [vmem:[#allocation7 + $0x128] ss:$24 sps:$4 sm:$0xff]   ;;  %v6453_v12 = vld [vmem:[#allocation7 + $0x158] ss:$24 sps:$4 sm:$0xff]   ;;  %v6454_v31 = vld [vmem:[#allocation7 + $0x184] ss:$24 sps:$4 sm:$0xff]  }
 0x149   :  { %v1518_v41 = vpop.f32.mrf.mxu0  ;;  %6077 = vmatprep.subr.bf16.mxu1 %v6781_v28  ;;  %2346 = vperm.xlu1 %6117, %v2120_v2   ;;  %v2117_v18 = vld [vmem:[%s8963_s6 + $0x128] sm:$0xff]  ;;  %v480_v24 = vsub.s32 2, %v7807_v42  ;;  %v218_v2 = vld [vmem:[%s8959_s2 + $0x2b0] sm:$0xff] }
 0x14a   :  { %v1519_v47 = vadd.f32 %v1518_v41, %v7839_v61  ;;  %v7984_v49 = vadd.f32 %v1589_v20, %v1517_v34  ;;  %v1591_v57 = vpop.f32.mrf.mxu1  ;;  %v2115_v34 = vld [vmem:[%s8963_s6 + $0x118] sm:$0xff]  ;;  %v8053_v20 = vrot.slane %v7817_v29, %v484_v62  ;;  %v2142_v62 = vld [vmem:[%s8963_s6 + $0x1f0] sm:$0xff] }
 0x14b   :  { %4017 = vmatpush1.bf16.msra.mxu0 %v260_v50  ;;  %v6462_v41 = vld [vmem:[#allocation7 + $0x1bc] ss:$24 sps:$4 sm:$0xff]  }
 0x14c   :  { %4018 = vmatprep.subr.bf16.mxu0 %v6781_v28  ;;  %v7994_v61 = vadd.f32 %v1591_v57, %v1519_v47  ;;  %6093 = vmatpush1.bf16.msra.mxu1 %v260_v50  ;;  %v6456_v50 = vld [vmem:[#allocation7 + $0x18c] ss:$24 sps:$4 sm:$0xff]   ;;  %v8050_v47 = vpop.f32.mrf.mxu1 }
 0x14d   :  { %3489 = vmatmul.mubr.bf16.gmra.mxu0 %v6434_v38  ;;  %2341 = vperm.xlu1 %6117, %v2119_v6   ;;  %v6459_v38 = vld [vmem:[#allocation7 + $0x188] ss:$24 sps:$4 sm:$0xff]   ;;  %8979 = vst [vmem:[#allocation23_spill] sm:$0xff] %v8050_v47 }
 0x14e   :  { %3778 = vmatmul.mubr.bf16.gmra.mxu1 %v6435_v11  ;;  %3496 = vmatprep.mubr.bf16.mxu0 %v6436_v44  ;;  %v6460_v11 = vld [vmem:[#allocation7 + $0x1b4] ss:$24 sps:$4 sm:$0xff]   ;;  %v8046_v44 = vrot.slane %v7817_v29, %v480_v24 }
 0x14f   :  { %3785 = vmatprep.mubr.bf16.mxu1 %v6438_v46  ;;  %4019 = vmatpush2.bf16.msra.mxu0 %v275_v53  ;;  %v8048_v46 = vpop.f32.mrf.mxu0 }
 0x150   :  { %4020 = vmatprep.subr.bf16.mxu0 %v6781_v28  ;;  %6078 = vmatprep.subr.bf16.mxu1 %v6781_v28  ;;  %8978 = vst [vmem:[#allocation22_spill] sm:$0xff] %v8048_v46  ;;  %v6594_v46 = vld [vmem:[#allocation7 + $0x5d4] ss:$24 sps:$4 sm:$0xff]  }
 0x151   :  { %2336 = vperm.xlu1 %6117, %v2118_v32   ;;  %6094 = vmatpush2.bf16.msra.mxu1 %v275_v53  ;;  %v6466_v32 = vld [vmem:[#allocation7 + $0x1e4] ss:$24 sps:$4 sm:$0xff]  }
 0x152   :  { %6079 = vmatprep.subr.bf16.mxu1 %v6781_v28 }
 0x153   :  { %4021 = vmatpush2.bf16.msra.mxu0 %v274_v60 }
 0x154   :  { %4022 = vmatprep.subr.bf16.mxu0 %v6781_v28 }
 0x155   :  { %3497 = vmatmul.mubr.bf16.gmra.mxu0 %v6440_v7  ;;  %2331 = vperm.xlu1 %6117, %v2117_v18  }
 0x156   :  { %3786 = vmatmul.mubr.bf16.gmra.mxu1 %v6441_v4  ;;  %3504 = vmatprep.mubr.bf16.mxu0 %v6442_v15  ;;  %v6464_v4 = vld [vmem:[#allocation7 + $0x1b0] ss:$24 sps:$4 sm:$0xff]  }
 0x157   :  { %3793 = vmatprep.mubr.bf16.mxu1 %v6444_v10  ;;  %4023 = vmatpush2.bf16.msra.mxu0 %v273_v5  ;;  %v6465_v15 = vld [vmem:[#allocation7 + $0x1b8] ss:$24 sps:$4 sm:$0xff]  }
 0x158   :  { %4024 = vmatprep.subr.bf16.mxu0 %v6781_v28  ;;  %6095 = vmatpush2.bf16.msra.mxu1 %v274_v60 }
 0x159   :  { %6080 = vmatprep.subr.bf16.mxu1 %v6781_v28  ;;  %2326 = vperm.xlu1 %6117, %v2116_v54  }
 0x15b   :  { %4025 = vmatpush2.bf16.msra.mxu0 %v272_v30 }
 0x15c   :  { %4026 = vmatprep.subr.bf16.mxu0 %v6781_v28  ;;  %6096 = vmatpush2.bf16.msra.mxu1 %v273_v5 }
 0x15d   :  { %3505 = vmatmul.mubr.bf16.gmra.mxu0 %v6446_v8  ;;  %2321 = vperm.xlu1 %6117, %v2115_v34   ;;  %v6468_v8 = vld [vmem:[#allocation7 + $0x1ec] ss:$24 sps:$4 sm:$0xff]   ;;  %v6470_v34 = vld [vmem:[#allocation7 + $0x1e0] ss:$24 sps:$4 sm:$0xff]  }
 0x15e   :  { %3794 = vmatmul.mubr.bf16.gmra.mxu1 %v6447_v21  ;;  %3512 = vmatprep.mubr.bf16.mxu0 %v6448_v9 }
 0x15f   :  { %3801 = vmatprep.mubr.bf16.mxu1 %v6450_v13  ;;  %6081 = vmatprep.subr.bf16.mxu1 %v6781_v28 }
 0x160   :  { %6097 = vmatpush2.bf16.msra.mxu1 %v272_v30 }
 0x161   :  { %6082 = vmatprep.subr.bf16.mxu1 %v6781_v28  ;;  %2316 = vperm.xlu1 %6117, %v2114_v43  }
 0x165   :  { %3513 = vmatmul.mubr.bf16.gmra.mxu0 %v6452_v37  ;;  %2311 = vperm.xlu1 %6117, %v2113_v52   ;;  %v2141_v52 = vld [vmem:[%s8963_s6 + $0x1e8] sm:$0xff] }
 0x166   :  { %3802 = vmatmul.mubr.bf16.gmra.mxu1 %v6453_v12  ;;  %3520 = vmatprep.mubr.bf16.mxu0 %v6454_v31 }
 0x167   :  { %3809 = vmatprep.mubr.bf16.mxu1 %v6456_v50 }
 0x16d   :  { %v1630_v53 = vpop.f32.mrf.mxu0  ;;  %3521 = vmatmul.mubr.bf16.gmra.mxu0 %v6458_v36  ;;  %v6472_v36 = vld [vmem:[#allocation7 + $0x214] ss:$24 sps:$4 sm:$0xff]  }
 0x16e   :  { %3810 = vmatmul.mubr.bf16.gmra.mxu1 %v6459_v38  ;;  %v1703_v57 = vpop.f32.mrf.mxu1  ;;  %v8059_v58 = vadd.f32 %v1630_v53, %v7858_v33  ;;  %3528 = vmatprep.mubr.bf16.mxu0 %v6460_v11  ;;  %v219_v33 = vld [vmem:[%s8959_s2 + $0x2b8] sm:$0xff] }
 0x16f   :  { %3817 = vmatprep.mubr.bf16.mxu1 %v6462_v41  ;;  %v8062_v59 = vadd.f32 %v1703_v57, %v8046_v44  ;;  %v1632_v60 = vpop.f32.mrf.mxu0  ;;  %v271_v5 = vpack.c.bf16 %v219_v33, %v218_v2  ;;  %v6474_v38 = vld [vmem:[#allocation7 + $0x21c] ss:$24 sps:$4 sm:$0xff]  }
 0x170   :  { %8980 = vst [vmem:[#allocation24_spill] sm:$0xff] %v8059_v58  ;;  %v1705_v0 = vpop.f32.mrf.mxu1  ;;  %v8065_v29 = vadd.f32 %v1632_v60, %v7865_v17  ;;  %v2112_v17 = vld [vmem:[%s8963_s6 + $0x100] sm:$0xff] }
 0x171   :  { %v8068_v1 = vadd.f32 %v1705_v0, %v8053_v20  ;;  %v1634_v7 = vpop.f32.mrf.mxu0  ;;  %4027 = vmatpush2.bf16.msra.mxu0 %v271_v5  ;;  %2306 = vperm.xlu1 %6117, %v2112_v17  }
 0x172   :  { %v1707_v10 = vpop.f32.mrf.mxu1  ;;  %v8080_v6 = vadd.f32 %v1634_v7, %v7879_v25  ;;  %4028 = vmatprep.subr.bf16.mxu0 %v6781_v28  ;;  %6098 = vmatpush2.bf16.msra.mxu1 %v271_v5  ;;  %v2143_v25 = vld [vmem:[%s8963_s6 + $0x1f8] sm:$0xff] }
 0x173   :  { %v8083_v21 = vadd.f32 %v1707_v10, %v8046_v44  ;;  %v8085_v9 = vpop.f32.mrf.mxu0  ;;  %2461 = vperm.xlu0 %6116, %v2143_v25   ;;  %6083 = vmatprep.subr.bf16.mxu1 %v6781_v28  ;;  %v6476_v10 = vld [vmem:[#allocation7 + $0x210] ss:$24 sps:$4 sm:$0xff]  }
 0x174   :  { %8981 = vst [vmem:[#allocation25_spill] sm:$0xff] %v8080_v6  ;;  %8982 = vst [vmem:[#allocation26_spill] sm:$0xff] %v8085_v9  ;;  %v8087_v13 = vpop.f32.mrf.mxu1  ;;  %v6477_v5 = vld [vmem:[#allocation7 + $0x218] ss:$24 sps:$4 sm:$0xff]  }
 0x175   :  { %v1640_v18 = vpop.f32.mrf.mxu0  ;;  %3529 = vmatmul.mubr.bf16.gmra.mxu0 %v6464_v4  ;;  %v216_v4 = vld [vmem:[%s8959_s2 + $0x2a0] sm:$0xff] }
 0x176   :  { %3818 = vmatmul.mubr.bf16.gmra.mxu1 %v6465_v15  ;;  %v1713_v19 = vpop.f32.mrf.mxu1  ;;  %v8094_v40 = vadd.f32 %v1640_v18, %v7901_v51  ;;  %3536 = vmatprep.mubr.bf16.mxu0 %v6466_v32  ;;  %v6471_v51 = vld [vmem:[#allocation7 + $0x1e8] ss:$24 sps:$4 sm:$0xff]   ;;  %v6478_v18 = vld [vmem:[#allocation7 + $0x244] ss:$24 sps:$4 sm:$0xff]  }
 0x177   :  { %3825 = vmatprep.mubr.bf16.mxu1 %v6468_v8  ;;  %v8097_v30 = vadd.f32 %v1713_v19, %v8046_v44  ;;  %v1642_v54 = vpop.f32.mrf.mxu0  ;;  %2456 = vperm.xlu0 %6116, %v2142_v62   ;;  %v6480_v19 = vld [vmem:[#allocation7 + $0x24c] ss:$24 sps:$4 sm:$0xff]  }
 0x178   :  { %8983 = vst [vmem:[#allocation27_spill] sm:$0xff] %v8094_v40  ;;  %v1715_v37 = vpop.f32.mrf.mxu1  ;;  %v8101_v12 = vadd.f32 %v1642_v54, %v7905_v45  ;;  %v6609_v40 = vld [vmem:[#allocation7 + $0x584] ss:$24 sps:$4 sm:$0xff]  }
 0x179   :  { %v8104_v31 = vadd.f32 %v1715_v37, %v8053_v20  ;;  %v1644_v50 = vpop.f32.mrf.mxu0 }
 0x17a   :  { %8984 = vst [vmem:[#allocation28_spill] sm:$0xff] %v8101_v12  ;;  %v1717_v24 = vpop.f32.mrf.mxu1  ;;  %v8110_v43 = vadd.f32 %v1644_v50, %v7918_v56  ;;  %v6604_v12 = vld [vmem:[#allocation7 + $0x40] ss:$24 sps:$4 sm:$0xff]  }
 0x17b   :  { %v8113_v11 = vadd.f32 %v1717_v24, %v8046_v44  ;;  %v8115_v45 = vpop.f32.mrf.mxu0  ;;  %2451 = vperm.xlu0 %6116, %v2141_v52   ;;  %v6482_v52 = vld [vmem:[#allocation7 + $0x240] ss:$24 sps:$4 sm:$0xff]  }
 0x17c   :  { %8985 = vst [vmem:[#allocation29_spill] sm:$0xff] %v8110_v43  ;;  %8986 = vst [vmem:[#allocation30_spill] sm:$0xff] %v8115_v45  ;;  %v8117_v41 = vpop.f32.mrf.mxu1 }
 0x17d   :  { %v1650_v53 = vpop.f32.mrf.mxu0  ;;  %3537 = vmatmul.mubr.bf16.gmra.mxu0 %v6470_v34 }
 0x17e   :  { %3826 = vmatmul.mubr.bf16.gmra.mxu1 %v6471_v51  ;;  %v1723_v57 = vpop.f32.mrf.mxu1  ;;  %v8123_v56 = vadd.f32 %v1650_v53, %v7943_v55  ;;  %3544 = vmatprep.mubr.bf16.mxu0 %v6472_v36  ;;  %v217_v55 = vld [vmem:[%s8959_s2 + $0x2a8] sm:$0xff] }
 0x17f   :  { %3833 = vmatprep.mubr.bf16.mxu1 %v6474_v38  ;;  %v8126_v60 = vadd.f32 %v1723_v57, %v8046_v44  ;;  %v1652_v0 = vpop.f32.mrf.mxu0  ;;  %v270_v32 = vpack.c.bf16 %v217_v55, %v216_v4  ;;  %v6484_v55 = vld [vmem:[#allocation7 + $0x274] ss:$24 sps:$4 sm:$0xff]  }
 0x180   :  { %8987 = vst [vmem:[#allocation31_spill] sm:$0xff] %v8123_v56  ;;  %v1725_v2 = vpop.f32.mrf.mxu1  ;;  %v8129_v33 = vadd.f32 %v1652_v0, %v7947_v14  ;;  %v2140_v14 = vld [vmem:[%s8963_s6 + $0x1e0] sm:$0xff] }
 0x181   :  { %v8132_v7 = vadd.f32 %v1725_v2, %v8053_v20  ;;  %v1654_v15 = vpop.f32.mrf.mxu0  ;;  %4029 = vmatpush2.bf16.msra.mxu0 %v270_v32  ;;  %2446 = vperm.xlu0 %6116, %v2140_v14   ;;  %v2138_v2 = vld [vmem:[%s8963_s6 + $0x1d0] sm:$0xff] }
 0x182   :  { %8988 = vst [vmem:[#allocation32_spill] sm:$0xff] %v8129_v33  ;;  %v1727_v17 = vpop.f32.mrf.mxu1  ;;  %v8144_v8 = vadd.f32 %v1654_v15, %v7960_v23  ;;  %4030 = vmatprep.subr.bf16.mxu0 %v6781_v28  ;;  %6099 = vmatpush2.bf16.msra.mxu1 %v270_v32  ;;  %v2139_v23 = vld [vmem:[%s8963_s6 + $0x1d8] sm:$0xff]  ;;  %v6600_v33 = vld [vmem:[#allocation7 + $0x14] ss:$24 sps:$4 sm:$0xff]  }
 0x183   :  { %v8147_v25 = vadd.f32 %v1727_v17, %v8046_v44  ;;  %v8149_v54 = vpop.f32.mrf.mxu0  ;;  %6084 = vmatprep.subr.bf16.mxu1 %v6781_v28  ;;  %v6486_v15 = vld [vmem:[#allocation7 + $0x27c] ss:$24 sps:$4 sm:$0xff]   ;;  %v6488_v17 = vld [vmem:[#allocation7 + $0x270] ss:$24 sps:$4 sm:$0xff]  }
 0x184   :  { %8989 = vst [vmem:[#allocation33_spill] sm:$0xff] %v8144_v8  ;;  %8990 = vst [vmem:[#allocation34_spill] sm:$0xff] %v8149_v54  ;;  %v8151_v37 = vpop.f32.mrf.mxu1  ;;  %v6489_v32 = vld [vmem:[#allocation7 + $0x278] ss:$24 sps:$4 sm:$0xff]  }
 0x185   :  { %v1660_v50 = vpop.f32.mrf.mxu0  ;;  %3545 = vmatmul.mubr.bf16.gmra.mxu0 %v6476_v10  ;;  %2441 = vperm.xlu0 %6116, %v2139_v23  }
 0x186   :  { %3834 = vmatmul.mubr.bf16.gmra.mxu1 %v6477_v5  ;;  %v1733_v34 = vpop.f32.mrf.mxu1  ;;  %v8158_v51 = vadd.f32 %v1660_v50, %v7980_v39  ;;  %3552 = vmatprep.mubr.bf16.mxu0 %v6478_v18  ;;  %v6483_v39 = vld [vmem:[#allocation7 + $0x248] ss:$24 sps:$4 sm:$0xff]   ;;  %v8182_v5 = vpop.permute.xlu1 %2296  ;;  %v6492_v50 = vld [vmem:[#allocation7 + $0x2ac] ss:$24 sps:$4 sm:$0xff]  }
 0x187   :  { %3841 = vmatprep.mubr.bf16.mxu1 %v6480_v19  ;;  %v8161_v24 = vadd.f32 %v1733_v34, %v8046_v44  ;;  %v1662_v62 = vpop.f32.mrf.mxu0  ;;  %v2136_v18 = vld [vmem:[%s8963_s6 + $0x1c0] sm:$0xff]  ;;  %v2135_v34 = vld [vmem:[%s8963_s6 + $0x1b8] sm:$0xff] }
 0x188   :  { %8991 = vst [vmem:[#allocation35_spill] sm:$0xff] %v8158_v51  ;;  %v1735_v36 = vpop.f32.mrf.mxu1  ;;  %v8165_v38 = vadd.f32 %v1662_v62, %v7984_v49  ;;  %v2137_v49 = vld [vmem:[%s8963_s6 + $0x1c8] sm:$0xff]  ;;  %v6490_v19 = vld [vmem:[#allocation7 + $0x2a4] ss:$24 sps:$4 sm:$0xff]   ;;  %v6494_v62 = vld [vmem:[#allocation7 + $0x2a0] ss:$24 sps:$4 sm:$0xff]  }
 0x189   :  { %v8168_v53 = vadd.f32 %v1735_v36, %v8053_v20  ;;  %v1664_v57 = vpop.f32.mrf.mxu0  ;;  %2436 = vperm.xlu0 %6116, %v2138_v2   ;;  %v6495_v36 = vld [vmem:[#allocation7 + $0x2a8] ss:$24 sps:$4 sm:$0xff]  }
 0x18a   :  { %8992 = vst [vmem:[#allocation36_spill] sm:$0xff] %v8165_v38  ;;  %v1737_v0 = vpop.f32.mrf.mxu1  ;;  %v8174_v4 = vadd.f32 %v1664_v57, %v7994_v61  ;;  %v214_v61 = vld [vmem:[%s8959_s2 + $0x290] sm:$0xff]  ;;  %v8197_v23 = vpop.permute.xlu1 %2216  ;;  %v2133_v2 = vld [vmem:[%s8963_s6 + $0x1a8] sm:$0xff] }
 0x18b   :  { %v8177_v10 = vadd.f32 %v1737_v0, %v8046_v44  ;;  %v215_v44 = vld [vmem:[%s8959_s2 + $0x298] sm:$0xff]  ;;  %v2134_v57 = vld [vmem:[%s8963_s6 + $0x1b0] sm:$0xff] }
 0x18c   :  { %8993 = vst [vmem:[#allocation37_spill] sm:$0xff] %v8174_v4  ;;  %v269_v14 = vpack.c.bf16 %v215_v44, %v214_v61  ;;  %v2132_v44 = vld [vmem:[%s8963_s6 + $0x1a0] sm:$0xff] }
 0x18d   :  { %3553 = vmatmul.mubr.bf16.gmra.mxu0 %v6482_v52  ;;  %2431 = vperm.xlu0 %6116, %v2137_v49   ;;  %v6496_v52 = vld [vmem:[#allocation7 + $0x2d4] ss:$24 sps:$4 sm:$0xff]   ;;  %v6501_v49 = vld [vmem:[#allocation7 + $0x2d8] ss:$24 sps:$4 sm:$0xff]  }
 0x18e   :  { %3842 = vmatmul.mubr.bf16.gmra.mxu1 %v6483_v39  ;;  %3560 = vmatprep.mubr.bf16.mxu0 %v6484_v55  ;;  %v6498_v39 = vld [vmem:[#allocation7 + $0x2dc] ss:$24 sps:$4 sm:$0xff]   ;;  %v8203_v0 = vpop.permute.xlu1 %2211  ;;  %v213_v55 = vld [vmem:[%s8959_s2 + $0x288] sm:$0xff] }
 0x18f   :  { %3849 = vmatprep.mubr.bf16.mxu1 %v6486_v15  ;;  %4031 = vmatpush2.bf16.msra.mxu0 %v269_v14  ;;  %v6500_v15 = vld [vmem:[#allocation7 + $0x2d0] ss:$24 sps:$4 sm:$0xff]  }
 0x190   :  { %4032 = vmatprep.subr.bf16.mxu0 %v6781_v28  ;;  %6100 = vmatpush2.bf16.msra.mxu1 %v269_v14 }
 0x191   :  { %2426 = vperm.xlu0 %6116, %v2136_v18   ;;  %6085 = vmatprep.subr.bf16.mxu1 %v6781_v28  ;;  %v212_v28 = vld [vmem:[%s8959_s2 + $0x280] sm:$0xff]  ;;  %v2131_v18 = vld [vmem:[%s8963_s6 + $0x198] sm:$0xff] }
 0x192   :  { %v268_v61 = vpack.c.bf16 %v213_v55, %v212_v28  ;;  %v8217_v14 = vpop.permute.xlu1 %2206  ;;  %v2129_v55 = vld [vmem:[%s8963_s6 + $0x188] sm:$0xff] }
 0x194   :  { %4033 = vmatpush2.bf16.msra.mxu0 %v268_v61  ;;  %6101 = vmatpush2.bf16.msra.mxu1 %v268_v61 }
 0x195   :  { %3561 = vmatmul.mubr.bf16.gmra.mxu0 %v6488_v17  ;;  %2421 = vperm.xlu0 %6116, %v2135_v34   ;;  %v6504_v17 = vld [vmem:[#allocation7 + $0x304] ss:$24 sps:$4 sm:$0xff]   ;;  %v6505_v34 = vld [vmem:[#allocation7 + $0x308] ss:$24 sps:$4 sm:$0xff]  }
 0x196   :  { %3850 = vmatmul.mubr.bf16.gmra.mxu1 %v6489_v32  ;;  %3568 = vmatprep.mubr.bf16.mxu0 %v6490_v19  ;;  %v6507_v32 = vld [vmem:[#allocation7 + $0x30c] ss:$24 sps:$4 sm:$0xff]   ;;  %v8222_v19 = vpop.permute.xlu1 %2201 }
 0x197   :  { %3857 = vmatprep.mubr.bf16.mxu1 %v6492_v50  ;;  %v6502_v50 = vld [vmem:[#allocation7 + $0x300] ss:$24 sps:$4 sm:$0xff]  }
 0x199   :  { %2416 = vperm.xlu0 %6116, %v2134_v57   ;;  %v6510_v57 = vld [vmem:[#allocation7 + $0x334] ss:$24 sps:$4 sm:$0xff]  }
 0x19d   :  { %3569 = vmatmul.mubr.bf16.gmra.mxu0 %v6494_v62  ;;  %2411 = vperm.xlu0 %6116, %v2133_v2   ;;  %v8224_v62 = vpop.f32.mrf.mxu1 }
 0x19e   :  { %3858 = vmatmul.mubr.bf16.gmra.mxu1 %v6495_v36  ;;  %3576 = vmatprep.mubr.bf16.mxu0 %v6496_v52  ;;  %v2130_v36 = vld [vmem:[%s8963_s6 + $0x190] sm:$0xff] }
 0x19f   :  { %3865 = vmatprep.mubr.bf16.mxu1 %v6498_v39  ;;  %v6513_v52 = vld [vmem:[#allocation7 + $0x33c] ss:$24 sps:$4 sm:$0xff]   ;;  %v8229_v39 = vpop.f32.mrf.mxu0 }
 0x1a0   :  { %8994 = vst [vmem:[#allocation38_spill] sm:$0xff] %v8229_v39 }
 0x1a1   :  { %2406 = vperm.xlu0 %6116, %v2132_v44  }
 0x1a5   :  { %3577 = vmatmul.mubr.bf16.gmra.mxu0 %v6500_v15  ;;  %2401 = vperm.xlu0 %6116, %v2131_v18  }
 0x1a6   :  { %3866 = vmatmul.mubr.bf16.gmra.mxu1 %v6501_v49  ;;  %3584 = vmatprep.mubr.bf16.mxu0 %v6504_v17  ;;  %v8235_v49 = vpop.permute.xlu1 %2196  ;;  %v1710_v17 = vadd.f32 %v8087_v13, %v8053_v20 }
 0x1a7   :  { %3873 = vmatprep.mubr.bf16.mxu1 %v6507_v32 }
 0x1a9   :  { %2396 = vperm.xlu0 %6116, %v2130_v36   ;;  %v6508_v36 = vld [vmem:[#allocation7 + $0x330] ss:$24 sps:$4 sm:$0xff]  }
 0x1ad   :  { %v1776_v2 = vpop.f32.mrf.mxu0  ;;  %3585 = vmatmul.mubr.bf16.gmra.mxu0 %v6502_v50  ;;  %2391 = vperm.xlu0 %6116, %v2129_v55   ;;  %v6519_v55 = vld [vmem:[#allocation7 + $0x36c] ss:$24 sps:$4 sm:$0xff]  }
 0x1ae   :  { %3874 = vmatmul.mubr.bf16.gmra.mxu1 %v6505_v34  ;;  %v1849_v28 = vpop.f32.mrf.mxu1  ;;  %v1777_v15 = vadd.f32 %v1776_v2, %v8062_v59  ;;  %3592 = vmatprep.mubr.bf16.mxu0 %v6510_v57  ;;  %v2128_v59 = vld [vmem:[%s8963_s6 + $0x180] sm:$0xff]  ;;  %s5445_s6 = sld [smem:[#allocation3]] }
 0x1af   :  { %3881 = vmatprep.mubr.bf16.mxu1 %v6513_v52  ;;  %v1778_v61 = vpop.f32.mrf.mxu0  ;;  %v6516_v2 = vld [vmem:[#allocation7 + $0x364] ss:$24 sps:$4 sm:$0xff]  }
 0x1b0   :  { %v1851_v44 = vpop.f32.mrf.mxu1  ;;  %v1779_v32 = vadd.f32 %v1778_v61, %v8068_v1  ;;  %v8240_v18 = vadd.f32 %v1849_v28, %v1777_v15  ;;  %v8250_v15 = vpop.permute.xlu1 %2191 }
 0x1b1   :  { %v1780_v50 = vpop.f32.mrf.mxu0  ;;  %2386 = vperm.xlu0 %6116, %v2128_v59  }
 0x1b2   :  { %8995 = vst [vmem:[#allocation39_spill] sm:$0xff] %v8240_v18  ;;  %v1853_v34 = vpop.f32.mrf.mxu1  ;;  %v1781_v57 = vadd.f32 %v1780_v50, %v8083_v21  ;;  %v8246_v52 = vadd.f32 %v1851_v44, %v1779_v32  ;;  %v1720_v50 = vadd.f32 %v8117_v41, %v8053_v20 }
 0x1b3   :  { %v1782_v42 = vpop.f32.mrf.mxu0 }
 0x1b4   :  { %8996 = vst [vmem:[#allocation40_spill] sm:$0xff] %v8246_v52  ;;  %v1855_v13 = vpop.f32.mrf.mxu1  ;;  %v1783_v1 = vadd.f32 %v1782_v42, %v1710_v17  ;;  %v8248_v28 = vadd.f32 %v1853_v34, %v1781_v57  ;;  %v6514_v34 = vld [vmem:[#allocation7 + $0x360] ss:$24 sps:$4 sm:$0xff]   ;;  %v6522_v57 = vld [vmem:[#allocation7 + $0x394] ss:$24 sps:$4 sm:$0xff]  }
 0x1b5   :  { %3593 = vmatmul.mubr.bf16.gmra.mxu0 %v6508_v36  ;;  %v1786_v61 = vpop.f32.mrf.mxu0  ;;  %v6517_v36 = vld [vmem:[#allocation7 + $0x368] ss:$24 sps:$4 sm:$0xff]  }
 0x1b6   :  { %8997 = vst [vmem:[#allocation41_spill] sm:$0xff] %v8248_v28  ;;  %3882 = vmatmul.mubr.bf16.gmra.mxu1 %v6511_v35  ;;  %v1859_v18 = vpop.f32.mrf.mxu1  ;;  %v8252_v4 = vadd.f32 %v1855_v13, %v1783_v1  ;;  %3600 = vmatprep.mubr.bf16.mxu0 %v6516_v2  ;;  %v1787_v21 = vadd.f32 %v1786_v61, %v8097_v30  ;;  %v6525_v13 = vld [vmem:[#allocation7 + $0x39c] ss:$24 sps:$4 sm:$0xff]   ;;  %v8260_v1 = vpop.permute.xlu1 %2186 }
 0x1b7   :  { %3889 = vmatprep.mubr.bf16.mxu1 %v6519_v55  ;;  %v1788_v44 = vpop.f32.mrf.mxu0 }
 0x1b8   :  { %8998 = vst [vmem:[#allocation42_spill] sm:$0xff] %v8252_v4  ;;  %v1861_v32 = vpop.f32.mrf.mxu1  ;;  %v1789_v42 = vadd.f32 %v1788_v44, %v8104_v31  ;;  %v8258_v17 = vadd.f32 %v1859_v18, %v1787_v21 }
 0x1b9   :  { %v1790_v35 = vpop.f32.mrf.mxu0 }
 0x1ba   :  { %8999 = vst [vmem:[#allocation43_spill] sm:$0xff] %v8258_v17  ;;  %v1863_v59 = vpop.f32.mrf.mxu1  ;;  %v1791_v2 = vadd.f32 %v1790_v35, %v8113_v11  ;;  %v8263_v30 = vadd.f32 %v1861_v32, %v1789_v42  ;;  %v1730_v11 = vadd.f32 %v8151_v37, %v8053_v20  ;;  %v8272_v32 = vpop.permute.xlu1 %2181 }
 0x1bb   :  { %v1792_v55 = vpop.f32.mrf.mxu0 }
 0x1bc   :  { %9000 = vst [vmem:[#allocation44_spill] sm:$0xff] %v8263_v30  ;;  %v1865_v61 = vpop.f32.mrf.mxu1  ;;  %v1793_v28 = vadd.f32 %v1792_v55, %v1720_v50  ;;  %v8265_v41 = vadd.f32 %v1863_v59, %v1791_v2  ;;  %v6567_v30 = vld [vmem:[#allocation7 + $0x4ec] ss:$24 sps:$4 sm:$0xff]  }
 0x1bd   :  { %3601 = vmatmul.mubr.bf16.gmra.mxu0 %v6514_v34  ;;  %v1796_v31 = vpop.f32.mrf.mxu0  ;;  %v6520_v34 = vld [vmem:[#allocation7 + $0x390] ss:$24 sps:$4 sm:$0xff]  }
 0x1be   :  { %9001 = vst [vmem:[#allocation45_spill] sm:$0xff] %v8265_v41  ;;  %3890 = vmatmul.mubr.bf16.gmra.mxu1 %v6517_v36  ;;  %v1869_v18 = vpop.f32.mrf.mxu1  ;;  %3608 = vmatprep.mubr.bf16.mxu0 %v6522_v57  ;;  %v1797_v21 = vadd.f32 %v1796_v31, %v8126_v60  ;;  %v8268_v44 = vadd.f32 %v1865_v61, %v1793_v28  ;;  %v6523_v36 = vld [vmem:[#allocation7 + $0x398] ss:$24 sps:$4 sm:$0xff]   ;;  %v6528_v57 = vld [vmem:[#allocation7 + $0x3c4] ss:$24 sps:$4 sm:$0xff]   ;;  %v8282_v31 = vpop.permute.xlu1 %2176 }
 0x1bf   :  { %3897 = vmatprep.mubr.bf16.mxu1 %v6525_v13  ;;  %v1798_v17 = vpop.f32.mrf.mxu0  ;;  %v6531_v13 = vld [vmem:[#allocation7 + $0x3cc] ss:$24 sps:$4 sm:$0xff]  }
 0x1c0   :  { %9002 = vst [vmem:[#allocation46_spill] sm:$0xff] %v8268_v44  ;;  %v1871_v4 = vpop.f32.mrf.mxu1  ;;  %v1799_v50 = vadd.f32 %v1798_v17, %v8132_v7  ;;  %v8275_v42 = vadd.f32 %v1869_v18, %v1797_v21  ;;  %v6564_v44 = vld [vmem:[#allocation7 + $0x4e4] ss:$24 sps:$4 sm:$0xff]  }
 0x1c1   :  { %v1800_v35 = vpop.f32.mrf.mxu0 }
 0x1c2   :  { %9003 = vst [vmem:[#allocation47_spill] sm:$0xff] %v8275_v42  ;;  %v1873_v59 = vpop.f32.mrf.mxu1  ;;  %v1801_v60 = vadd.f32 %v1800_v35, %v8147_v25  ;;  %v8278_v28 = vadd.f32 %v1871_v4, %v1799_v50  ;;  %v1740_v50 = vadd.f32 %v8224_v62, %v8053_v20  ;;  %v8297_v20 = vpop.permute.xlu1 %2171  ;;  %v6556_v42 = vld [vmem:[#allocation7 + $0x4b0] ss:$24 sps:$4 sm:$0xff]  }
 0x1c3   :  { %v1802_v2 = vpop.f32.mrf.mxu0  ;;  %v8301_v62 = vpop.permute.xlu0 %2301 }
 0x1c4   :  { %9004 = vst [vmem:[#allocation48_spill] sm:$0xff] %v8278_v28  ;;  %v1875_v55 = vpop.f32.mrf.mxu1  ;;  %v1803_v61 = vadd.f32 %v1802_v2, %v1730_v11  ;;  %v8280_v37 = vadd.f32 %v1873_v59, %v1801_v60  ;;  %v6537_v60 = vld [vmem:[#allocation7 + $0x3fc] ss:$24 sps:$4 sm:$0xff]   ;;  %v6559_v28 = vld [vmem:[#allocation7 + $0x4b8] ss:$24 sps:$4 sm:$0xff]  }
 0x1c5   :  { %3609 = vmatmul.mubr.bf16.gmra.mxu0 %v6520_v34  ;;  %v1806_v7 = vpop.f32.mrf.mxu0  ;;  %v6526_v34 = vld [vmem:[#allocation7 + $0x3c0] ss:$24 sps:$4 sm:$0xff]  }
 0x1c6   :  { %9005 = vst [vmem:[#allocation49_spill] sm:$0xff] %v8280_v37  ;;  %3898 = vmatmul.mubr.bf16.gmra.mxu1 %v6523_v36  ;;  %v1879_v17 = vpop.f32.mrf.mxu1  ;;  %3616 = vmatprep.mubr.bf16.mxu0 %v6528_v57  ;;  %v1807_v18 = vadd.f32 %v1806_v7, %v8161_v24  ;;  %v8285_v21 = vadd.f32 %v1875_v55, %v1803_v61  ;;  %v6529_v36 = vld [vmem:[#allocation7 + $0x3c8] ss:$24 sps:$4 sm:$0xff]  }
 0x1c7   :  { %3905 = vmatprep.mubr.bf16.mxu1 %v6531_v13  ;;  %v1808_v25 = vpop.f32.mrf.mxu0  ;;  %v6534_v13 = vld [vmem:[#allocation7 + $0x3f4] ss:$24 sps:$4 sm:$0xff]  }
 0x1c8   :  { %9006 = vst [vmem:[#allocation50_spill] sm:$0xff] %v8285_v21  ;;  %v1881_v4 = vpop.f32.mrf.mxu1  ;;  %v1809_v11 = vadd.f32 %v1808_v25, %v8168_v53  ;;  %v8290_v35 = vadd.f32 %v1879_v17, %v1807_v18  ;;  %v6532_v17 = vld [vmem:[#allocation7 + $0x3f0] ss:$24 sps:$4 sm:$0xff]   ;;  %v6543_v25 = vld [vmem:[#allocation7 + $0x42c] ss:$24 sps:$4 sm:$0xff]  }
 0x1c9   :  { %v1810_v59 = vpop.f32.mrf.mxu0  ;;  %v6535_v18 = vld [vmem:[#allocation7 + $0x3f8] ss:$24 sps:$4 sm:$0xff]  }
 0x1ca   :  { %9007 = vst [vmem:[#allocation51_spill] sm:$0xff] %v8290_v35  ;;  %v1883_v57 = vpop.f32.mrf.mxu1  ;;  %v1811_v2 = vadd.f32 %v1810_v59, %v8177_v10  ;;  %v8293_v24 = vadd.f32 %v1881_v4, %v1809_v11  ;;  %v6540_v10 = vld [vmem:[#allocation7 + $0x424] ss:$24 sps:$4 sm:$0xff]   ;;  %v8303_v4 = vpop.permute.xlu1 %2166  ;;  %v6538_v11 = vld [vmem:[#allocation7 + $0x420] ss:$24 sps:$4 sm:$0xff]  }
 0x1cb   :  { %v1812_v55 = vpop.f32.mrf.mxu0  ;;  %v6546_v59 = vld [vmem:[#allocation7 + $0x454] ss:$24 sps:$4 sm:$0xff]  }
 0x1cc   :  { %9008 = vst [vmem:[#allocation52_spill] sm:$0xff] %v8293_v24  ;;  %v1885_v61 = vpop.f32.mrf.mxu1  ;;  %v1813_v7 = vadd.f32 %v1812_v55, %v1740_v50  ;;  %v8295_v37 = vadd.f32 %v1883_v57, %v1811_v2  ;;  %v8305_v50 = vpop.permute.xlu0 %2221  ;;  %v6549_v57 = vld [vmem:[#allocation7 + $0x45c] ss:$24 sps:$4 sm:$0xff]   ;;  %v6544_v2 = vld [vmem:[#allocation7 + $0x450] ss:$24 sps:$4 sm:$0xff]  }
 0x1cd   :  { %3617 = vmatmul.mubr.bf16.gmra.mxu0 %v6526_v34  ;;  %v6541_v34 = vld [vmem:[#allocation7 + $0x428] ss:$24 sps:$4 sm:$0xff]   ;;  %v6547_v55 = vld [vmem:[#allocation7 + $0x458] ss:$24 sps:$4 sm:$0xff]  }
 0x1ce   :  { %9009 = vst [vmem:[#allocation53_spill] sm:$0xff] %v8295_v37  ;;  %3906 = vmatmul.mubr.bf16.gmra.mxu1 %v6529_v36  ;;  %3624 = vmatprep.mubr.bf16.mxu0 %v6534_v13  ;;  %v8299_v53 = vadd.f32 %v1885_v61, %v1813_v7  ;;  %v2162_v36 = vpop.permute.xlu1 %2161  ;;  %v6552_v61 = vld [vmem:[#allocation7 + $0x484] ss:$24 sps:$4 sm:$0xff]   ;;  %v6553_v37 = vld [vmem:[#allocation7 + $0x488] ss:$24 sps:$4 sm:$0xff]  }
 0x1cf   :  { %3913 = vmatprep.mubr.bf16.mxu1 %v6537_v60  ;;  %v6555_v7 = vld [vmem:[#allocation7 + $0x48c] ss:$24 sps:$4 sm:$0xff]  }
 0x1d0   :  { %9010 = vst [vmem:[#allocation54_spill] sm:$0xff] %v8299_v53  ;;  %v8307_v13 = vpop.permute.xlu0 %2291 }
 0x1d2   :  { %v2157_v60 = vpop.permute.xlu1 %2156 }
 0x1d5   :  { %3625 = vmatmul.mubr.bf16.gmra.mxu0 %v6532_v17  ;;  %v8309_v17 = vpop.permute.xlu0 %2286 }
 0x1d6   :  { %3914 = vmatmul.mubr.bf16.gmra.mxu1 %v6535_v18  ;;  %3632 = vmatprep.mubr.bf16.mxu0 %v6540_v10  ;;  %v2152_v18 = vpop.permute.xlu1 %2151 }
 0x1d7   :  { %3921 = vmatprep.mubr.bf16.mxu1 %v6543_v25  ;;  %v6550_v25 = vld [vmem:[#allocation7 + $0x480] ss:$24 sps:$4 sm:$0xff]  }
 0x1d9   :  { %v8311_v10 = vpop.permute.xlu0 %2281 }
 0x1dd   :  { %3633 = vmatmul.mubr.bf16.gmra.mxu0 %v6538_v11  ;;  %v6558_v11 = vld [vmem:[#allocation7 + $0x4b4] ss:$24 sps:$4 sm:$0xff]   ;;  %v8313_v24 = vpop.permute.xlu0 %2276 }
 0x1de   :  { %3922 = vmatmul.mubr.bf16.gmra.mxu1 %v6541_v34  ;;  %3640 = vmatprep.mubr.bf16.mxu0 %v6546_v59  ;;  %v6561_v34 = vld [vmem:[#allocation7 + $0x4bc] ss:$24 sps:$4 sm:$0xff]   ;;  %v2147_v59 = vpop.permute.xlu1 %2146 }
 0x1df   :  { %3929 = vmatprep.mubr.bf16.mxu1 %v6549_v57 }
 0x1e5   :  { %3641 = vmatmul.mubr.bf16.gmra.mxu0 %v6544_v2 }
 0x1e6   :  { %3930 = vmatmul.mubr.bf16.gmra.mxu1 %v6547_v55  ;;  %3648 = vmatprep.mubr.bf16.mxu0 %v6552_v61 }
 0x1e7   :  { %3937 = vmatprep.mubr.bf16.mxu1 %v6555_v7 }
 0x1ed   :  { %v3458_v57 = vpop.f32.mrf.mxu0  ;;  %3649 = vmatmul.mubr.bf16.gmra.mxu0 %v6550_v25 }
 0x1ee   :  { %v3747_v53 = vpop.f32.mrf.mxu1  ;;  %3938 = vmatmul.mubr.bf16.gmra.mxu1 %v6553_v37  ;;  %v3459_v35 = vadd.f32 %v3458_v57, %v2147_v59  ;;  %3656 = vmatprep.mubr.bf16.mxu0 %v6558_v11  ;;  %v8319_v37 = vpop.permute.xlu0 %2271 }
 0x1ef   :  { %3945 = vmatprep.mubr.bf16.mxu1 %v6561_v34  ;;  %v3460_v2 = vpop.f32.mrf.mxu0 }
 0x1f0   :  { %v3749_v55 = vpop.f32.mrf.mxu1  ;;  %v8315_v61 = vadd.f32 %v3747_v53, %v3459_v35 }
 0x1f1   :  { %v3461_v7 = vpop.f32.mrf.mxu0  ;;  %v6562_v55 = vld [vmem:[#allocation7 + $0x4e0] ss:$24 sps:$4 sm:$0xff]  }
 0x1f2   :  { %v3750_v21 = vpop.f32.mrf.mxu1  ;;  %v3462_v41 = vadd.f32 %v3461_v7, %v2152_v18 }
 0x1f3   :  { %v3463_v52 = vpop.f32.mrf.mxu0 }
 0x1f4   :  { %v3752_v25 = vpop.f32.mrf.mxu1  ;;  %v8317_v51 = vadd.f32 %v3750_v21, %v3462_v41  ;;  %v6565_v52 = vld [vmem:[#allocation7 + $0x4e8] ss:$24 sps:$4 sm:$0xff]   ;;  %v6570_v41 = vld [vmem:[#allocation7 + $0x514] ss:$24 sps:$4 sm:$0xff]  }
 0x1f5   :  { %v3466_v11 = vpop.f32.mrf.mxu0  ;;  %3657 = vmatmul.mubr.bf16.gmra.mxu0 %v6556_v42  ;;  %v6573_v21 = vld [vmem:[#allocation7 + $0x51c] ss:$24 sps:$4 sm:$0xff]   ;;  %v8323_v25 = vpop.permute.xlu0 %2266 }
 0x1f6   :  { %v3755_v34 = vpop.f32.mrf.mxu1  ;;  %3946 = vmatmul.mubr.bf16.gmra.mxu1 %v6559_v28  ;;  %v3467_v59 = vadd.f32 %v3466_v11, %v2157_v60  ;;  %3664 = vmatprep.mubr.bf16.mxu0 %v6564_v44 }
 0x1f7   :  { %3953 = vmatprep.mubr.bf16.mxu1 %v6567_v30  ;;  %v3468_v35 = vpop.f32.mrf.mxu0 }
 0x1f8   :  { %v3757_v53 = vpop.f32.mrf.mxu1  ;;  %v8321_v57 = vadd.f32 %v3755_v34, %v3467_v59 }
 0x1f9   :  { %v3469_v18 = vpop.f32.mrf.mxu0  ;;  %v6571_v53 = vld [vmem:[#allocation7 + $0x518] ss:$24 sps:$4 sm:$0xff]  }
 0x1fa   :  { %v3758_v2 = vpop.f32.mrf.mxu1  ;;  %v3470_v7 = vadd.f32 %v3469_v18, %v2162_v36  ;;  %v8330_v36 = vpop.permute.xlu0 %2261 }
 0x1fb   :  { %v3471_v39 = vpop.f32.mrf.mxu0 }
 0x1fc   :  { %v3760_v42 = vpop.f32.mrf.mxu1  ;;  %v8325_v38 = vadd.f32 %v3758_v2, %v3470_v7  ;;  %v6568_v39 = vld [vmem:[#allocation7 + $0x510] ss:$24 sps:$4 sm:$0xff]   ;;  %v6576_v2 = vld [vmem:[#allocation7 + $0x544] ss:$24 sps:$4 sm:$0xff]  }
 0x1fd   :  { %v3474_v28 = vpop.f32.mrf.mxu0  ;;  %3665 = vmatmul.mubr.bf16.gmra.mxu0 %v6562_v55  ;;  %v6579_v55 = vld [vmem:[#allocation7 + $0x54c] ss:$24 sps:$4 sm:$0xff]  }
 0x1fe   :  { %v3763_v30 = vpop.f32.mrf.mxu1  ;;  %3954 = vmatmul.mubr.bf16.gmra.mxu1 %v6565_v52  ;;  %v3475_v44 = vadd.f32 %v3474_v28, %v8303_v4  ;;  %3672 = vmatprep.mubr.bf16.mxu0 %v6570_v41  ;;  %v8336_v28 = vpop.permute.xlu0 %2256 }
 0x1ff   :  { %3961 = vmatprep.mubr.bf16.mxu1 %v6573_v21  ;;  %v3476_v60 = vpop.f32.mrf.mxu0 }
 0x200   :  { %v3765_v11 = vpop.f32.mrf.mxu1  ;;  %v8328_v34 = vadd.f32 %v3763_v30, %v3475_v44 }
 0x201   :  { %v3477_v59 = vpop.f32.mrf.mxu0 }
 0x202   :  { %v3766_v35 = vpop.f32.mrf.mxu1  ;;  %v3478_v18 = vadd.f32 %v3477_v59, %v8297_v20  ;;  %v6574_v59 = vld [vmem:[#allocation7 + $0x540] ss:$24 sps:$4 sm:$0xff]  }
 0x203   :  { %v3479_v7 = vpop.f32.mrf.mxu0 }
 0x204   :  { %v3768_v52 = vpop.f32.mrf.mxu1  ;;  %v8333_v42 = vadd.f32 %v3766_v35, %v3478_v18  ;;  %v6577_v7 = vld [vmem:[#allocation7 + $0x548] ss:$24 sps:$4 sm:$0xff]   ;;  %v6582_v18 = vld [vmem:[#allocation7 + $0x574] ss:$24 sps:$4 sm:$0xff]  }
 0x205   :  { %v3482_v4 = vpop.f32.mrf.mxu0  ;;  %3673 = vmatmul.mubr.bf16.gmra.mxu0 %v6568_v39  ;;  %v6585_v39 = vld [vmem:[#allocation7 + $0x57c] ss:$24 sps:$4 sm:$0xff]  }
 0x206   :  { %v3771_v41 = vpop.f32.mrf.mxu1  ;;  %3962 = vmatmul.mubr.bf16.gmra.mxu1 %v6571_v53  ;;  %v3483_v21 = vadd.f32 %v3482_v4, %v8282_v31  ;;  %3680 = vmatprep.mubr.bf16.mxu0 %v6576_v2  ;;  %v8343_v31 = vpop.permute.xlu0 %2251 }
 0x207   :  { %3969 = vmatprep.mubr.bf16.mxu1 %v6579_v55  ;;  %v3484_v30 = vpop.f32.mrf.mxu0 }
 0x208   :  { %v3773_v44 = vpop.f32.mrf.mxu1  ;;  %v8338_v60 = vadd.f32 %v3771_v41, %v3483_v21 }
 0x209   :  { %v3485_v20 = vpop.f32.mrf.mxu0 }
 0x20a   :  { %v3774_v11 = vpop.f32.mrf.mxu1  ;;  %v3486_v35 = vadd.f32 %v3485_v20, %v8272_v32  ;;  %v8348_v32 = vpop.permute.xlu1 %2381 }
 0x20b   :  { %v3487_v52 = vpop.f32.mrf.mxu0  ;;  %v8351_v8 = vpop.permute.xlu0 %2246 }
 0x20c   :  { %v3776_v53 = vpop.f32.mrf.mxu1  ;;  %v8341_v47 = vadd.f32 %v3774_v11, %v3486_v35  ;;  %v6580_v11 = vld [vmem:[#allocation7 + $0x570] ss:$24 sps:$4 sm:$0xff]  }
 0x20d   :  { %v3490_v2 = vpop.f32.mrf.mxu0  ;;  %3681 = vmatmul.mubr.bf16.gmra.mxu0 %v6574_v59  ;;  %v6583_v35 = vld [vmem:[#allocation7 + $0x578] ss:$24 sps:$4 sm:$0xff]   ;;  %v6588_v53 = vld [vmem:[#allocation7 + $0x5a4] ss:$24 sps:$4 sm:$0xff]  }
 0x20e   :  { %v3779_v55 = vpop.f32.mrf.mxu1  ;;  %3970 = vmatmul.mubr.bf16.gmra.mxu1 %v6577_v7  ;;  %v3491_v4 = vadd.f32 %v3490_v2, %v8260_v1  ;;  %3688 = vmatprep.mubr.bf16.mxu0 %v6582_v18  ;;  %v6591_v59 = vld [vmem:[#allocation7 + $0x5ac] ss:$24 sps:$4 sm:$0xff]  }
 0x20f   :  { %3977 = vmatprep.mubr.bf16.mxu1 %v6585_v39  ;;  %v3492_v41 = vpop.f32.mrf.mxu0 }
 0x210   :  { %v3781_v21 = vpop.f32.mrf.mxu1  ;;  %v8346_v30 = vadd.f32 %v3779_v55, %v3491_v4  ;;  %v8356_v4 = vpop.permute.xlu1 %2376 }
 0x211   :  { %v3493_v44 = vpop.f32.mrf.mxu0 }
 0x212   :  { %v3782_v20 = vpop.f32.mrf.mxu1  ;;  %v3494_v52 = vadd.f32 %v3493_v44, %v8250_v15  ;;  %v8360_v44 = vpop.permute.xlu0 %2241 }
 0x213   :  { %v3495_v7 = vpop.f32.mrf.mxu0 }
 0x214   :  { %v3784_v1 = vpop.f32.mrf.mxu1  ;;  %v8353_v18 = vadd.f32 %v3782_v20, %v3494_v52  ;;  %v6586_v20 = vld [vmem:[#allocation7 + $0x5a0] ss:$24 sps:$4 sm:$0xff]  }
 0x215   :  { %v3498_v39 = vpop.f32.mrf.mxu0  ;;  %3689 = vmatmul.mubr.bf16.gmra.mxu0 %v6580_v11  ;;  %v6589_v52 = vld [vmem:[#allocation7 + $0x5a8] ss:$24 sps:$4 sm:$0xff]  }
 0x216   :  { %v3787_v2 = vpop.f32.mrf.mxu1  ;;  %3978 = vmatmul.mubr.bf16.gmra.mxu1 %v6583_v35  ;;  %v3499_v55 = vadd.f32 %v3498_v39, %v8235_v49  ;;  %3696 = vmatprep.mubr.bf16.mxu0 %v6588_v53  ;;  %v6597_v35 = vld [vmem:[#allocation7 + $0x5dc] ss:$24 sps:$4 sm:$0xff]  }
 0x217   :  { %3985 = vmatprep.mubr.bf16.mxu1 %v6591_v59  ;;  %v3500_v41 = vpop.f32.mrf.mxu0  ;;  %v8365_v59 = vpop.permute.xlu1 %2371 }
 0x218   :  { %v3789_v15 = vpop.f32.mrf.mxu1  ;;  %v8358_v21 = vadd.f32 %v3787_v2, %v3499_v55  ;;  %v8368_v41 = vpop.permute.xlu0 %2236 }
 0x219   :  { %v3501_v7 = vpop.f32.mrf.mxu0 }
 0x21a   :  { %v3790_v1 = vpop.f32.mrf.mxu1  ;;  %v3502_v11 = vadd.f32 %v3501_v7, %v8222_v19 }
 0x21b   :  { %v3503_v56 = vpop.f32.mrf.mxu0  ;;  %v8373_v27 = vpop.permute.xlu1 %2366 }
 0x21c   :  { %v3792_v49 = vpop.f32.mrf.mxu1  ;;  %v8363_v53 = vadd.f32 %v3790_v1, %v3502_v11  ;;  %v6592_v1 = vld [vmem:[#allocation7 + $0x5d0] ss:$24 sps:$4 sm:$0xff]  }
 0x21d   :  { %v3506_v39 = vpop.f32.mrf.mxu0  ;;  %3697 = vmatmul.mubr.bf16.gmra.mxu0 %v6586_v20  ;;  %v6595_v11 = vld [vmem:[#allocation7 + $0x5d8] ss:$24 sps:$4 sm:$0xff]   ;;  %v6603_v20 = vld [vmem:[#allocation7 + $0x554] ss:$24 sps:$4 sm:$0xff]  }
 0x21e   :  { %v3795_v2 = vpop.f32.mrf.mxu1  ;;  %3986 = vmatmul.mubr.bf16.gmra.mxu1 %v6589_v52  ;;  %v3507_v55 = vadd.f32 %v3506_v39, %v8217_v14  ;;  %3704 = vmatprep.mubr.bf16.mxu0 %v6594_v46 }
 0x21f   :  { %3993 = vmatprep.mubr.bf16.mxu1 %v6597_v35  ;;  %v3508_v15 = vpop.f32.mrf.mxu0  ;;  %v2232_v35 = vpop.permute.xlu0 %2231 }
 0x220   :  { %v3797_v19 = vpop.f32.mrf.mxu1  ;;  %v8370_v7 = vadd.f32 %v3795_v2, %v3507_v55 }
 0x221   :  { %v3509_v56 = vpop.f32.mrf.mxu0 }
 0x222   :  { %v3798_v49 = vpop.f32.mrf.mxu1  ;;  %v3510_v54 = vadd.f32 %v3509_v56, %v8203_v0  ;;  %v8380_v56 = vpop.permute.xlu1 %2361 }
 0x223   :  { %v3511_v52 = vpop.f32.mrf.mxu0  ;;  %v2227_v16 = vpop.permute.xlu0 %2226 }
 0x224   :  { %v3800_v14 = vpop.f32.mrf.mxu1  ;;  %v8375_v46 = vadd.f32 %v3798_v49, %v3510_v54  ;;  %v6601_v54 = vld [vmem:[#allocation7 + $0x550] ss:$24 sps:$4 sm:$0xff]  }
 0x225   :  { %v3514_v39 = vpop.f32.mrf.mxu0  ;;  %3705 = vmatmul.mubr.bf16.gmra.mxu0 %v6592_v1  ;;  %v6598_v14 = vld [vmem:[#allocation7 + $0x10] ss:$24 sps:$4 sm:$0xff]   ;;  %v6606_v1 = vld [vmem:[#allocation7 + $0x44] ss:$24 sps:$4 sm:$0xff]  }
 0x226   :  { %v3803_v15 = vpop.f32.mrf.mxu1  ;;  %3994 = vmatmul.mubr.bf16.gmra.mxu1 %v6595_v11  ;;  %v3515_v2 = vadd.f32 %v3514_v39, %v8197_v23  ;;  %4034 = vmatprep.mubr.bf16.mxu0 %v6600_v33 }
 0x227   :  { %4258 = vmatprep.mubr.bf16.mxu1 %v6603_v20  ;;  %v3516_v55 = vpop.f32.mrf.mxu0 }
 0x228   :  { %v3805_v19 = vpop.f32.mrf.mxu1  ;;  %v8378_v0 = vadd.f32 %v3803_v15, %v3515_v2  ;;  %v8385_v15 = vpop.permute.xlu1 %2356 }
 0x229   :  { %v3517_v43 = vpop.f32.mrf.mxu0 }
 0x22a   :  { %v3806_v52 = vpop.f32.mrf.mxu1  ;;  %v3518_v49 = vadd.f32 %v3517_v43, %v8305_v50 }
 0x22b   :  { %v3519_v11 = vpop.f32.mrf.mxu0 }
 0x22c   :  { %v3808_v45 = vpop.f32.mrf.mxu1  ;;  %v8383_v23 = vadd.f32 %v3806_v52, %v3518_v49  ;;  %v6607_v11 = vld [vmem:[#allocation7 + $0x580] ss:$24 sps:$4 sm:$0xff]   ;;  %v6612_v52 = vld [vmem:[#allocation7 + $0x74] ss:$24 sps:$4 sm:$0xff]  }
 0x22d   :  { %v3522_v33 = vpop.f32.mrf.mxu0  ;;  %4035 = vmatmul.mubr.bf16.vlgmr.msra.gmra.mxu0 %v6598_v14  ;;  %v6615_v49 = vld [vmem:[#allocation7 + $0x5b4] ss:$24 sps:$4 sm:$0xff]  }
 0x22e   :  { %v3811_v20 = vpop.f32.mrf.mxu1  ;;  %4259 = vmatmul.mubr.bf16.vlgmr.msra.gmra.mxu1 %v6601_v54  ;;  %v3523_v39 = vadd.f32 %v3522_v33, %v2227_v16  ;;  %4042 = vmatprep.mubr.bf16.mxu0 %v6606_v1  ;;  %v8391_v16 = vpop.permute.xlu1 %2351 }
 0x22f   :  { %4266 = vmatprep.mubr.bf16.mxu1 %v6609_v40  ;;  %v3524_v2 = vpop.f32.mrf.mxu0 }
 0x230   :  { %v3813_v55 = vpop.f32.mrf.mxu1  ;;  %v8387_v19 = vadd.f32 %v3811_v20, %v3523_v39 }
 0x231   :  { %v3525_v43 = vpop.f32.mrf.mxu0 }
 0x232   :  { %v3814_v50 = vpop.f32.mrf.mxu1  ;;  %v3526_v45 = vadd.f32 %v3525_v43, %v2232_v35  ;;  %v6618_v43 = vld [vmem:[#allocation7 + $0xa4] ss:$24 sps:$4 sm:$0xff]  }
 0x233   :  { %v3527_v63 = vpop.f32.mrf.mxu0 }
 0x234   :  { %v3816_v6 = vpop.f32.mrf.mxu1  ;;  %v8389_v14 = vadd.f32 %v3814_v50, %v3526_v45  ;;  %v6610_v63 = vld [vmem:[#allocation7 + $0x70] ss:$24 sps:$4 sm:$0xff]   ;;  %v6621_v50 = vld [vmem:[#allocation7 + $0x5e4] ss:$24 sps:$4 sm:$0xff]   ;;  %v8397_v45 = vpop.permute.xlu1 %2346 }
 0x235   :  { %v3530_v40 = vpop.f32.mrf.mxu0  ;;  %4043 = vmatmul.mubr.bf16.gmra.mxu0 %v6604_v12  ;;  %v6613_v6 = vld [vmem:[#allocation7 + $0x5b0] ss:$24 sps:$4 sm:$0xff]  }
 0x236   :  { %v3819_v54 = vpop.f32.mrf.mxu1  ;;  %4267 = vmatmul.mubr.bf16.gmra.mxu1 %v6607_v11  ;;  %v3531_v1 = vadd.f32 %v3530_v40, %v8368_v41  ;;  %4050 = vmatprep.mubr.bf16.mxu0 %v6612_v52 }
 0x237   :  { %4274 = vmatprep.mubr.bf16.mxu1 %v6615_v49  ;;  %v3532_v33 = vpop.f32.mrf.mxu0 }
 0x238   :  { %v3821_v20 = vpop.f32.mrf.mxu1  ;;  %v8394_v39 = vadd.f32 %v3819_v54, %v3531_v1 }
 0x239   :  { %v3533_v35 = vpop.f32.mrf.mxu0 }
 0x23a   :  { %v3822_v2 = vpop.f32.mrf.mxu1  ;;  %v3534_v55 = vadd.f32 %v3533_v35, %v8360_v44  ;;  %v8404_v44 = vpop.permute.xlu1 %2341  ;;  %v6616_v35 = vld [vmem:[#allocation7 + $0xa0] ss:$24 sps:$4 sm:$0xff]  }
 0x23b   :  { %v3535_v12 = vpop.f32.mrf.mxu0 }
 0x23c   :  { %v3824_v11 = vpop.f32.mrf.mxu1  ;;  %v8399_v48 = vadd.f32 %v3822_v2, %v3534_v55  ;;  %v6619_v12 = vld [vmem:[#allocation7 + $0x5e0] ss:$24 sps:$4 sm:$0xff]   ;;  %v6624_v55 = vld [vmem:[#allocation7 + $0xd4] ss:$24 sps:$4 sm:$0xff]  }
 0x23d   :  { %v3538_v41 = vpop.f32.mrf.mxu0  ;;  %4051 = vmatmul.mubr.bf16.gmra.mxu0 %v6610_v63 }
 0x23e   :  { %v3827_v52 = vpop.f32.mrf.mxu1  ;;  %4275 = vmatmul.mubr.bf16.gmra.mxu1 %v6613_v6  ;;  %v3539_v49 = vadd.f32 %v3538_v41, %v8351_v8  ;;  %4058 = vmatprep.mubr.bf16.mxu0 %v6618_v43  ;;  %v8411_v41 = vpop.permute.xlu1 %2336 }
 0x23f   :  { %4282 = vmatprep.mubr.bf16.mxu1 %v6621_v50  ;;  %v3540_v40 = vpop.f32.mrf.mxu0 }
 0x240   :  { %v3829_v54 = vpop.f32.mrf.mxu1  ;;  %v8402_v1 = vadd.f32 %v3827_v52, %v3539_v49 }
 0x241   :  { %v3541_v33 = vpop.f32.mrf.mxu0 }
 0x242   :  { %v3830_v20 = vpop.f32.mrf.mxu1  ;;  %v3542_v2 = vadd.f32 %v3541_v33, %v8343_v31  ;;  %v6622_v33 = vld [vmem:[#allocation7 + $0xd0] ss:$24 sps:$4 sm:$0xff]  }
 0x243   :  { %v3543_v11 = vpop.f32.mrf.mxu0 }
 0x244   :  { %v3832_v63 = vpop.f32.mrf.mxu1  ;;  %v8407_v6 = vadd.f32 %v3830_v20, %v3542_v2  ;;  %v6627_v2 = vld [vmem:[#allocation7 + $0x104] ss:$24 sps:$4 sm:$0xff]  }
 0x245   :  { %v3546_v8 = vpop.f32.mrf.mxu0  ;;  %4059 = vmatmul.mubr.bf16.gmra.mxu0 %v6616_v35 }
 0x246   :  { %9011 = vst [vmem:[#allocation55_spill] sm:$0xff] %v8407_v6  ;;  %v3835_v43 = vpop.f32.mrf.mxu1  ;;  %4283 = vmatmul.mubr.bf16.gmra.mxu1 %v6619_v12  ;;  %v3547_v50 = vadd.f32 %v3546_v8, %v8336_v28  ;;  %4066 = vmatprep.mubr.bf16.mxu0 %v6624_v55  ;;  %v8418_v28 = vpop.permute.xlu1 %2331 }
 0x247   :  { %4355 = vmatprep.mubr.f32.mxu1 %v8065_v29  ;;  %v3548_v52 = vpop.f32.mrf.mxu0 }
 0x248   :  { %v3837_v49 = vpop.f32.mrf.mxu1  ;;  %v8413_v40 = vadd.f32 %v3835_v43, %v3547_v50  ;;  %v8423_v52 = vpop.permute.xlu0 %2461 }
 0x249   :  { %v3549_v31 = vpop.f32.mrf.mxu0 }
 0x24a   :  { %9012 = vst [vmem:[#allocation56_spill] sm:$0xff] %v8413_v40  ;;  %v3838_v54 = vpop.f32.mrf.mxu1  ;;  %v3550_v20 = vadd.f32 %v3549_v31, %v8330_v36  ;;  %v6625_v31 = vld [vmem:[#allocation7 + $0x100] ss:$24 sps:$4 sm:$0xff]  }
 0x24b   :  { %v3551_v11 = vpop.f32.mrf.mxu0 }
 0x24c   :  { %v3840_v35 = vpop.f32.mrf.mxu1  ;;  %v8416_v12 = vadd.f32 %v3838_v54, %v3550_v20  ;;  %v6630_v20 = vld [vmem:[#allocation7 + $0x134] ss:$24 sps:$4 sm:$0xff]   ;;  %v8426_v11 = vpop.permute.xlu1 %2326 }
 0x24d   :  { %v3554_v29 = vpop.f32.mrf.mxu0  ;;  %4067 = vmatmul.mubr.bf16.gmra.mxu0 %v6622_v33 }
 0x24e   :  { %9013 = vst [vmem:[#allocation57_spill] sm:$0xff] %v8416_v12  ;;  %v3843_v55 = vpop.f32.mrf.mxu1  ;;  %v3555_v63 = vadd.f32 %v3554_v29, %v8323_v25  ;;  %4074 = vmatprep.mubr.bf16.mxu0 %v6627_v2  ;;  %v6634_v12 = vld [vmem:[#allocation7 + $0x190] ss:$24 sps:$4 sm:$0xff]  }
 0x24f   :  { %v3556_v8 = vpop.f32.mrf.mxu0 }
 0x250   :  { %v3845_v43 = vpop.f32.mrf.mxu1  ;;  %v8421_v50 = vadd.f32 %v3843_v55, %v3555_v63  ;;  %v8431_v55 = vpop.permute.xlu0 %2456 }
 0x251   :  { %v3557_v36 = vpop.f32.mrf.mxu0 }
 0x252   :  { %9014 = vst [vmem:[#allocation58_spill] sm:$0xff] %v8421_v50  ;;  %v3846_v49 = vpop.f32.mrf.mxu1  ;;  %v3558_v54 = vadd.f32 %v3557_v36, %v8319_v37  ;;  %v8435_v37 = vpop.permute.xlu1 %2321 }
 0x253   :  { %v3559_v35 = vpop.f32.mrf.mxu0 }
 0x254   :  { %v3848_v58 = vpop.f32.mrf.mxu1  ;;  %v8428_v33 = vadd.f32 %v3846_v49, %v3558_v54  ;;  %v6628_v35 = vld [vmem:[#allocation7 + $0x130] ss:$24 sps:$4 sm:$0xff]   ;;  %v6633_v49 = vld [vmem:[#allocation7 + $0x164] ss:$24 sps:$4 sm:$0xff]  }
 0x255   :  { %v3562_v25 = vpop.f32.mrf.mxu0  ;;  %4075 = vmatmul.mubr.bf16.gmra.mxu0 %v6625_v31 }
 0x256   :  { %9015 = vst [vmem:[#allocation59_spill] sm:$0xff] %v8428_v33  ;;  %v3851_v2 = vpop.f32.mrf.mxu1  ;;  %v3563_v29 = vadd.f32 %v3562_v25, %v8313_v24  ;;  %4082 = vmatprep.mubr.bf16.mxu0 %v6630_v20  ;;  %v8440_v24 = vpop.permute.xlu0 %2451 }
 0x257   :  { %v3564_v63 = vpop.f32.mrf.mxu0 }
 0x258   :  { %v3853_v8 = vpop.f32.mrf.mxu1  ;;  %v8433_v43 = vadd.f32 %v3851_v2, %v3563_v29  ;;  %v2317_v29 = vpop.permute.xlu1 %2316 }
 0x259   :  { %v3565_v36 = vpop.f32.mrf.mxu0 }
 0x25a   :  { %9016 = vst [vmem:[#allocation60_spill] sm:$0xff] %v8433_v43  ;;  %v3854_v9 = vpop.f32.mrf.mxu1  ;;  %v3566_v58 = vadd.f32 %v3565_v36, %v8311_v10  ;;  %v6631_v36 = vld [vmem:[#allocation7 + $0x160] ss:$24 sps:$4 sm:$0xff]  }
 0x25b   :  { %v3567_v54 = vpop.f32.mrf.mxu0 }
 0x25c   :  { %v3856_v26 = vpop.f32.mrf.mxu1  ;;  %v8438_v31 = vadd.f32 %v3854_v9, %v3566_v58  ;;  %v6636_v9 = vld [vmem:[#allocation7 + $0x194] ss:$24 sps:$4 sm:$0xff]   ;;  %v8446_v58 = vpop.permute.xlu0 %2446 }
 0x25d   :  { %v3570_v20 = vpop.f32.mrf.mxu0  ;;  %4083 = vmatmul.mubr.bf16.gmra.mxu0 %v6628_v35  ;;  %v2312_v35 = vpop.permute.xlu1 %2311 }
 0x25e   :  { %9017 = vst [vmem:[#allocation61_spill] sm:$0xff] %v8438_v31  ;;  %v3859_v25 = vpop.f32.mrf.mxu1  ;;  %v3571_v2 = vadd.f32 %v3570_v20, %v8309_v17  ;;  %4090 = vmatprep.mubr.bf16.mxu0 %v6633_v49  ;;  %v6642_v31 = vld [vmem:[#allocation7 + $0x1f4] ss:$24 sps:$4 sm:$0xff]  }
 0x25f   :  { %v3572_v63 = vpop.f32.mrf.mxu0 }
 0x260   :  { %v3861_v8 = vpop.f32.mrf.mxu1  ;;  %v8443_v22 = vadd.f32 %v3859_v25, %v3571_v2 }
 0x261   :  { %v3573_v3 = vpop.f32.mrf.mxu0  ;;  %v8453_v8 = vpop.permute.xlu0 %2441 }
 0x262   :  { %9018 = vst [vmem:[#allocation62_spill] sm:$0xff] %v8443_v22  ;;  %v3862_v10 = vpop.f32.mrf.mxu1  ;;  %v3574_v26 = vadd.f32 %v3573_v3, %v8307_v13  ;;  %v6640_v22 = vld [vmem:[#allocation7 + $0x1f0] ss:$24 sps:$4 sm:$0xff]  }
 0x263   :  { %v3575_v54 = vpop.f32.mrf.mxu0 }
 0x264   :  { %v3864_v6 = vpop.f32.mrf.mxu1  ;;  %v8448_v40 = vadd.f32 %v3862_v10, %v3574_v26  ;;  %v2307_v10 = vpop.permute.xlu1 %2306  ;;  %v6639_v26 = vld [vmem:[#allocation7 + $0x1c4] ss:$24 sps:$4 sm:$0xff]  }
 0x265   :  { %v3578_v17 = vpop.f32.mrf.mxu0  ;;  %4091 = vmatmul.mubr.bf16.gmra.mxu0 %v6631_v36 }
 0x266   :  { %v3867_v49 = vpop.f32.mrf.mxu1  ;;  %v3579_v20 = vadd.f32 %v3578_v17, %v8182_v5  ;;  %4098 = vmatprep.mubr.bf16.mxu0 %v6636_v9  ;;  %v8458_v17 = vpop.permute.xlu0 %2436 }
 0x267   :  { %v3580_v25 = vpop.f32.mrf.mxu0 }
 0x268   :  { %v3869_v2 = vpop.f32.mrf.mxu1  ;;  %v8451_v63 = vadd.f32 %v3867_v49, %v3579_v20 }
 0x269   :  { %v3581_v3 = vpop.f32.mrf.mxu0 }
 0x26a   :  { %v3870_v13 = vpop.f32.mrf.mxu1  ;;  %v3582_v6 = vadd.f32 %v3581_v3, %v8301_v62  ;;  %v6637_v62 = vld [vmem:[#allocation7 + $0x1c0] ss:$24 sps:$4 sm:$0xff]  }
 0x26b   :  { %v3583_v54 = vpop.f32.mrf.mxu0 }
 0x26c   :  { %v3872_v50 = vpop.f32.mrf.mxu1  ;;  %v8456_v33 = vadd.f32 %v3870_v13, %v3582_v6  ;;  %v8464_v6 = vpop.permute.xlu0 %2431 }
 0x26d   :  { %v3586_v36 = vpop.f32.mrf.mxu0  ;;  %4099 = vmatmul.mubr.bf16.gmra.mxu0 %v6634_v12 }
 0x26e   :  { %v3875_v5 = vpop.f32.mrf.mxu1  ;;  %v3587_v9 = vadd.f32 %v3586_v36, %v2307_v10  ;;  %4106 = vmatprep.mubr.bf16.mxu0 %v6639_v26 }
 0x26f   :  { %v3588_v49 = vpop.f32.mrf.mxu0 }
 0x270   :  { %v3877_v20 = vpop.f32.mrf.mxu1  ;;  %v8460_v25 = vadd.f32 %v3875_v5, %v3587_v9 }
 0x271   :  { %v3589_v2 = vpop.f32.mrf.mxu0 }
 0x272   :  { %v3878_v43 = vpop.f32.mrf.mxu1  ;;  %v3590_v3 = vadd.f32 %v3589_v2, %v2312_v35  ;;  %v6645_v2 = vld [vmem:[#allocation7 + $0x224] ss:$24 sps:$4 sm:$0xff]  }
 0x273   :  { %v3591_v54 = vpop.f32.mrf.mxu0 }
 0x274   :  { %v3880_v50 = vpop.f32.mrf.mxu1  ;;  %v8462_v13 = vadd.f32 %v3878_v43, %v3590_v3  ;;  %v8469_v54 = vpop.permute.xlu0 %2426 }
 0x275   :  { %v3594_v12 = vpop.f32.mrf.mxu0  ;;  %4107 = vmatmul.mubr.bf16.gmra.mxu0 %v6637_v62 }
 0x276   :  { %9019 = vst [vmem:[#allocation63_spill] sm:$0xff] %v8462_v13  ;;  %v3883_v10 = vpop.f32.mrf.mxu1  ;;  %v3595_v26 = vadd.f32 %v3594_v12, %v2317_v29  ;;  %4114 = vmatprep.mubr.bf16.mxu0 %v6642_v31 }
 0x277   :  { %v3596_v36 = vpop.f32.mrf.mxu0 }
 0x278   :  { %v3885_v49 = vpop.f32.mrf.mxu1  ;;  %v8466_v5 = vadd.f32 %v3883_v10, %v3595_v26  ;;  %v8476_v26 = vpop.permute.xlu0 %2421 }
 0x279   :  { %v3597_v9 = vpop.f32.mrf.mxu0  ;;  %v6643_v49 = vld [vmem:[#allocation7 + $0x220] ss:$24 sps:$4 sm:$0xff]  }
 0x27a   :  { %v3886_v20 = vpop.f32.mrf.mxu1  ;;  %v3598_v35 = vadd.f32 %v3597_v9, %v8435_v37 }
 0x27b   :  { %v3599_v43 = vpop.f32.mrf.mxu0 }
 0x27c   :  { %v3888_v3 = vpop.f32.mrf.mxu1  ;;  %v8471_v50 = vadd.f32 %v3886_v20, %v3598_v35  ;;  %v6648_v43 = vld [vmem:[#allocation7 + $0x254] ss:$24 sps:$4 sm:$0xff]  }
 0x27d   :  { %v3602_v13 = vpop.f32.mrf.mxu0  ;;  %4115 = vmatmul.mubr.bf16.gmra.mxu0 %v6640_v22 }
 0x27e   :  { %9020 = vst [vmem:[#allocation64_spill] sm:$0xff] %v8471_v50  ;;  %v3891_v62 = vpop.f32.mrf.mxu1  ;;  %v3603_v31 = vadd.f32 %v3602_v13, %v8426_v11  ;;  %4122 = vmatprep.mubr.bf16.mxu0 %v6645_v2  ;;  %v8482_v13 = vpop.permute.xlu0 %2416 }
 0x27f   :  { %v3604_v29 = vpop.f32.mrf.mxu0 }
 0x280   :  { %v3893_v12 = vpop.f32.mrf.mxu1  ;;  %v8474_v10 = vadd.f32 %v3891_v62, %v3603_v31 }
 0x281   :  { %v3605_v37 = vpop.f32.mrf.mxu0 }
 0x282   :  { %v3894_v36 = vpop.f32.mrf.mxu1  ;;  %v3606_v9 = vadd.f32 %v3605_v37, %v8418_v28  ;;  %v6646_v28 = vld [vmem:[#allocation7 + $0x250] ss:$24 sps:$4 sm:$0xff]  }
 0x283   :  { %v3607_v20 = vpop.f32.mrf.mxu0 }
 0x284   :  { %v3896_v35 = vpop.f32.mrf.mxu1  ;;  %v8479_v3 = vadd.f32 %v3894_v36, %v3606_v9  ;;  %v6651_v20 = vld [vmem:[#allocation7 + $0x284] ss:$24 sps:$4 sm:$0xff]  }
 0x285   :  { %v3610_v22 = vpop.f32.mrf.mxu0  ;;  %4123 = vmatmul.mubr.bf16.gmra.mxu0 %v6643_v49  ;;  %v8489_v49 = vpop.permute.xlu0 %2411 }
 0x286   :  { %9021 = vst [vmem:[#allocation65_spill] sm:$0xff] %v8479_v3  ;;  %v3899_v50 = vpop.f32.mrf.mxu1  ;;  %v3611_v11 = vadd.f32 %v3610_v22, %v8411_v41  ;;  %4130 = vmatprep.mubr.bf16.mxu0 %v6648_v43 }
 0x287   :  { %v3612_v2 = vpop.f32.mrf.mxu0 }
 0x288   :  { %v3901_v62 = vpop.f32.mrf.mxu1  ;;  %v8484_v31 = vadd.f32 %v3899_v50, %v3611_v11 }
 0x289   :  { %v3613_v29 = vpop.f32.mrf.mxu0 }
 0x28a   :  { %9022 = vst [vmem:[#allocation66_spill] sm:$0xff] %v8484_v31  ;;  %v3902_v12 = vpop.f32.mrf.mxu1  ;;  %v3614_v37 = vadd.f32 %v3613_v29, %v8404_v44  ;;  %v6649_v44 = vld [vmem:[#allocation7 + $0x280] ss:$24 sps:$4 sm:$0xff]  }
 0x28b   :  { %v3615_v36 = vpop.f32.mrf.mxu0 }
 0x28c   :  { %v3904_v9 = vpop.f32.mrf.mxu1  ;;  %v8487_v35 = vadd.f32 %v3902_v12, %v3614_v37  ;;  %v6654_v36 = vld [vmem:[#allocation7 + $0x2b4] ss:$24 sps:$4 sm:$0xff]   ;;  %v8495_v12 = vpop.permute.xlu0 %2406 }
 0x28d   :  { %v3618_v41 = vpop.f32.mrf.mxu0  ;;  %4131 = vmatmul.mubr.bf16.gmra.mxu0 %v6646_v28 }
 0x28e   :  { %9023 = vst [vmem:[#allocation67_spill] sm:$0xff] %v8487_v35  ;;  %v3907_v43 = vpop.f32.mrf.mxu1  ;;  %v3619_v22 = vadd.f32 %v3618_v41, %v8397_v45  ;;  %4138 = vmatprep.mubr.bf16.mxu0 %v6651_v20 }
 0x28f   :  { %v3620_v50 = vpop.f32.mrf.mxu0 }
 0x290   :  { %v3909_v11 = vpop.f32.mrf.mxu1  ;;  %v8492_v2 = vadd.f32 %v3907_v43, %v3619_v22  ;;  %v8502_v22 = vpop.permute.xlu0 %2401 }
 0x291   :  { %v3621_v62 = vpop.f32.mrf.mxu0  ;;  %v6652_v11 = vld [vmem:[#allocation7 + $0x2b0] ss:$24 sps:$4 sm:$0xff]  }
 0x292   :  { %9024 = vst [vmem:[#allocation68_spill] sm:$0xff] %v8492_v2  ;;  %v3910_v31 = vpop.f32.mrf.mxu1  ;;  %v3622_v29 = vadd.f32 %v3621_v62, %v8391_v16 }
 0x293   :  { %v3623_v37 = vpop.f32.mrf.mxu0 }
 0x294   :  { %v3912_v9 = vpop.f32.mrf.mxu1  ;;  %v8497_v35 = vadd.f32 %v3910_v31, %v3622_v29  ;;  %v6657_v37 = vld [vmem:[#allocation7 + $0x2e4] ss:$24 sps:$4 sm:$0xff]  }
 0x295   :  { %v3626_v28 = vpop.f32.mrf.mxu0  ;;  %4139 = vmatmul.mubr.bf16.gmra.mxu0 %v6649_v44 }
 0x296   :  { %9025 = vst [vmem:[#allocation69_spill] sm:$0xff] %v8497_v35  ;;  %v3915_v3 = vpop.f32.mrf.mxu1  ;;  %v3627_v45 = vadd.f32 %v3626_v28, %v8385_v15  ;;  %4146 = vmatprep.mubr.bf16.mxu0 %v6654_v36  ;;  %v6655_v35 = vld [vmem:[#allocation7 + $0x2e0] ss:$24 sps:$4 sm:$0xff]  }
 0x297   :  { %v3628_v20 = vpop.f32.mrf.mxu0 }
 0x298   :  { %v3917_v41 = vpop.f32.mrf.mxu1  ;;  %v8500_v43 = vadd.f32 %v3915_v3, %v3627_v45  ;;  %v2397_v3 = vpop.permute.xlu0 %2396 }
 0x299   :  { %v3629_v16 = vpop.f32.mrf.mxu0 }
 0x29a   :  { %9026 = vst [vmem:[#allocation70_spill] sm:$0xff] %v8500_v43  ;;  %v3918_v50 = vpop.f32.mrf.mxu1  ;;  %v3630_v62 = vadd.f32 %v3629_v16, %v8380_v56  ;;  %v6660_v16 = vld [vmem:[#allocation7 + $0x314] ss:$24 sps:$4 sm:$0xff]  }
 0x29b   :  { %v3631_v31 = vpop.f32.mrf.mxu0 }
 0x29c   :  { %v3920_v29 = vpop.f32.mrf.mxu1  ;;  %v8505_v9 = vadd.f32 %v3918_v50, %v3630_v62 }
 0x29d   :  { %v3634_v44 = vpop.f32.mrf.mxu0  ;;  %4147 = vmatmul.mubr.bf16.gmra.mxu0 %v6652_v11  ;;  %v2392_v29 = vpop.permute.xlu0 %2391 }
 0x29e   :  { %9027 = vst [vmem:[#allocation71_spill] sm:$0xff] %v8505_v9  ;;  %v3923_v2 = vpop.f32.mrf.mxu1  ;;  %v3635_v15 = vadd.f32 %v3634_v44, %v8373_v27  ;;  %4154 = vmatprep.mubr.bf16.mxu0 %v6657_v37 }
 0x29f   :  { %v3636_v36 = vpop.f32.mrf.mxu0 }
 0x2a0   :  { %v3925_v28 = vpop.f32.mrf.mxu1  ;;  %v8508_v45 = vadd.f32 %v3923_v2, %v3635_v15 }
 0x2a1   :  { %v3637_v20 = vpop.f32.mrf.mxu0  ;;  %v6658_v28 = vld [vmem:[#allocation7 + $0x310] ss:$24 sps:$4 sm:$0xff]  }
 0x2a2   :  { %9028 = vst [vmem:[#allocation72_spill] sm:$0xff] %v8508_v45  ;;  %v3926_v41 = vpop.f32.mrf.mxu1  ;;  %v3638_v56 = vadd.f32 %v3637_v20, %v8365_v59  ;;  %v2387_v20 = vpop.permute.xlu0 %2386 }
 0x2a3   :  { %v3639_v31 = vpop.f32.mrf.mxu0 }
 0x2a4   :  { %v3928_v50 = vpop.f32.mrf.mxu1  ;;  %v8511_v62 = vadd.f32 %v3926_v41, %v3638_v56  ;;  %v6663_v31 = vld [vmem:[#allocation7 + $0x344] ss:$24 sps:$4 sm:$0xff]  }
 0x2a5   :  { %v3642_v11 = vpop.f32.mrf.mxu0  ;;  %4155 = vmatmul.mubr.bf16.gmra.mxu0 %v6655_v35 }
 0x2a6   :  { %9029 = vst [vmem:[#allocation73_spill] sm:$0xff] %v8511_v62  ;;  %v3931_v43 = vpop.f32.mrf.mxu1  ;;  %v3643_v27 = vadd.f32 %v3642_v11, %v8356_v4  ;;  %4162 = vmatprep.mubr.bf16.mxu0 %v6660_v16 }
 0x2a7   :  { %v3644_v37 = vpop.f32.mrf.mxu0 }
 0x2a8   :  { %v3933_v2 = vpop.f32.mrf.mxu1  ;;  %v8514_v44 = vadd.f32 %v3931_v43, %v3643_v27 }
 0x2a9   :  { %v3645_v15 = vpop.f32.mrf.mxu0  ;;  %v6661_v2 = vld [vmem:[#allocation7 + $0x340] ss:$24 sps:$4 sm:$0xff]  }
 0x2aa   :  { %v3934_v36 = vpop.f32.mrf.mxu1  ;;  %v3646_v59 = vadd.f32 %v3645_v15, %v8348_v32  ;;  %v6666_v32 = vld [vmem:[#allocation7 + $0x374] ss:$24 sps:$4 sm:$0xff]  }
 0x2ab   :  { %v3647_v41 = vpop.f32.mrf.mxu0 }
 0x2ac   :  { %v3936_v56 = vpop.f32.mrf.mxu1  ;;  %v8517_v50 = vadd.f32 %v3934_v36, %v3646_v59 }
 0x2ad   :  { %v3650_v9 = vpop.f32.mrf.mxu0  ;;  %4163 = vmatmul.mubr.bf16.gmra.mxu0 %v6658_v28 }
 0x2ae   :  { %v3939_v35 = vpop.f32.mrf.mxu1  ;;  %v3651_v4 = vadd.f32 %v3650_v9, %v2387_v20  ;;  %4170 = vmatprep.mubr.bf16.mxu0 %v6663_v31 }
 0x2af   :  { %v3652_v16 = vpop.f32.mrf.mxu0 }
 0x2b0   :  { %v3941_v11 = vpop.f32.mrf.mxu1  ;;  %v8519_v43 = vadd.f32 %v3939_v35, %v3651_v4  ;;  %v6664_v4 = vld [vmem:[#allocation7 + $0x370] ss:$24 sps:$4 sm:$0xff]  }
 0x2b1   :  { %v3653_v27 = vpop.f32.mrf.mxu0 }
 0x2b2   :  { %9030 = vst [vmem:[#allocation74_spill] sm:$0xff] %v8519_v43  ;;  %v3942_v37 = vpop.f32.mrf.mxu1  ;;  %v3654_v45 = vadd.f32 %v3653_v27, %v2392_v29  ;;  %v6669_v29 = vld [vmem:[#allocation7 + $0x3a4] ss:$24 sps:$4 sm:$0xff]  }
 0x2b3   :  { %v3655_v15 = vpop.f32.mrf.mxu0 }
 0x2b4   :  { %v3944_v62 = vpop.f32.mrf.mxu1  ;;  %v8521_v41 = vadd.f32 %v3942_v37, %v3654_v45 }
 0x2b5   :  { %v3658_v36 = vpop.f32.mrf.mxu0  ;;  %4171 = vmatmul.mubr.bf16.gmra.mxu0 %v6661_v2 }
 0x2b6   :  { %9031 = vst [vmem:[#allocation75_spill] sm:$0xff] %v8521_v41  ;;  %v3947_v59 = vpop.f32.mrf.mxu1  ;;  %v3659_v56 = vadd.f32 %v3658_v36, %v2397_v3  ;;  %4178 = vmatprep.mubr.bf16.mxu0 %v6666_v32 }
 0x2b7   :  { %v3660_v9 = vpop.f32.mrf.mxu0 }
 0x2b8   :  { %v3949_v28 = vpop.f32.mrf.mxu1  ;;  %v8523_v20 = vadd.f32 %v3947_v59, %v3659_v56  ;;  %v6667_v56 = vld [vmem:[#allocation7 + $0x3a0] ss:$24 sps:$4 sm:$0xff]   ;;  %v6672_v9 = vld [vmem:[#allocation7 + $0x3d4] ss:$24 sps:$4 sm:$0xff]  }
 0x2b9   :  { %v3661_v31 = vpop.f32.mrf.mxu0 }
 0x2ba   :  { %v3950_v35 = vpop.f32.mrf.mxu1  ;;  %v3662_v16 = vadd.f32 %v3661_v31, %v8502_v22 }
 0x2bb   :  { %v3663_v11 = vpop.f32.mrf.mxu0 }
 0x2bc   :  { %v3952_v27 = vpop.f32.mrf.mxu1  ;;  %v8526_v62 = vadd.f32 %v3950_v35, %v3662_v16 }
 0x2bd   :  { %v3666_v45 = vpop.f32.mrf.mxu0  ;;  %4179 = vmatmul.mubr.bf16.gmra.mxu0 %v6664_v4 }
 0x2be   :  { %v3955_v37 = vpop.f32.mrf.mxu1  ;;  %v3667_v3 = vadd.f32 %v3666_v45, %v8495_v12  ;;  %4186 = vmatprep.mubr.bf16.mxu0 %v6669_v29 }
 0x2bf   :  { %v3668_v2 = vpop.f32.mrf.mxu0 }
 0x2c0   :  { %v3957_v32 = vpop.f32.mrf.mxu1  ;;  %v8529_v15 = vadd.f32 %v3955_v37, %v3667_v3  ;;  %v6670_v3 = vld [vmem:[#allocation7 + $0x3d0] ss:$24 sps:$4 sm:$0xff]   ;;  %v6675_v2 = vld [vmem:[#allocation7 + $0x404] ss:$24 sps:$4 sm:$0xff]  }
 0x2c1   :  { %v3669_v36 = vpop.f32.mrf.mxu0 }
 0x2c2   :  { %v3958_v59 = vpop.f32.mrf.mxu1  ;;  %v3670_v22 = vadd.f32 %v3669_v36, %v8489_v49 }
 0x2c3   :  { %v3671_v28 = vpop.f32.mrf.mxu0 }
 0x2c4   :  { %v3960_v31 = vpop.f32.mrf.mxu1  ;;  %v8532_v35 = vadd.f32 %v3958_v59, %v3670_v22 }
 0x2c5   :  { %v3674_v16 = vpop.f32.mrf.mxu0  ;;  %4187 = vmatmul.mubr.bf16.gmra.mxu0 %v6667_v56 }
 0x2c6   :  { %v3963_v11 = vpop.f32.mrf.mxu1  ;;  %v3675_v12 = vadd.f32 %v3674_v16, %v8482_v13  ;;  %4194 = vmatprep.mubr.bf16.mxu0 %v6672_v9 }
 0x2c7   :  { %v3676_v4 = vpop.f32.mrf.mxu0 }
 0x2c8   :  { %v3965_v29 = vpop.f32.mrf.mxu1  ;;  %v8535_v27 = vadd.f32 %v3963_v11, %v3675_v12  ;;  %v6673_v12 = vld [vmem:[#allocation7 + $0x400] ss:$24 sps:$4 sm:$0xff]  }
 0x2c9   :  { %v3677_v45 = vpop.f32.mrf.mxu0 }
 0x2ca   :  { %v3966_v37 = vpop.f32.mrf.mxu1  ;;  %v3678_v49 = vadd.f32 %v3677_v45, %v8476_v26  ;;  %v6678_v26 = vld [vmem:[#allocation7 + $0x434] ss:$24 sps:$4 sm:$0xff]  }
 0x2cb   :  { %v3679_v32 = vpop.f32.mrf.mxu0 }
 0x2cc   :  { %v3968_v36 = vpop.f32.mrf.mxu1  ;;  %v8538_v59 = vadd.f32 %v3966_v37, %v3678_v49 }
 0x2cd   :  { %v3682_v22 = vpop.f32.mrf.mxu0  ;;  %4195 = vmatmul.mubr.bf16.gmra.mxu0 %v6670_v3 }
 0x2ce   :  { %v3971_v28 = vpop.f32.mrf.mxu1  ;;  %v3683_v13 = vadd.f32 %v3682_v22, %v8469_v54  ;;  %4202 = vmatprep.mubr.bf16.mxu0 %v6675_v2 }
 0x2cf   :  { %v3684_v56 = vpop.f32.mrf.mxu0 }
 0x2d0   :  { %v3973_v9 = vpop.f32.mrf.mxu1  ;;  %v3972_v31 = vadd.f32 %v3971_v28, %v3683_v13  ;;  %v6676_v13 = vld [vmem:[#allocation7 + $0x430] ss:$24 sps:$4 sm:$0xff]  }
 0x2d1   :  { %v3685_v16 = vpop.f32.mrf.mxu0  ;;  %v6681_v9 = vld [vmem:[#allocation7 + $0x464] ss:$24 sps:$4 sm:$0xff]  }
 0x2d2   :  { %v3974_v11 = vpop.f32.mrf.mxu1  ;;  %v3686_v4 = vadd.f32 %v3685_v16, %v8464_v6 }
 0x2d3   :  { %v3687_v29 = vpop.f32.mrf.mxu0 }
 0x2d4   :  { %v3976_v45 = vpop.f32.mrf.mxu1  ;;  %v3975_v32 = vadd.f32 %v3974_v11, %v3686_v4 }
 0x2d5   :  { %v3690_v37 = vpop.f32.mrf.mxu0  ;;  %4203 = vmatmul.mubr.bf16.gmra.mxu0 %v6673_v12 }
 0x2d6   :  { %v3979_v49 = vpop.f32.mrf.mxu1  ;;  %v3691_v3 = vadd.f32 %v3690_v37, %v8458_v17  ;;  %4210 = vmatprep.mubr.bf16.mxu0 %v6678_v26 }
 0x2d7   :  { %v3692_v54 = vpop.f32.mrf.mxu0 }
 0x2d8   :  { %v3981_v2 = vpop.f32.mrf.mxu1  ;;  %v3980_v36 = vadd.f32 %v3979_v49, %v3691_v3  ;;  %v6679_v3 = vld [vmem:[#allocation7 + $0x460] ss:$24 sps:$4 sm:$0xff]  }
 0x2d9   :  { %v3693_v22 = vpop.f32.mrf.mxu0  ;;  %v6684_v2 = vld [vmem:[#allocation7 + $0x494] ss:$24 sps:$4 sm:$0xff]  }
 0x2da   :  { %v3982_v28 = vpop.f32.mrf.mxu1  ;;  %v3694_v56 = vadd.f32 %v3693_v22, %v8453_v8 }
 0x2db   :  { %v3695_v6 = vpop.f32.mrf.mxu0 }
 0x2dc   :  { %v3984_v16 = vpop.f32.mrf.mxu1  ;;  %v3983_v29 = vadd.f32 %v3982_v28, %v3694_v56 }
 0x2dd   :  { %v3698_v45 = vpop.f32.mrf.mxu0  ;;  %4211 = vmatmul.mubr.bf16.gmra.mxu0 %v6676_v13 }
 0x2de   :  { %v3987_v11 = vpop.f32.mrf.mxu1  ;;  %v3699_v12 = vadd.f32 %v3698_v45, %v8446_v58  ;;  %4218 = vmatprep.mubr.bf16.mxu0 %v6681_v9 }
 0x2df   :  { %v3700_v17 = vpop.f32.mrf.mxu0 }
 0x2e0   :  { %v3989_v4 = vpop.f32.mrf.mxu1  ;;  %v3988_v26 = vadd.f32 %v3987_v11, %v3699_v12  ;;  %v6682_v12 = vld [vmem:[#allocation7 + $0x490] ss:$24 sps:$4 sm:$0xff]  }
 0x2e1   :  { %v3701_v37 = vpop.f32.mrf.mxu0  ;;  %v6687_v4 = vld [vmem:[#allocation7 + $0x4c4] ss:$24 sps:$4 sm:$0xff]  }
 0x2e2   :  { %v3990_v49 = vpop.f32.mrf.mxu1  ;;  %v3702_v54 = vadd.f32 %v3701_v37, %v8440_v24 }
 0x2e3   :  { %v3703_v8 = vpop.f32.mrf.mxu0 }
 0x2e4   :  { %v3992_v22 = vpop.f32.mrf.mxu1  ;;  %v3991_v6 = vadd.f32 %v3990_v49, %v3702_v54 }
 0x2e5   :  { %v3706_v16 = vpop.f32.mrf.mxu0  ;;  %4219 = vmatmul.mubr.bf16.gmra.mxu0 %v6679_v3 }
 0x2e6   :  { %v3995_v28 = vpop.f32.mrf.mxu1  ;;  %v3707_v13 = vadd.f32 %v3706_v16, %v8431_v55  ;;  %4226 = vmatprep.mubr.bf16.mxu0 %v6684_v2 }
 0x2e7   :  { %v3708_v58 = vpop.f32.mrf.mxu0 }
 0x2e8   :  { %v3997_v56 = vpop.f32.mrf.mxu1  ;;  %v3996_v9 = vadd.f32 %v3995_v28, %v3707_v13  ;;  %v6685_v13 = vld [vmem:[#allocation7 + $0x4c0] ss:$24 sps:$4 sm:$0xff]  }
 0x2e9   :  { %v3709_v45 = vpop.f32.mrf.mxu0  ;;  %v6690_v56 = vld [vmem:[#allocation7 + $0x4f4] ss:$24 sps:$4 sm:$0xff]  }
 0x2ea   :  { %v3998_v11 = vpop.f32.mrf.mxu1  ;;  %v3710_v17 = vadd.f32 %v3709_v45, %v8423_v52 }
 0x2eb   :  { %v3711_v24 = vpop.f32.mrf.mxu0 }
 0x2ec   :  { %v4000_v37 = vpop.f32.mrf.mxu1  ;;  %v3999_v8 = vadd.f32 %v3998_v11, %v3710_v17 }
 0x2ed   :  { %v4036_v22 = vpop.f32.mrf.mxu0  ;;  %4227 = vmatmul.mubr.bf16.gmra.mxu0 %v6682_v12 }
 0x2ee   :  { %v4260_v49 = vpop.f32.mrf.mxu1  ;;  %v8549_v3 = vadd.f32 %v4036_v22, %v8315_v61  ;;  %4234 = vmatprep.mubr.bf16.mxu0 %v6687_v4 }
 0x2ef   :  { %v8551_v55 = vadd.f32 %v4260_v49, %v3972_v31  ;;  %v4038_v54 = vpop.f32.mrf.mxu0 }
 0x2f0   :  { %v4262_v2 = vpop.f32.mrf.mxu1  ;;  %v6693_v54 = vld [vmem:[#allocation7 + $0x524] ss:$24 sps:$4 sm:$0xff]  }
 0x2f1   :  { %v4039_v16 = vpop.f32.mrf.mxu0 }
 0x2f2   :  { %v4263_v28 = vpop.f32.mrf.mxu1  ;;  %v8554_v52 = vadd.f32 %v4039_v16, %v8317_v51  ;;  %v6688_v51 = vld [vmem:[#allocation7 + $0x4f0] ss:$24 sps:$4 sm:$0xff]  }
 0x2f3   :  { %v8556_v58 = vadd.f32 %v4263_v28, %v3975_v32  ;;  %v4041_v45 = vpop.f32.mrf.mxu0 }
 0x2f4   :  { %v4265_v11 = vpop.f32.mrf.mxu1 }
 0x2f5   :  { %v4044_v12 = vpop.f32.mrf.mxu0  ;;  %4235 = vmatmul.mubr.bf16.gmra.mxu0 %v6685_v13 }
 0x2f6   :  { %v4268_v61 = vpop.f32.mrf.mxu1  ;;  %v8559_v31 = vadd.f32 %v4044_v12, %v8321_v57  ;;  %4242 = vmatprep.mubr.bf16.mxu0 %v6690_v56 }
 0x2f7   :  { %v8561_v17 = vadd.f32 %v4268_v61, %v3980_v36  ;;  %v4046_v4 = vpop.f32.mrf.mxu0 }
 0x2f8   :  { %v4270_v24 = vpop.f32.mrf.mxu1 }
 0x2f9   :  { %v4047_v37 = vpop.f32.mrf.mxu0 }
 0x2fa   :  { %v4271_v22 = vpop.f32.mrf.mxu1  ;;  %v8564_v32 = vadd.f32 %v4047_v37, %v8325_v38  ;;  %v6691_v38 = vld [vmem:[#allocation7 + $0x520] ss:$24 sps:$4 sm:$0xff]  }
 0x2fb   :  { %v8566_v49 = vadd.f32 %v4271_v22, %v3983_v29  ;;  %v4049_v2 = vpop.f32.mrf.mxu0 }
 0x2fc   :  { %v4273_v16 = vpop.f32.mrf.mxu1 }
 0x2fd   :  { %v4052_v28 = vpop.f32.mrf.mxu0  ;;  %4243 = vmatmul.mubr.bf16.gmra.mxu0 %v6688_v51 }
 0x2fe   :  { %v4276_v57 = vpop.f32.mrf.mxu1  ;;  %v8569_v36 = vadd.f32 %v4052_v28, %v8328_v34  ;;  %4250 = vmatprep.mubr.bf16.mxu0 %v6693_v54 }
 0x2ff   :  { %v8571_v13 = vadd.f32 %v4276_v57, %v3988_v26  ;;  %v4054_v56 = vpop.f32.mrf.mxu0 }
 0x300   :  { %v4278_v45 = vpop.f32.mrf.mxu1 }
 0x301   :  { %v4055_v11 = vpop.f32.mrf.mxu0 }
 0x302   :  { %v4279_v12 = vpop.f32.mrf.mxu1  ;;  %v8574_v29 = vadd.f32 %v4055_v11, %v8333_v42 }
 0x303   :  { %v8576_v61 = vadd.f32 %v4279_v12, %v3991_v6  ;;  %v4057_v4 = vpop.f32.mrf.mxu0 }
 0x304   :  { %v4281_v24 = vpop.f32.mrf.mxu1 }
 0x305   :  { %v4060_v37 = vpop.f32.mrf.mxu0  ;;  %4251 = vmatmul.mubr.bf16.gmra.mxu0 %v6691_v38 }
 0x306   :  { %v4284_v22 = vpop.f32.mrf.mxu1  ;;  %v8579_v34 = vadd.f32 %v4060_v37, %v8338_v60 }
 0x307   :  { %v8581_v26 = vadd.f32 %v4284_v22, %v3996_v9  ;;  %v4062_v51 = vpop.f32.mrf.mxu0 }
 0x308   :  { %v4286_v54 = vpop.f32.mrf.mxu1 }
 0x309   :  { %v4063_v2 = vpop.f32.mrf.mxu0 }
 0x30a   :  { %v4287_v16 = vpop.f32.mrf.mxu1  ;;  %v8584_v28 = vadd.f32 %v4063_v2, %v8341_v47 }
 0x30b   :  { %v8586_v42 = vadd.f32 %v4287_v16, %v3999_v8  ;;  %v4065_v6 = vpop.f32.mrf.mxu0 }
 0x30c   :  { %v4289_v57 = vpop.f32.mrf.mxu1 }
 0x30d   :  { %v4068_v56 = vpop.f32.mrf.mxu0 }
 0x30e   :  { %v8589_v45 = vadd.f32 %v4068_v56, %v8346_v30 }
 0x30f   :  { %v4070_v11 = vpop.f32.mrf.mxu0 }
 0x311   :  { %v4071_v60 = vpop.f32.mrf.mxu0 }
 0x312   :  { %v8592_v9 = vadd.f32 %v4071_v60, %v8353_v18 }
 0x313   :  { %v4073_v12 = vpop.f32.mrf.mxu0 }
 0x315   :  { %v4076_v38 = vpop.f32.mrf.mxu0 }
 0x316   :  { %v8595_v4 = vadd.f32 %v4076_v38, %v8358_v21 }
 0x317   :  { %v4078_v47 = vpop.f32.mrf.mxu0 }
 0x319   :  { %v4079_v24 = vpop.f32.mrf.mxu0 }
 0x31a   :  { %v8598_v8 = vadd.f32 %v4079_v24, %v8363_v53 }
 0x31b   :  { %v4081_v37 = vpop.f32.mrf.mxu0 }
 0x31d   :  { %v4084_v22 = vpop.f32.mrf.mxu0 }
 0x31e   :  { %v8601_v30 = vadd.f32 %v4084_v22, %v8370_v7 }
 0x31f   :  { %v4086_v51 = vpop.f32.mrf.mxu0 }
 0x321   :  { %v4087_v54 = vpop.f32.mrf.mxu0 }
 0x322   :  { %v4088_v18 = vadd.f32 %v4087_v54, %v8375_v46 }
 0x323   :  { %v4089_v2 = vpop.f32.mrf.mxu0 }
 0x325   :  { %v4092_v16 = vpop.f32.mrf.mxu0 }
 0x326   :  { %v4093_v6 = vadd.f32 %v4092_v16, %v8378_v0 }
 0x327   :  { %v4094_v21 = vpop.f32.mrf.mxu0 }
 0x329   :  { %v4095_v57 = vpop.f32.mrf.mxu0 }
 0x32a   :  { %v4096_v56 = vadd.f32 %v4095_v57, %v8383_v23 }
 0x32b   :  { %v4097_v11 = vpop.f32.mrf.mxu0 }
 0x32d   :  { %v4100_v53 = vpop.f32.mrf.mxu0 }
 0x32e   :  { %v8607_v60 = vadd.f32 %v4100_v53, %v8387_v19 }
 0x32f   :  { %v4102_v12 = vpop.f32.mrf.mxu0 }
 0x331   :  { %v4103_v7 = vpop.f32.mrf.mxu0 }
 0x332   :  { %v8610_v38 = vadd.f32 %v4103_v7, %v8389_v14 }
 0x333   :  { %v4105_v47 = vpop.f32.mrf.mxu0 }
 0x335   :  { %v4108_v46 = vpop.f32.mrf.mxu0 }
 0x336   :  { %v8613_v24 = vadd.f32 %v4108_v46, %v8394_v39 }
 0x337   :  { %v4110_v0 = vpop.f32.mrf.mxu0 }
 0x339   :  { %v4111_v37 = vpop.f32.mrf.mxu0 }
 0x33a   :  { %v8616_v22 = vadd.f32 %v4111_v37, %v8399_v48 }
 0x33b   :  { %v4113_v23 = vpop.f32.mrf.mxu0 }
 0x33d   :  { %v4116_v51 = vpop.f32.mrf.mxu0 }
 0x33e   :  { %v8619_v19 = vadd.f32 %v4116_v51, %v8402_v1 }
 0x33f   :  { %v4118_v54 = vpop.f32.mrf.mxu0 }
 0x341   :  { %v8621_v2 = vpop.f32.mrf.mxu0 }
 0x343   :  { %v4121_v14 = vpop.f32.mrf.mxu0 }
 0x345   :  { %v4124_v16 = vpop.f32.mrf.mxu0 }
 0x347   :  { %v4126_v21 = vpop.f32.mrf.mxu0 }
 0x349   :  { %v4127_v57 = vpop.f32.mrf.mxu0 }
 0x34b   :  { %v4129_v11 = vpop.f32.mrf.mxu0 }
 0x34d   :  { %v4132_v39 = vpop.f32.mrf.mxu0 }
 0x34f   :  { %v4134_v53 = vpop.f32.mrf.mxu0 }
 0x351   :  { %v4135_v12 = vpop.f32.mrf.mxu0 }
 0x353   :  { %v4137_v7 = vpop.f32.mrf.mxu0 }
 0x355   :  { %v4140_v47 = vpop.f32.mrf.mxu0 }
 0x357   :  { %v4142_v48 = vpop.f32.mrf.mxu0 }
 0x359   :  { %v4143_v46 = vpop.f32.mrf.mxu0 }
 0x35b   :  { %v4145_v0 = vpop.f32.mrf.mxu0 }
 0x35d   :  { %v4148_v37 = vpop.f32.mrf.mxu0 }
 0x35f   :  { %v4150_v23 = vpop.f32.mrf.mxu0 }
 0x360   :  { %v9032_v23 = vld [vmem:[#allocation62_spill] sm:$0xff] }
 0x361   :  { %v4151_v1 = vpop.f32.mrf.mxu0 }
 0x362   :  { %v4152_v7 = vadd.f32 %v4151_v1, %v8448_v40  ;;  %v9035_v40 = vld [vmem:[#allocation60_spill] sm:$0xff] }
 0x363   :  { %v4153_v51 = vpop.f32.mrf.mxu0 }
 0x364   :  { %v4149_v51 = vadd.f32 %v4148_v37, %v9032_v23 }
 0x365   :  { %v4156_v54 = vpop.f32.mrf.mxu0 }
 0x366   :  { %v4157_v11 = vadd.f32 %v4156_v54, %v8451_v63 }
 0x367   :  { %v4158_v43 = vpop.f32.mrf.mxu0 }
 0x369   :  { %v4159_v41 = vpop.f32.mrf.mxu0 }
 0x36a   :  { %v4160_v14 = vadd.f32 %v4159_v41, %v8456_v33  ;;  %v9033_v33 = vld [vmem:[#allocation61_spill] sm:$0xff] }
 0x36b   :  { %v4161_v21 = vpop.f32.mrf.mxu0  ;;  %v4144_v41 = vadd.f32 %v4143_v46, %v9033_v33  ;;  %v9037_v46 = vld [vmem:[#allocation58_spill] sm:$0xff] }
 0x36c   :  { %5958 = vmatprep.subr.mxu1 %v4160_v14  ;;  %v9034_v21 = vld [vmem:[#allocation63_spill] sm:$0xff]  ;;  %v4133_v14 = vadd.f32 %v4132_v39, %v9037_v46  ;;  %v9054_v46 = vld [vmem:[#allocation30_spill] sm:$0xff] }
 0x36d   :  { %v4164_v53 = vpop.f32.mrf.mxu0  ;;  %5959 = vmatpush3.msra.mxu1 %v4096_v56 }
 0x36e   :  { %v8627_v48 = vadd.f32 %v4164_v53, %v8460_v25  ;;  %5960 = vmatprep.subr.mxu1 %v4157_v11  ;;  %v4141_v25 = vadd.f32 %v4140_v47, %v9035_v40  ;;  %v9039_v53 = vld [vmem:[#allocation64_spill] sm:$0xff] }
 0x36f   :  { %v4166_v0 = vpop.f32.mrf.mxu0  ;;  %5961 = vmatpush3.msra.mxu1 %v4093_v6  ;;  %v9036_v6 = vld [vmem:[#allocation59_spill] sm:$0xff] }
 0x370   :  { %5962 = vmatprep.subr.mxu1 %v4152_v7  ;;  %v4136_v37 = vadd.f32 %v4135_v12, %v9036_v6  ;;  %v9052_v6 = vld [vmem:[#allocation19_spill] sm:$0xff] }
 0x371   :  { %v4167_v43 = vpop.f32.mrf.mxu0  ;;  %5963 = vmatpush3.msra.mxu1 %v4088_v18 }
 0x372   :  { %v8632_v63 = vadd.f32 %v4167_v43, %v9034_v21  ;;  %5964 = vmatprep.subr.mxu1 %v4149_v51 }
 0x373   :  { %v4169_v56 = vpop.f32.mrf.mxu0  ;;  %5965 = vmatpush3.msra.mxu1 %v8601_v30  ;;  %v9038_v30 = vld [vmem:[#allocation57_spill] sm:$0xff] }
 0x374   :  { %5966 = vmatprep.subr.mxu1 %v4144_v41  ;;  %v4128_v47 = vadd.f32 %v4127_v57, %v9038_v30 }
 0x375   :  { %v4172_v1 = vpop.f32.mrf.mxu0  ;;  %5967 = vmatpush3.msra.mxu1 %v8598_v8 }
 0x376   :  { %v8639_v54 = vadd.f32 %v4172_v1, %v8466_v5  ;;  %5968 = vmatprep.subr.mxu1 %v4141_v25  ;;  %v9040_v5 = vld [vmem:[#allocation56_spill] sm:$0xff]  ;;  %v9051_v1 = vld [vmem:[#allocation25_spill] sm:$0xff] }
 0x377   :  { %v4174_v18 = vpop.f32.mrf.mxu0  ;;  %5969 = vmatpush3.msra.mxu1 %v8595_v4  ;;  %v4125_v12 = vadd.f32 %v4124_v16, %v9040_v5  ;;  %v9041_v4 = vld [vmem:[#allocation55_spill] sm:$0xff]  ;;  %v9058_v5 = vld [vmem:[#allocation21_spill] sm:$0xff] }
 0x378   :  { %5970 = vmatprep.subr.mxu1 %v4136_v37  ;;  %v4120_v39 = vadd.f32 %v8621_v2, %v9041_v4  ;;  %v9044_v2 = vld [vmem:[#allocation16_spill] sm:$0xff] }
 0x379   :  { %v4175_v11 = vpop.f32.mrf.mxu0  ;;  %5971 = vmatpush3.msra.mxu1 %v8592_v9  ;;  %v9053_v18 = vld [vmem:[#allocation28_spill] sm:$0xff] }
 0x37a   :  { %v8646_v7 = vadd.f32 %v4175_v11, %v9039_v53  ;;  %5972 = vmatprep.subr.mxu1 %v4133_v14  ;;  %v9055_v11 = vld [vmem:[#allocation27_spill] sm:$0xff]  ;;  %v9059_v4 = vld [vmem:[#allocation32_spill] sm:$0xff] }
 0x37b   :  { %v4177_v8 = vpop.f32.mrf.mxu0  ;;  %5973 = vmatpush3.msra.mxu1 %v8589_v45  ;;  %v9042_v45 = vld [vmem:[#allocation65_spill] sm:$0xff] }
 0x37c   :  { %5974 = vmatprep.subr.mxu1 %v4128_v47  ;;  %v9057_v8 = vld [vmem:[#allocation29_spill] sm:$0xff] }
 0x37d   :  { %v4180_v0 = vpop.f32.mrf.mxu0  ;;  %5975 = vmatpush3.msra.mxu1 %v8584_v28 }
 0x37e   :  { %v8654_v9 = vadd.f32 %v4180_v0, %v8474_v10  ;;  %5976 = vmatprep.subr.mxu1 %v4125_v12  ;;  %v9043_v10 = vld [vmem:[#allocation15_spill] sm:$0xff] }
 0x37f   :  { %v4182_v57 = vpop.f32.mrf.mxu0  ;;  %5977 = vmatpush3.msra.mxu1 %v8579_v34  ;;  %v1491_v51 = vadd.f32 %v9044_v2, %v9043_v10  ;;  %v9045_v34 = vld [vmem:[#allocation66_spill] sm:$0xff] }
 0x380   :  { %5978 = vmatprep.subr.mxu1 %v4120_v39  ;;  %v9060_v39 = vld [vmem:[#allocation34_spill] sm:$0xff] }
 0x381   :  { %v4183_v23 = vpop.f32.mrf.mxu0  ;;  %5979 = vmatpush3.msra.mxu1 %v8574_v29 }
 0x382   :  { %v8659_v16 = vadd.f32 %v4183_v23, %v9042_v45  ;;  %5980 = vmatprep.subr.mxu1 %v8619_v19  ;;  %v9046_v19 = vld [vmem:[#allocation17_spill] sm:$0xff]  ;;  %v9061_v45 = vld [vmem:[#allocation31_spill] sm:$0xff] }
 0x383   :  { %v4185_v28 = vpop.f32.mrf.mxu0  ;;  %5981 = vmatpush3.msra.mxu1 %v8569_v36  ;;  %v1564_v36 = vadd.f32 %v9046_v19, %v1491_v51 }
 0x384   :  { %5982 = vmatprep.subr.mxu1 %v8616_v22  ;;  %v9047_v22 = vld [vmem:[#allocation67_spill] sm:$0xff]  ;;  %v9062_v28 = vld [vmem:[#allocation22_spill] sm:$0xff] }
 0x385   :  { %v4188_v43 = vpop.f32.mrf.mxu0  ;;  %5983 = vmatpush3.msra.mxu1 %v8564_v32  ;;  %v9048_v32 = vld [vmem:[#allocation26_spill] sm:$0xff]  ;;  %v1521_v2 = vadd.f32 %v9062_v28, %v9043_v10 }
 0x386   :  { %v8668_v33 = vadd.f32 %v4188_v43, %v9045_v34  ;;  %5984 = vmatprep.subr.mxu1 %v8613_v24  ;;  %v1637_v56 = vadd.f32 %v9048_v32, %v1564_v36  ;;  %v9049_v24 = vld [vmem:[#allocation24_spill] sm:$0xff]  ;;  %v9063_v34 = vld [vmem:[#allocation33_spill] sm:$0xff] }
 0x387   :  { %v4190_v29 = vpop.f32.mrf.mxu0  ;;  %5985 = vmatpush3.msra.mxu1 %v8559_v31  ;;  %v9050_v31 = vld [vmem:[#allocation18_spill] sm:$0xff] }
 0x388   :  { %5986 = vmatprep.subr.mxu1 %v8610_v38  ;;  %v1501_v38 = vadd.f32 %v9050_v31, %v9043_v10  ;;  %v9064_v29 = vld [vmem:[#allocation23_spill] sm:$0xff] }
 0x389   :  { %v4191_v41 = vpop.f32.mrf.mxu0  ;;  %5987 = vmatpush3.msra.mxu1 %v8554_v52  ;;  %v1594_v19 = vadd.f32 %v9064_v29, %v1521_v2 }
 0x38a   :  { %v8676_v21 = vadd.f32 %v4191_v41, %v9047_v22  ;;  %5988 = vmatprep.subr.mxu1 %v8607_v60  ;;  %v1574_v60 = vadd.f32 %v9052_v6, %v1501_v38  ;;  %v9065_v41 = vld [vmem:[#allocation36_spill] sm:$0xff]  ;;  %v9066_v22 = vld [vmem:[#allocation38_spill] sm:$0xff]  ;;  %v9068_v38 = vld [vmem:[#allocation37_spill] sm:$0xff] }
 0x38b   :  { %v4193_v40 = vpop.f32.mrf.mxu0  ;;  %5989 = vmatpush3.msra.mxu1 %v8549_v3  ;;  %v1667_v32 = vadd.f32 %v9066_v22, %v1594_v19  ;;  %v9087_v19 = vlaneseq }
 0x38c   :  { %4356 = vmatmul.mubr.f32.vlgmr.msra.gmra.mxu1 %v9049_v24  ;;  %6014 = vmatprep.subr.mxu1 %v8586_v42  ;;  %v1647_v3 = vadd.f32 %v9054_v46, %v1574_v60  ;;  %v9056_v42 = vld [vmem:[#allocation20_spill] sm:$0xff]  ;;  %v9067_v40 = vld [vmem:[#allocation35_spill] sm:$0xff]  ;;  %v9070_v46 = vld [vmem:[#allocation73_spill] sm:$0xff] }
 0x38d   :  { %v8685_v25 = vpop.f32.mrf.mxu0  ;;  %4360 = vmatprep.mubr.f32.mxu1 %v1637_v56  ;;  %v1511_v30 = vadd.f32 %v9056_v42, %v9043_v10 }
 0x38f   :  { %v4198_v52 = vpop.f32.mrf.mxu0  ;;  %v1584_v12 = vadd.f32 %v9058_v5, %v1511_v30 }
 0x390   :  { %4361 = vmatmul.mubr.f32.gmra.mxu1 %v9051_v1  ;;  %v9069_v52 = vld [vmem:[#allocation40_spill] sm:$0xff] }
 0x391   :  { %v4199_v37 = vpop.f32.mrf.mxu0  ;;  %4365 = vmatprep.mubr.f32.mxu1 %v9053_v18  ;;  %v1657_v57 = vadd.f32 %v9060_v39, %v1584_v12  ;;  %v9074_v12 = vld [vmem:[#allocation69_spill] sm:$0xff]  ;;  %v9075_v39 = vld [vmem:[#allocation68_spill] sm:$0xff] }
 0x393   :  { %v4201_v14 = vpop.f32.mrf.mxu0 }
 0x394   :  { %4366 = vmatmul.mubr.f32.gmra.mxu1 %v9055_v11  ;;  %v9071_v11 = vld [vmem:[#allocation72_spill] sm:$0xff] }
 0x395   :  { %v4204_v47 = vpop.f32.mrf.mxu0  ;;  %4370 = vmatprep.mubr.f32.mxu1 %v1647_v3 }
 0x397   :  { %v4206_v53 = vpop.f32.mrf.mxu0 }
 0x398   :  { %4371 = vmatmul.mubr.f32.gmra.mxu1 %v9057_v8  ;;  %v9073_v8 = vld [vmem:[#allocation70_spill] sm:$0xff] }
 0x399   :  { %v4207_v0 = vpop.f32.mrf.mxu0  ;;  %4375 = vmatprep.mubr.f32.mxu1 %v9059_v4 }
 0x39b   :  { %v4209_v23 = vpop.f32.mrf.mxu0 }
 0x39c   :  { %4376 = vmatmul.mubr.f32.gmra.mxu1 %v9061_v45 }
 0x39d   :  { %v4212_v51 = vpop.f32.mrf.mxu0  ;;  %4380 = vmatprep.mubr.f32.mxu1 %v1657_v57 }
 0x39e   :  { %v4213_v42 = vadd.f32 %v4212_v51, %v9071_v11 }
 0x39f   :  { %v4214_v43 = vpop.f32.mrf.mxu0 }
 0x3a0   :  { %4381 = vmatmul.mubr.f32.gmra.mxu1 %v9063_v34  ;;  %v9085_v34 = vld [vmem:[#allocation48_spill] sm:$0xff] }
 0x3a1   :  { %v4215_v36 = vpop.f32.mrf.mxu0  ;;  %4385 = vmatprep.mubr.f32.mxu1 %v9065_v41  ;;  %v9089_v41 = vld [vmem:[#allocation50_spill] sm:$0xff] }
 0x3a2   :  { %v4216_v3 = vadd.f32 %v4215_v36, %v9070_v46  ;;  %v9088_v36 = vld [vmem:[#allocation47_spill] sm:$0xff] }
 0x3a3   :  { %v4217_v56 = vpop.f32.mrf.mxu0 }
 0x3a4   :  { %4386 = vmatmul.mubr.f32.gmra.mxu1 %v9067_v40  ;;  %v9090_v56 = vld [vmem:[#allocation49_spill] sm:$0xff]  ;;  %v6782_v40 = vmov 1.0  }
 0x3a5   :  { %v4220_v24 = vpop.f32.mrf.mxu0  ;;  %4390 = vmatprep.mubr.f32.mxu1 %v1667_v32 }
 0x3a6   :  { %v4221_v60 = vadd.f32 %v4220_v24, %v8514_v44  ;;  %v9091_v24 = vld [vmem:[#allocation52_spill] sm:$0xff] }
 0x3a7   :  { %v4222_v31 = vpop.f32.mrf.mxu0 }
 0x3a8   :  { %4391 = vmatmul.mubr.f32.gmra.mxu1 %v9068_v38  ;;  %v6783_v31 = vmov 0.0   ;;  %v9092_v38 = vld [vmem:[#allocation51_spill] sm:$0xff] }
 0x3a9   :  { %v4223_v10 = vpop.f32.mrf.mxu0  ;;  %4460 = vmatprep.mubr.f32.mxu1 %v9069_v52  ;;  %v9094_v52 = vld [vmem:[#allocation53_spill] sm:$0xff] }
 0x3aa   :  { %v4224_v1 = vadd.f32 %v4223_v10, %v8517_v50  ;;  %v9072_v50 = vld [vmem:[#allocation71_spill] sm:$0xff]  ;;  %v9093_v10 = vld [vmem:[#allocation54_spill] sm:$0xff] }
 0x3ab   :  { %v4225_v6 = vpop.f32.mrf.mxu0  ;;  %v4208_v53 = vadd.f32 %v4207_v0, %v9072_v50 }
 0x3ac   :  { %6015 = vmatpush3.msra.mxu1 %v4224_v1 }
 0x3ad   :  { %v4228_v18 = vpop.f32.mrf.mxu0  ;;  %6016 = vmatprep.subr.mxu1 %v8581_v26  ;;  %v4205_v26 = vadd.f32 %v4204_v47, %v9073_v8 }
 0x3ae   :  { %6017 = vmatpush3.msra.mxu1 %v4221_v60 }
 0x3af   :  { %v4230_v14 = vpop.f32.mrf.mxu0  ;;  %6018 = vmatprep.subr.mxu1 %v8576_v61  ;;  %v4200_v61 = vadd.f32 %v4199_v37, %v9074_v12 }
 0x3b0   :  { %6019 = vmatpush3.msra.mxu1 %v4216_v3 }
 0x3b1   :  { %v4231_v30 = vpop.f32.mrf.mxu0  ;;  %6020 = vmatprep.subr.mxu1 %v8571_v13  ;;  %v4197_v13 = vadd.f32 %v8685_v25, %v9075_v39 }
 0x3b2   :  { %6021 = vmatpush3.msra.mxu1 %v4213_v42 }
 0x3b3   :  { %v4233_v44 = vpop.f32.mrf.mxu0  ;;  %6022 = vmatprep.subr.mxu1 %v8566_v49 }
 0x3b4   :  { %6023 = vmatpush3.msra.mxu1 %v4208_v53 }
 0x3b5   :  { %v4236_v5 = vpop.f32.mrf.mxu0  ;;  %6024 = vmatprep.subr.mxu1 %v8561_v17 }
 0x3b6   :  { %6025 = vmatpush3.msra.mxu1 %v4205_v26 }
 0x3b7   :  { %v4238_v4 = vpop.f32.mrf.mxu0  ;;  %6026 = vmatprep.subr.mxu1 %v8556_v58 }
 0x3b8   :  { %6027 = vmatpush3.msra.mxu1 %v4200_v61 }
 0x3b9   :  { %v4239_v0 = vpop.f32.mrf.mxu0  ;;  %6028 = vmatprep.subr.mxu1 %v8551_v55 }
 0x3ba   :  { %6029 = vmatpush3.msra.mxu1 %v4197_v13  ;;  %v4240_v43 = vadd.f32 %v4239_v0, %v8526_v62  ;;  %v9078_v62 = vld [vmem:[#allocation39_spill] sm:$0xff] }
 0x3bb   :  { %v4241_v49 = vpop.f32.mrf.mxu0 }
 0x3bd   :  { %v4244_v47 = vpop.f32.mrf.mxu0 }
 0x3be   :  { %v4245_v55 = vadd.f32 %v4244_v47, %v8529_v15 }
 0x3bf   :  { %v4246_v57 = vpop.f32.mrf.mxu0 }
 0x3c1   :  { %v4247_v23 = vpop.f32.mrf.mxu0 }
 0x3c2   :  { %v4248_v25 = vadd.f32 %v4247_v23, %v8532_v35 }
 0x3c3   :  { %v4249_v45 = vpop.f32.mrf.mxu0 }
 0x3c5   :  { %v4252_v17 = vpop.f32.mrf.mxu0 }
 0x3c6   :  { %v4253_v58 = vadd.f32 %v4252_v17, %v8535_v27  ;;  %v4237_v27 = vadd.f32 %v4236_v5, %v8523_v20  ;;  %v9080_v20 = vld [vmem:[#allocation41_spill] sm:$0xff] }
 0x3c7   :  { %v4254_v28 = vpop.f32.mrf.mxu0 }
 0x3c9   :  { %v4255_v37 = vpop.f32.mrf.mxu0 }
 0x3ca   :  { %v4256_v2 = vadd.f32 %v4255_v37, %v8538_v59  ;;  %v9076_v59 = vld [vmem:[#allocation75_spill] sm:$0xff] }
 0x3cb   :  { %v4257_v51 = vpop.f32.mrf.mxu0  ;;  %v4232_v35 = vadd.f32 %v4231_v30, %v9076_v59 }
 0x3cc   :  { %6030 = vmatprep.subr.mxu1 %v4256_v2 }
 0x3cd   :  { %6031 = vmatpush3.msra.mxu1 %v8676_v21  ;;  %v9083_v21 = vld [vmem:[#allocation46_spill] sm:$0xff] }
 0x3ce   :  { %6032 = vmatprep.subr.mxu1 %v4253_v58 }
 0x3cf   :  { %6033 = vmatpush3.msra.mxu1 %v8668_v33  ;;  %v9077_v33 = vld [vmem:[#allocation74_spill] sm:$0xff] }
 0x3d0   :  { %6034 = vmatprep.subr.mxu1 %v4248_v25  ;;  %v4229_v15 = vadd.f32 %v4228_v18, %v9077_v33 }
 0x3d1   :  { %6035 = vmatpush3.msra.mxu1 %v8659_v16  ;;  %v9082_v16 = vld [vmem:[#allocation43_spill] sm:$0xff] }
 0x3d2   :  { %6036 = vmatprep.subr.mxu1 %v4245_v55 }
 0x3d3   :  { %6037 = vmatpush3.msra.mxu1 %v8654_v9  ;;  %v9079_v9 = vld [vmem:[#allocation42_spill] sm:$0xff] }
 0x3d4   :  { %6038 = vmatprep.subr.mxu1 %v4240_v43 }
 0x3d5   :  { %6039 = vmatpush3.msra.mxu1 %v8646_v7  ;;  %v9081_v7 = vld [vmem:[#allocation44_spill] sm:$0xff] }
 0x3d6   :  { %6040 = vmatprep.subr.mxu1 %v4237_v27 }
 0x3d7   :  { %6041 = vmatpush3.msra.mxu1 %v8639_v54  ;;  %v9084_v54 = vld [vmem:[#allocation45_spill] sm:$0xff] }
 0x3d8   :  { %6042 = vmatprep.subr.mxu1 %v4232_v35 }
 0x3d9   :  { %6043 = vmatpush3.msra.mxu1 %v8632_v63  ;;  %v9086_v63 = vld [vmem:[#allocation14_spill] sm:$0xff] }
 0x3da   :  { %6044 = vmatprep.subr.mxu1 %v4229_v15  ;;  %v4503_v29 = vadd.s32 8, %v9086_v63  ;;  %v4505_v1 = vadd.s32 24, %v9086_v63  ;;  %v4504_v39 = vadd.s32 16, %v9086_v63  ;;  %v4507_v17 = vadd.s32 40, %v9086_v63 }
 0x3db   :  { %6045 = vmatpush3.msra.mxu1 %v8627_v48  ;;  %v8750_v48 = vand.u32 127, %v9087_v19  ;;  %vm5444_vm9 = vcmp.eq.s32.totalorder %v9086_v63, 0  ;;  %vm5448_vm10 = vcmp.eq.s32.totalorder %v9086_v63, 1  ;;  %vm5452_vm11 = vcmp.eq.s32.totalorder %v9086_v63, 2 }
 0x3dc   :  { %4461 = vmatmul.mubr.f32.vlgmr.msra.gmra.mxu1 %v9078_v62  ;;  %v4567_v22 = vadd.s32 120, %v4503_v29  ;;  %v4649_v60 = vadd.s32 360, %v4505_v1  ;;  %v4608_v57 = vadd.s32 240, %v4504_v39  ;;  %v4731_v25 = vadd.s32 600, %v4507_v17 }
 0x3dd   :  { %4465 = vmatprep.mubr.f32.mxu1 %v9079_v9  ;;  %v4824_v32 = vadd.s32 128, %v8750_v48  ;;  %vm4831_vm1 = vcmp.eq.s32.totalorder %v8750_v48, %v9086_v63  ;;  %v4826_v6 = vadd.s32 384, %v8750_v48  ;;  %v4825_v23 = vadd.s32 256, %v8750_v48 }
 0x3de   :  { %v4828_v55 = vadd.s32 640, %v8750_v48  ;;  %vm5456_vm12 = vcmp.eq.s32.totalorder %v9086_v63, 3  ;;  %vm5460_vm13 = vcmp.eq.s32.totalorder %v9086_v63, 4  ;;  %vm5464_vm14 = vcmp.eq.s32.totalorder %v9086_v63, 5 }
 0x3df   :  { %vm4840_vm0 = vcmp.eq.s32.totalorder %v4824_v32, %v4567_v22  ;;  %vm4858_vm2 = vcmp.eq.s32.totalorder %v4826_v6, %v4649_v60  ;;  %vm4849_vm4 = vcmp.eq.s32.totalorder %v4825_v23, %v4608_v57  ;;  %vm5468_vm15 = vcmp.eq.s32.totalorder %v9086_v63, 6 }
 0x3e0   :  { %4466 = vmatmul.mubr.f32.gmra.mxu1 %v9080_v20  ;;  %5911 = vmatprep.subr.msk.mxu1 %vm4840_vm0, %v6782_v40  ;;  %vm4876_vm5 = vcmp.eq.s32.totalorder %v4828_v55, %v4731_v25  ;;  %v5470_v57 = vstv %s5956_s10  ;;  %vm5472_vm0 = vcmp.eq.s32.totalorder %v9086_v63, 7 }
 0x3e1   :  { %4470 = vmatprep.mubr.f32.mxu1 %v9081_v7  ;;  %5077 = vmatpush1.msra.mxu1 %v6783_v31 }
 0x3e2   :  { %5078 = vmatprep.subr.mxu1 %v6783_v31 }
 0x3e3   :  { %5912 = vmatpush1.msk.msra.mxu1 %vm4831_vm1, %v6782_v40 }
 0x3e4   :  { %4471 = vmatmul.mubr.f32.gmra.mxu1 %v9082_v16  ;;  %5921 = vmatprep.subr.msk.mxu1 %vm4858_vm2, %v6782_v40 }
 0x3e5   :  { %4475 = vmatprep.mubr.f32.mxu1 %v9083_v21 }
 0x3e8   :  { %4476 = vmatmul.mubr.f32.gmra.mxu1 %v9084_v54 }
 0x3e9   :  { %4480 = vmatprep.mubr.f32.mxu1 %v9085_v34 }
 0x3ec   :  { %4481 = vmatmul.mubr.f32.gmra.mxu1 %v9088_v36 }
 0x3ed   :  { %4485 = vmatprep.mubr.f32.mxu1 %v9089_v41 }
 0x3f0   :  { %4486 = vmatmul.mubr.f32.gmra.mxu1 %v9090_v56 }
 0x3f1   :  { %4490 = vmatprep.mubr.f32.mxu1 %v9091_v24 }
 0x3f4   :  { %4491 = vmatmul.mubr.f32.gmra.mxu1 %v9092_v38 }
 0x3f5   :  { %4495 = vmatprep.mubr.f32.mxu1 %v9093_v10 }
 0x3f8   :  { %4496 = vmatmul.mubr.f32.gmra.mxu1 %v9094_v52 }
 0x3f9   :  { %5112 = vmatprep.mubr.f32.mxu1 %v6783_v31 }
 0x44c   :  { %v5990_v18 = vpop.f32.mrf.mxu1 }
 0x44e   :  { %v5991_v46 = vpop.f32.mrf.mxu1 }
 0x44f   :  { %v5992_v49 = vadd.f32 %v5991_v46, %v5990_v18  ;;  %v4506_v46 = vadd.s32 32, %v9086_v63 }
 0x450   :  { %v5993_v3 = vpop.f32.mrf.mxu1 }
 0x452   :  { %v5994_v14 = vpop.f32.mrf.mxu1 }
 0x453   :  { %v5995_v2 = vadd.f32 %v5994_v14, %v5993_v3  ;;  %v4690_v14 = vadd.s32 480, %v4506_v46 }
 0x454   :  { %v5996_v11 = vpop.f32.mrf.mxu1 }
 0x456   :  { %v5997_v42 = vpop.f32.mrf.mxu1 }
 0x457   :  { %v5998_v59 = vadd.f32 %v5997_v42, %v5996_v11  ;;  %v4827_v11 = vadd.s32 512, %v8750_v48  ;;  %v4509_v42 = vadd.s32 56, %v9086_v63 }
 0x458   :  { %v5999_v30 = vpop.f32.mrf.mxu1 }
 0x459   :  { %vm4867_vm6 = vcmp.eq.s32.totalorder %v4827_v11, %v4690_v14 }
 0x45a   :  { %v6000_v50 = vpop.f32.mrf.mxu1 }
 0x45b   :  { %v6001_v9 = vadd.f32 %v6000_v50, %v5999_v30  ;;  %v4813_v30 = vadd.s32 840, %v4509_v42  ;;  %v4830_v50 = vadd.s32 896, %v8750_v48 }
 0x45c   :  { %v6002_v53 = vpop.f32.mrf.mxu1 }
 0x45d   :  { %vm4894_vm7 = vcmp.eq.s32.totalorder %v4830_v50, %v4813_v30 }
 0x45e   :  { %v6003_v44 = vpop.f32.mrf.mxu1 }
 0x45f   :  { %v6004_v54 = vadd.f32 %v6003_v44, %v6002_v53  ;;  %v4508_v53 = vadd.s32 48, %v9086_v63 }
 0x460   :  { %v6005_v8 = vpop.f32.mrf.mxu1 }
 0x461   :  { %v4772_v44 = vadd.s32 720, %v4508_v53 }
 0x462   :  { %v6006_v26 = vpop.f32.mrf.mxu1 }
 0x463   :  { %v6007_v41 = vadd.f32 %v6006_v26, %v6005_v8  ;;  %v4829_v8 = vadd.s32 768, %v8750_v48 }
 0x464   :  { %v8770_v5 = vpop.f32.mrf.mxu1 }
 0x465   :  { %vm4885_vm8 = vcmp.eq.s32.totalorder %v4829_v8, %v4772_v44 }
 0x466   :  { %v6009_v12 = vpop.f32.mrf.mxu1 }
 0x467   :  { %v6010_v38 = vadd.f32 %v6009_v12, %v8770_v5  ;;  %v5450_v5 = vstv %s5951_s29 }
 0x468   :  { %v8772_v61 = vpop.f32.mrf.mxu1 }
 0x46a   :  { %v8774_v4 = vpop.f32.mrf.mxu1 }
 0x46b   :  { %v6013_v60 = vadd.f32 %v8774_v4, %v8772_v61  ;;  %v5454_v61 = vstv %s5952_s30  ;;  %v5458_v4 = vstv %s5953_s0 }
 0x49c   :  { %v6046_v13 = vpop.f32.mrf.mxu1 }
 0x49e   :  { %v6047_v0 = vpop.f32.mrf.mxu1 }
 0x49f   :  { %v6048_v47 = vadd.f32 %v6047_v0, %v6046_v13  ;;  %v5462_v13 = vstv %s5954_s8 }
 0x4a0   :  { %v6049_v45 = vpop.f32.mrf.mxu1 }
 0x4a1   :  { %v8779_v28 = vadd.f32 %v6048_v47, %v5992_v49  ;;  %v5466_v49 = vstv %s5955_s9 }
 0x4a2   :  { %v6050_v37 = vpop.f32.mrf.mxu1 }
 0x4a3   :  { %v6051_v51 = vadd.f32 %v6050_v37, %v6049_v45  ;;  %5913 = vmatmul.mubr.msk.f32.vlgmr.msra.gmra.mxu1 %vm5023_vm3, %v8779_v28  ;;  %v5474_v45 = vstv %s5957_s11 }
 0x4a4   :  { %v6052_v58 = vpop.f32.mrf.mxu1  ;;  %5172 = vmatpush1.msra.mxu1 %v6783_v31  ;;  %5117 = vmatprep.mubr.f32.mxu1 %v6783_v31 }
 0x4a5   :  { %v8786_v43 = vadd.f32 %v6051_v51, %v5995_v2  ;;  %5173 = vmatprep.subr.mxu1 %v6783_v31 }
 0x4a6   :  { %v6053_v27 = vpop.f32.mrf.mxu1  ;;  %5922 = vmatpush1.msk.msra.mxu1 %vm4849_vm4, %v6782_v40 }
 0x4a7   :  { %v6054_v35 = vadd.f32 %v6053_v27, %v6052_v58  ;;  %5914 = vmatmul.mubr.msk.f32.gmra.mxu1 %vm5023_vm3, %v8786_v43  ;;  %5175 = vmatprep.subr.mxu1 %v6783_v31 }
 0x4a8   :  { %v6055_v33 = vpop.f32.mrf.mxu1  ;;  %5122 = vmatprep.mubr.f32.mxu1 %v6783_v31  ;;  %5176 = vmatpush1.msra.mxu1 %v6783_v31 }
 0x4a9   :  { %v8795_v15 = vadd.f32 %v6054_v35, %v5998_v59  ;;  %5177 = vmatprep.subr.mxu1 %v6783_v31 }
 0x4aa   :  { %v6056_v62 = vpop.f32.mrf.mxu1  ;;  %5178 = vmatpush1.msra.mxu1 %v6783_v31 }
 0x4ab   :  { %v6057_v20 = vadd.f32 %v6056_v62, %v6055_v33  ;;  %5915 = vmatmul.mubr.msk.f32.gmra.mxu1 %vm5023_vm3, %v8795_v15  ;;  %5931 = vmatprep.subr.msk.mxu1 %vm4876_vm5, %v6782_v40 }
 0x4ac   :  { %v6058_v7 = vpop.f32.mrf.mxu1  ;;  %5126 = vmatprep.mubr.f32.mxu1 %v6783_v31 }
 0x4ad   :  { %v8803_v16 = vadd.f32 %v6057_v20, %v6001_v9 }
 0x4ae   :  { %v6059_v21 = vpop.f32.mrf.mxu1 }
 0x4af   :  { %v6060_v34 = vadd.f32 %v6059_v21, %v6058_v7  ;;  %5916 = vmatmul.mubr.msk.f32.gmra.mxu1 %vm5023_vm3, %v8803_v16 }
 0x4b0   :  { %v6061_v29 = vpop.f32.mrf.mxu1  ;;  %5130 = vmatprep.mubr.f32.mxu1 %v6783_v31 }
 0x4b1   :  { %v8808_v19 = vadd.f32 %v6060_v34, %v6004_v54 }
 0x4b2   :  { %v6062_v36 = vpop.f32.mrf.mxu1 }
 0x4b3   :  { %v6063_v22 = vadd.f32 %v6062_v36, %v6061_v29  ;;  %5917 = vmatmul.mubr.msk.f32.gmra.mxu1 %vm5023_vm3, %v8808_v19 }
 0x4b4   :  { %v6064_v32 = vpop.f32.mrf.mxu1  ;;  %5134 = vmatprep.mubr.f32.mxu1 %v6783_v31 }
 0x4b5   :  { %v8813_v56 = vadd.f32 %v6063_v22, %v6007_v41 }
 0x4b6   :  { %v6065_v24 = vpop.f32.mrf.mxu1 }
 0x4b7   :  { %v6066_v10 = vadd.f32 %v6065_v24, %v6064_v32  ;;  %5918 = vmatmul.mubr.msk.f32.gmra.mxu1 %vm5023_vm3, %v8813_v56 }
 0x4b8   :  { %v6067_v52 = vpop.f32.mrf.mxu1  ;;  %5138 = vmatprep.mubr.f32.mxu1 %v6783_v31 }
 0x4b9   :  { %v8819_v1 = vadd.f32 %v6066_v10, %v6010_v38 }
 0x4ba   :  { %v6068_v6 = vpop.f32.mrf.mxu1 }
 0x4bb   :  { %v6069_v18 = vadd.f32 %v6068_v6, %v6067_v52  ;;  %5919 = vmatmul.mubr.msk.f32.gmra.mxu1 %vm5023_vm3, %v8819_v1 }
 0x4bc   :  { %5142 = vmatprep.mubr.f32.mxu1 %v6783_v31 }
 0x4bd   :  { %v8827_v3 = vadd.f32 %v6069_v18, %v6013_v60 }
 0x4bf   :  { %5920 = vmatmul.mubr.msk.f32.gmra.mxu1 %vm5023_vm3, %v8827_v3 }
 0x4c0   :  { %5211 = vmatprep.mubr.f32.mxu1 %v6783_v31 }
 0x4c3   :  { %5923 = vmatmul.mubr.msk.f32.vlgmr.msra.gmra.mxu1 %vm5023_vm3, %v8779_v28 }
 0x4c4   :  { %5267 = vmatpush1.msra.mxu1 %v6783_v31  ;;  %5215 = vmatprep.mubr.f32.mxu1 %v6783_v31 }
 0x4c5   :  { %5268 = vmatprep.subr.mxu1 %v6783_v31 }
 0x4c6   :  { %5932 = vmatpush1.msk.msra.mxu1 %vm4867_vm6, %v6782_v40 }
 0x4c7   :  { %5924 = vmatmul.mubr.msk.f32.gmra.mxu1 %vm5023_vm3, %v8786_v43  ;;  %5270 = vmatprep.subr.mxu1 %v6783_v31 }
 0x4c8   :  { %5219 = vmatprep.mubr.f32.mxu1 %v6783_v31  ;;  %5271 = vmatpush1.msra.mxu1 %v6783_v31 }
 0x4c9   :  { %5272 = vmatprep.subr.mxu1 %v6783_v31 }
 0x4ca   :  { %5273 = vmatpush1.msra.mxu1 %v6783_v31 }
 0x4cb   :  { %5925 = vmatmul.mubr.msk.f32.gmra.mxu1 %vm5023_vm3, %v8795_v15  ;;  %5274 = vmatprep.subr.mxu1 %v6783_v31 }
 0x4cc   :  { %5224 = vmatprep.mubr.f32.mxu1 %v6783_v31  ;;  %5275 = vmatpush1.msra.mxu1 %v6783_v31 }
 0x4cd   :  { %5276 = vmatprep.subr.mxu1 %v6783_v31 }
 0x4ce   :  { %5277 = vmatpush1.msra.mxu1 %v6783_v31 }
 0x4cf   :  { %5926 = vmatmul.mubr.msk.f32.gmra.mxu1 %vm5023_vm3, %v8803_v16  ;;  %5941 = vmatprep.subr.msk.mxu1 %vm4894_vm7, %v6782_v40 }
 0x4d0   :  { %5229 = vmatprep.mubr.f32.mxu1 %v6783_v31 }
 0x4d3   :  { %5927 = vmatmul.mubr.msk.f32.gmra.mxu1 %vm5023_vm3, %v8808_v19 }
 0x4d4   :  { %5233 = vmatprep.mubr.f32.mxu1 %v6783_v31 }
 0x4d7   :  { %5928 = vmatmul.mubr.msk.f32.gmra.mxu1 %vm5023_vm3, %v8813_v56 }
 0x4d8   :  { %5237 = vmatprep.mubr.f32.mxu1 %v6783_v31 }
 0x4db   :  { %5929 = vmatmul.mubr.msk.f32.gmra.mxu1 %vm5023_vm3, %v8819_v1 }
 0x4dc   :  { %5241 = vmatprep.mubr.f32.mxu1 %v6783_v31 }
 0x4df   :  { %5930 = vmatmul.mubr.msk.f32.gmra.mxu1 %vm5023_vm3, %v8827_v3 }
 0x4e0   :  { %5310 = vmatprep.mubr.f32.mxu1 %v6783_v31 }
 0x4e3   :  { %5933 = vmatmul.mubr.msk.f32.vlgmr.msra.gmra.mxu1 %vm5023_vm3, %v8779_v28 }
 0x4e4   :  { %5362 = vmatpush1.msra.mxu1 %v6783_v31  ;;  %5314 = vmatprep.mubr.f32.mxu1 %v6783_v31 }
 0x4e5   :  { %5363 = vmatprep.subr.mxu1 %v6783_v31 }
 0x4e6   :  { %5942 = vmatpush1.msk.msra.mxu1 %vm4885_vm8, %v6782_v40  ;;  %v5446_v40 = vstv %s5445_s6 }
 0x4e7   :  { %5934 = vmatmul.mubr.msk.f32.gmra.mxu1 %vm5023_vm3, %v8786_v43  ;;  %5365 = vmatprep.subr.mxu1 %v6783_v31  ;;  %v5447_v26 = vsel %vm5444_vm9, %v5446_v40, 0 }
 0x4e8   :  { %5318 = vmatprep.mubr.f32.mxu1 %v6783_v31  ;;  %5366 = vmatpush1.msra.mxu1 %v6783_v31  ;;  %v5451_v12 = vsel %vm5448_vm10, %v5450_v5, %v5447_v26 }
 0x4e9   :  { %5367 = vmatprep.subr.mxu1 %v6783_v31 }
 0x4ea   :  { %5368 = vmatpush1.msra.mxu1 %v6783_v31 }
 0x4eb   :  { %5935 = vmatmul.mubr.msk.f32.gmra.mxu1 %vm5023_vm3, %v8795_v15  ;;  %5369 = vmatprep.subr.mxu1 %v6783_v31 }
 0x4ec   :  { %5322 = vmatprep.mubr.f32.mxu1 %v6783_v31  ;;  %5370 = vmatpush1.msra.mxu1 %v6783_v31 }
 0x4ed   :  { %5371 = vmatprep.subr.mxu1 %v6783_v31 }
 0x4ee   :  { %5372 = vmatpush1.msra.mxu1 %v6783_v31 }
 0x4ef   :  { %5936 = vmatmul.mubr.msk.f32.gmra.mxu1 %vm5023_vm3, %v8803_v16  ;;  %5373 = vmatprep.subr.mxu1 %v6783_v31 }
 0x4f0   :  { %5326 = vmatprep.mubr.f32.mxu1 %v6783_v31  ;;  %5374 = vmatpush1.msra.mxu1 %v6783_v31 }
 0x4f1   :  { %5375 = vmatprep.subr.mxu1 %v6783_v31 }
 0x4f2   :  { %5376 = vmatpush1.msra.mxu1 %v6783_v31 }
 0x4f3   :  { %5937 = vmatmul.mubr.msk.f32.gmra.mxu1 %vm5023_vm3, %v8808_v19 }
 0x4f4   :  { %5331 = vmatprep.mubr.f32.mxu1 %v6783_v31 }
 0x4f7   :  { %5938 = vmatmul.mubr.msk.f32.gmra.mxu1 %vm5023_vm3, %v8813_v56 }
 0x4f8   :  { %5336 = vmatprep.mubr.f32.mxu1 %v6783_v31 }
 0x4fb   :  { %5939 = vmatmul.mubr.msk.f32.gmra.mxu1 %vm5023_vm3, %v8819_v1 }
 0x4fc   :  { %5340 = vmatprep.mubr.f32.mxu1 %v6783_v31 }
 0x4ff   :  { %5940 = vmatmul.mubr.msk.f32.gmra.mxu1 %vm5023_vm3, %v8827_v3 }
 0x500   :  { %5409 = vmatprep.mubr.f32.mxu1 %v6783_v31 }
 0x503   :  { %5943 = vmatmul.mubr.msk.f32.vlgmr.msra.gmra.mxu1 %vm5023_vm3, %v8779_v28  ;;  %v6784_v28 = vmov -2000.0  }
 0x504   :  { %5413 = vmatprep.mubr.f32.mxu1 %v6783_v31 }
 0x507   :  { %5944 = vmatmul.mubr.msk.f32.gmra.mxu1 %vm5023_vm3, %v8786_v43 }
 0x508   :  { %5417 = vmatprep.mubr.f32.mxu1 %v6783_v31 }
 0x50b   :  { %5945 = vmatmul.mubr.msk.f32.gmra.mxu1 %vm5023_vm3, %v8795_v15 }
 0x50c   :  { %5421 = vmatprep.mubr.f32.mxu1 %v6783_v31 }
 0x50f   :  { %5946 = vmatmul.mubr.msk.f32.gmra.mxu1 %vm5023_vm3, %v8803_v16 }
 0x510   :  { %5425 = vmatprep.mubr.f32.mxu1 %v6783_v31 }
 0x513   :  { %5947 = vmatmul.mubr.msk.f32.gmra.mxu1 %vm5023_vm3, %v8808_v19 }
 0x514   :  { %5429 = vmatprep.mubr.f32.mxu1 %v6783_v31 }
 0x517   :  { %5948 = vmatmul.mubr.msk.f32.gmra.mxu1 %vm5023_vm3, %v8813_v56 }
 0x518   :  { %5433 = vmatprep.mubr.f32.mxu1 %v6783_v31 }
 0x51b   :  { %5949 = vmatmul.mubr.msk.f32.gmra.mxu1 %vm5023_vm3, %v8819_v1 }
 0x51c   :  { %5438 = vmatprep.mubr.f32.mxu1 %v6783_v31  ;;  %v5455_v31 = vsel %vm5452_vm11, %v5454_v61, %v5451_v12 }
 0x51d   :  { %v5459_v39 = vsel %vm5456_vm12, %v5458_v4, %v5455_v31 }
 0x51e   :  { %v5463_v0 = vsel %vm5460_vm13, %v5462_v13, %v5459_v39 }
 0x51f   :  { %5950 = vmatmul.mubr.msk.f32.gmra.mxu1 %vm5023_vm3, %v8827_v3  ;;  %v5467_v47 = vsel %vm5464_vm14, %v5466_v49, %v5463_v0 }
 0x520   :  { %v5471_v23 = vsel %vm5468_vm15, %v5470_v57, %v5467_v47 }
 0x521   :  { %v5475_v17 = vsel %vm5472_vm0, %v5474_v45, %v5471_v23 }
 0x522   :  { %vm5476_vm1 = vcmp.gt.s32.totalorder %v5475_v17, %v8750_v48 }
 0x523   :  { %v8944_v37 = vsel %vm5476_vm1, 0.0, %v6784_v28 }
 0x563   :  { %v5114_v2 = vpop.f32.mrf.mxu1 }
 0x564   :  { %v5478_v51 = vadd.f32 %v8944_v37, %v5114_v2 }
 0x565   :  { %v5116_v58 = vpop.f32.mrf.mxu1 }
 0x566   :  { %5479 = vst [vmem:[#allocation9] sm:$0xff] %v5478_v51 }
 0x567   :  { %v5119_v25 = vpop.f32.mrf.mxu1 }
 0x569   :  { %v5120_v55 = vpop.f32.mrf.mxu1 }
 0x56a   :  { %v5480_v43 = vadd.f32 %v8944_v37, %v5120_v55 }
 0x56b   :  { %v5124_v27 = vpop.f32.mrf.mxu1 }
 0x56c   :  { %5482 = vst [vmem:[#allocation9 + $0x8] sm:$0xff] %v5480_v43 }
 0x56d   :  { %v5125_v59 = vpop.f32.mrf.mxu1 }
 0x56f   :  { %v5128_v63 = vpop.f32.mrf.mxu1 }
 0x571   :  { %v5129_v35 = vpop.f32.mrf.mxu1 }
 0x573   :  { %v5132_v33 = vpop.f32.mrf.mxu1 }
 0x575   :  { %v5133_v15 = vpop.f32.mrf.mxu1 }
 0x577   :  { %v5136_v48 = vpop.f32.mrf.mxu1 }
 0x579   :  { %v5137_v62 = vpop.f32.mrf.mxu1 }
 0x57b   :  { %v5140_v9 = vpop.f32.mrf.mxu1 }
 0x57d   :  { %v5141_v20 = vpop.f32.mrf.mxu1 }
 0x57f   :  { %v5144_v7 = vpop.f32.mrf.mxu1 }
 0x581   :  { %v5145_v16 = vpop.f32.mrf.mxu1 }
 0x583   :  { %v5213_v21 = vpop.f32.mrf.mxu1 }
 0x585   :  { %v5214_v54 = vpop.f32.mrf.mxu1 }
 0x587   :  { %v5217_v34 = vpop.f32.mrf.mxu1 }
 0x589   :  { %v5218_v29 = vpop.f32.mrf.mxu1 }
 0x58b   :  { %v5221_v19 = vpop.f32.mrf.mxu1 }
 0x58c   :  { %v5483_v36 = vadd.f32 %v8944_v37, %v5221_v19 }
 0x58d   :  { %v5223_v41 = vpop.f32.mrf.mxu1 }
 0x58e   :  { %5485 = vst [vmem:[#allocation9 + $0x10] sm:$0xff] %v5483_v36 }
 0x58f   :  { %v5226_v22 = vpop.f32.mrf.mxu1 }
 0x591   :  { %v5227_v32 = vpop.f32.mrf.mxu1 }
 0x592   :  { %v5486_v56 = vadd.f32 %v8944_v37, %v5227_v32 }
 0x593   :  { %v5231_v24 = vpop.f32.mrf.mxu1 }
 0x594   :  { %5488 = vst [vmem:[#allocation9 + $0x18] sm:$0xff] %v5486_v56 }
 0x595   :  { %v5232_v38 = vpop.f32.mrf.mxu1 }
 0x597   :  { %v5235_v10 = vpop.f32.mrf.mxu1 }
 0x599   :  { %v5236_v52 = vpop.f32.mrf.mxu1 }
 0x59b   :  { %v5239_v1 = vpop.f32.mrf.mxu1 }
 0x59d   :  { %v5240_v6 = vpop.f32.mrf.mxu1 }
 0x59f   :  { %v5243_v60 = vpop.f32.mrf.mxu1 }
 0x5a1   :  { %v5244_v18 = vpop.f32.mrf.mxu1 }
 0x5a3   :  { %v5312_v46 = vpop.f32.mrf.mxu1 }
 0x5a5   :  { %v5313_v3 = vpop.f32.mrf.mxu1 }
 0x5a7   :  { %v5316_v14 = vpop.f32.mrf.mxu1 }
 0x5a9   :  { %v5317_v11 = vpop.f32.mrf.mxu1 }
 0x5ab   :  { %v5320_v42 = vpop.f32.mrf.mxu1 }
 0x5ad   :  { %v5321_v30 = vpop.f32.mrf.mxu1 }
 0x5af   :  { %v5324_v50 = vpop.f32.mrf.mxu1 }
 0x5b1   :  { %v5325_v53 = vpop.f32.mrf.mxu1 }
 0x5b3   :  { %v5328_v44 = vpop.f32.mrf.mxu1 }
 0x5b4   :  { %v5489_v8 = vadd.f32 %v8944_v37, %v5328_v44 }
 0x5b5   :  { %v5330_v40 = vpop.f32.mrf.mxu1 }
 0x5b6   :  { %5491 = vst [vmem:[#allocation9 + $0x20] sm:$0xff] %v5489_v8 }
 0x5b7   :  { %v5333_v26 = vpop.f32.mrf.mxu1 }
 0x5b9   :  { %v5334_v5 = vpop.f32.mrf.mxu1 }
 0x5ba   :  { %v5492_v12 = vadd.f32 %v8944_v37, %v5334_v5 }
 0x5bb   :  { %v5338_v61 = vpop.f32.mrf.mxu1 }
 0x5bc   :  { %5494 = vst [vmem:[#allocation9 + $0x28] sm:$0xff] %v5492_v12 }
 0x5bd   :  { %v5339_v31 = vpop.f32.mrf.mxu1 }
 0x5bf   :  { %v5342_v4 = vpop.f32.mrf.mxu1 }
 0x5c1   :  { %v5343_v39 = vpop.f32.mrf.mxu1 }
 0x5c3   :  { %v5411_v13 = vpop.f32.mrf.mxu1 }
 0x5c5   :  { %v5412_v0 = vpop.f32.mrf.mxu1 }
 0x5c7   :  { %v5415_v49 = vpop.f32.mrf.mxu1 }
 0x5c9   :  { %v5416_v47 = vpop.f32.mrf.mxu1 }
 0x5cb   :  { %v5419_v57 = vpop.f32.mrf.mxu1 }
 0x5cd   :  { %v5420_v23 = vpop.f32.mrf.mxu1 }
 0x5cf   :  { %v5423_v45 = vpop.f32.mrf.mxu1 }
 0x5d1   :  { %v5424_v17 = vpop.f32.mrf.mxu1 }
 0x5d3   :  { %v5427_v28 = vpop.f32.mrf.mxu1 }
 0x5d5   :  { %v5428_v2 = vpop.f32.mrf.mxu1 }
 0x5d7   :  { %v5431_v51 = vpop.f32.mrf.mxu1 }
 0x5d9   :  { %v5432_v58 = vpop.f32.mrf.mxu1 }
 0x5db   :  { %v5435_v25 = vpop.f32.mrf.mxu1 }
 0x5dc   :  { %v5495_v55 = vadd.f32 %v8944_v37, %v5435_v25 }
 0x5dd   :  { %v5437_v43 = vpop.f32.mrf.mxu1 }
 0x5de   :  { %5497 = vst [vmem:[#allocation9 + $0x30] sm:$0xff] %v5495_v55 }
 0x5df   :  { %v5440_v27 = vpop.f32.mrf.mxu1 }
 0x5e1   :  { %v5441_v59 = vpop.f32.mrf.mxu1 }
 0x5e2   :  { %v5498_v63 = vadd.f32 %v8944_v37, %v5441_v59 }
 0x5e4   :  { %5500 = vst [vmem:[#allocation9 + $0x38] sm:$0xff] %v5498_v63 }
 0x5e5   :  { %6757 = shalt.err (!%p6754_p5)
}
 0x5e6   :  { %s6786_s14 = smov 128   ;;  %s6787_s15 = smov 8  }
 0x5e7   :  { %5512 = dma.vmem_to_hbm [thread:$0]  %s5507_s12, 1024, %s8964_s7, [#allocation6], %s6786_s14, %s6786_s14, %s6787_s15  }
 0x5e8   :  { %6772 = dma.done.wait [#allocation6], 1024  }
 0x5e9   :  { %6773 = vsyncadd [#allocation6], 4294966272 }
 0x5ea   :  { %5516 = vsyncpa [#allocation5], 1 }
 0x5eb   :  { %5517 = vsyncpa [#allocation8], 1 }
 0x5ec   :  { %5518 = vsyncpa [#allocation6], 1 }

</bundles_post_ra>
